<compile_context>
chip_gen: v6e
topology: v6e:2x2x1
jax: 0.10.0
libtpu: 0.0.40
codegen_flags: <defaults>
</compile_context>

<pallas_src>
import functools
import math

import numpy as np

import jax
import jax.numpy as jnp
from jax.experimental import pallas as pl
from jax.experimental.pallas import tpu as pltpu


def _round_up(x, m):
    return ((x + m - 1) // m) * m


def _choose_pack(state_dim):
    """How many logical rows to pack into one lane-dense row."""
    lane_width = (state_dim * 128) // math.gcd(state_dim, 128)  # lcm
    # Guard: the (lane_width, lane_width) f32 averaging matrix must stay small.
    if lane_width * lane_width * 4 > 8 * 1024 * 1024:
        return 1, state_dim            # lane-sparse fallback for huge state_dim
    return lane_width // state_dim, lane_width


def _build_avg_matrix(state_dim, x_sz, space_dim, pack):
    """Block-diagonal constant: mean_full = x_packed @ A (velocity cols = 0)."""
    n_particles = x_sz // space_dim
    i = np.arange(state_dim)[:, None]
    j = np.arange(state_dim)[None, :]
    a = np.where((i < x_sz) & (j < x_sz) & ((i % space_dim) == (j % space_dim)),
                 np.float32(1.0 / n_particles), np.float32(0.0)).astype(np.float32)
    if pack > 1:
        a = np.kron(np.eye(pack, dtype=np.float32), a)
    return jnp.asarray(a)


def _default_block_rows(packed_rows, lane_width, itemsize):
    """Largest row tile that keeps in+out double-buffered VMEM in budget."""
    min_sub = 8 * (4 // itemsize)               # 8 f32 / 16 bf16 / 32 int8
    lanes_padded = _round_up(lane_width, 128)   # VMEM pads the lane dim to 128
    budget = 16 * 1024 * 1024                   # 4 tiles (in+out, double-buffered)
    per_row = 4 * lanes_padded * itemsize
    cap = max(min_sub, (budget // per_row) // min_sub * min_sub)
    cap = min(2048, cap)                        # ~3 MiB/tile f32 at 384 lanes
    if packed_rows <= cap:
        # Whole batch fits in one tile.  Only split for v7x megacore when each
        # TensorCore gets enough rows to amortize the ~0.35 us/step overhead;
        # on v5e/v6e (single TC) and for small batches, one grid step.
        if packed_rows >= 1024:
            return _round_up(pl.cdiv(packed_rows, 2), min_sub)
        return packed_rows                      # block dim == full array dim
    return cap


def _subtract_mean_pos_kernel(avg_ref, xv_ref, out_ref):
    """avg_ref: (L, L) f32 constant; xv_ref/out_ref: (block_rows, L)."""
    xv = xv_ref[...].astype(jnp.float32)
    # Per-space-coordinate means via one constant matmul on the otherwise-idle
    # MXU.  Velocity columns of `avg` are zero -> mean_full is exactly 0 there.
    mean_full = jnp.dot(xv, avg_ref[...],
                        preferred_element_type=jnp.float32,
                        precision=jax.lax.Precision.HIGHEST)
    out_ref[...] = (xv - mean_full).astype(out_ref.dtype)


def subtract_mean_pos(xv, *, space_dim=1, block_rows=None):
    batch, state_dim = xv.shape
    x_sz = state_dim // 2
    assert state_dim == 2 * x_sz, "state_dim must be even (positions + velocities)"
    assert x_sz % space_dim == 0

    dtype = xv.dtype
    itemsize = jnp.dtype(dtype).itemsize
    pack, lane_width = _choose_pack(state_dim)

    # Pad batch to a multiple of `pack` (only when needed; one extra HBM pass).
    padded_batch = _round_up(batch, pack)
    xv_in = xv if padded_batch == batch else jnp.pad(
        xv, ((0, padded_batch - batch), (0, 0)))
    packed_rows = padded_batch // pack
    xv_packed = xv_in.reshape(packed_rows, pack * state_dim)  # free row-major view

    avg = _build_avg_matrix(state_dim, x_sz, space_dim, pack)

    if block_rows is None:
        block_rows = _default_block_rows(packed_rows, lane_width, itemsize)

    out_packed = pl.pallas_call(
        _subtract_mean_pos_kernel,
        out_shape=jax.ShapeDtypeStruct((packed_rows, lane_width), dtype),
        grid_spec=pltpu.PrefetchScalarGridSpec(
            num_scalar_prefetch=0,
            grid=(pl.cdiv(packed_rows, block_rows),),   # masked tail if uneven
            in_specs=[
                # Constant averaging matrix, resident across all grid steps.
                pl.BlockSpec((lane_width, lane_width), lambda i: (0, 0)),
                pl.BlockSpec((block_rows, lane_width), lambda i: (i, 0)),
            ],
            out_specs=pl.BlockSpec((block_rows, lane_width), lambda i: (i, 0)),
        ),
        compiler_params=pltpu.CompilerParams(
            dimension_semantics=("parallel",),
            # Worst case (f32, 2048-row tiles): 4 x 3 MiB data tiles + ~1.2 MiB
            # (double-buffered) avg matrix ~= 13 MiB, well under this limit and
            # under v7x's 32 MiB scoped / 64 MiB physical VMEM.
            vmem_limit_bytes=32 * 1024 * 1024,
        ),
    )(avg, xv_packed)

    out = out_packed.reshape(padded_batch, state_dim)
    if padded_batch != batch:
        out = out[:batch]
    return out


def subtract_mean_pos_ref(xv, *, space_dim=1):
    """Pure-JAX reference mirroring the PyTorch forward."""
    batch, state_dim = xv.shape
    x_sz = state_dim // 2
    x = xv[:, :x_sz].reshape(batch, -1, space_dim)
    x = x - x.mean(axis=1, keepdims=True)
    return jnp.concatenate([x.reshape(batch, x_sz), xv[:, x_sz:]], axis=1)


if __name__ == "__main__":
    # Shapes consistent with the module defaults: batch=32, state_dim=24.
    batch, state_dim = 32, 24
    key = jax.random.PRNGKey(0)
    xv = jax.random.normal(key, (batch, state_dim), dtype=jnp.float32)

    # space_dim = 1 (module default).
    out = jax.block_until_ready(subtract_mean_pos(xv, space_dim=1))
    ref = subtract_mean_pos_ref(xv, space_dim=1)
    assert out.shape == (batch, state_dim)
    assert jnp.allclose(out, ref, atol=1e-5, rtol=1e-5)

    # Uneven batch exercises the pad + masked-tail path.
    xv2 = jax.random.normal(jax.random.PRNGKey(0), (37, state_dim), dtype=jnp.float32)
    out2 = jax.block_until_ready(subtract_mean_pos(xv2, space_dim=1))
    ref2 = subtract_mean_pos_ref(xv2, space_dim=1)
    assert jnp.allclose(out2, ref2, atol=1e-5, rtol=1e-5)

    # space_dim > 1 exercises the general (strided) averaging matrix.
    out3 = jax.block_until_ready(subtract_mean_pos(xv, space_dim=3))
    ref3 = subtract_mean_pos_ref(xv, space_dim=3)
    assert jnp.allclose(out3, ref3, atol=1e-5, rtol=1e-5)

    # Velocities must pass through bit-exact.
    assert jnp.array_equal(out[:, state_dim // 2:], xv[:, state_dim // 2:])

    print("KERNEL_OK")
</pallas_src>

<mosaic_0001>
module attributes {stable_mosaic.version = 11 : i64} {
  func.func @_subtract_mean_pos_kernel(%arg0: i32, %arg1: memref<384x384xf32, #tpu.memory_space<vmem>>, %arg2: memref<2x384xf32, #tpu.memory_space<vmem>>, %arg3: memref<2x384xf32, #tpu.memory_space<vmem>>) attributes {dimension_semantics = [#tpu.dimension_semantics<parallel>], iteration_bounds = array<i64: 1>, scalar_prefetch = 0 : i64, scratch_operands = 0 : i64, tpu.core_type = #tpu.core_type<tc>, window_params = [{pipeline_mode = #tpu.pipeline_mode<synchronous>, transform_indices = @transform_0, window_bounds = array<i64: 384, 384>}, {transform_indices = @transform_1, window_bounds = array<i64: 2, 384>}, {transform_indices = @transform_2, window_bounds = array<i64: 2, 384>}]} {
    %c0 = arith.constant 0 : index
    %c0_0 = arith.constant 0 : index
    %0 = vector.load %arg2[%c0, %c0_0] : memref<2x384xf32, #tpu.memory_space<vmem>>, vector<2x384xf32>
    %c0_1 = arith.constant 0 : index
    %c0_2 = arith.constant 0 : index
    %1 = vector.load %arg1[%c0_1, %c0_2] : memref<384x384xf32, #tpu.memory_space<vmem>>, vector<384x384xf32>
    %cst = arith.constant dense<0.000000e+00> : vector<2x384xf32>
    %2 = tpu.matmul %0, %1, %cst {dimension_numbers = #tpu.dot_dimension_numbers<[1], [0], [0], [1], [0, 0, 1, 1], [], []>, precision = #tpu.contract_precision<fp32>} : vector<2x384xf32>, vector<384x384xf32>, vector<2x384xf32> -> vector<2x384xf32>
    %3 = arith.subf %0, %2 : vector<2x384xf32>
    %c0_3 = arith.constant 0 : index
    %c0_4 = arith.constant 0 : index
    %4 = vector.load %arg3[%c0_3, %c0_4] : memref<2x384xf32, #tpu.memory_space<vmem>>, vector<2x384xf32>
    tpu.vector_store %arg3[%c0_3, %c0_4], %3 {strides = array<i32>} : memref<2x384xf32, #tpu.memory_space<vmem>>, vector<2x384xf32>,
    return
  }
  func.func @transform_0(%arg0: i32) -> (i32, i32) {
    %c0_i32 = arith.constant 0 : i32
    %c0_i32_0 = arith.constant 0 : i32
    %c0_i32_1 = arith.constant 0 : i32
    return %c0_i32, %c0_i32_0 : i32, i32
  }
  func.func @transform_1(%arg0: i32) -> (i32, i32) {
    %c0_i32 = arith.constant 0 : i32
    %c0_i32_0 = arith.constant 0 : i32
    return %arg0, %c0_i32 : i32, i32
  }
  func.func @transform_2(%arg0: i32) -> (i32, i32) {
    %c0_i32 = arith.constant 0 : i32
    %c0_i32_0 = arith.constant 0 : i32
    return %arg0, %c0_i32 : i32, i32
  }
}

</mosaic_0001>

<bundles_post_ra>
// kernel: tpu_custom_call.1
= control target key start
LH: loop header
LB: loop body
LE: loop exit
PB: predicated region body
PF: predicated region fallthrough
CT: control target
= control target key end

     0   :  { %7 = vsyncpa [#allocation3], 0  ;;  %s7217_s0 = inlined_call_operand.hbm [shape: f32[384,384], index: 0, kind: input, shape index: {}]   ;;  %s7218_s1 = inlined_call_operand.hbm [shape: f32[2,384], index: 1, kind: input, shape index: {}]   ;;  %s7219_s2 = inlined_call_operand.hbm [shape: f32[2,384], index: 2, kind: output, shape index: {}]  }
   0x1   :  { %8 = vsyncpa [#allocation6], 0 }
   0x2   :  { %9 = vsyncpa [#allocation4], 0  ;;  %s4481_s9 = smov [#allocation2]  }
   0x3   :  { %s15_s10 = sshll.u32 %s4481_s9, 4  ;;  %s16_s10 = int_to_ptr.vmem [resolvable:$true] %s15_s10 }
   0x4   :  { %s4423_s11 = scalar_lea.vmem %s16_s10, 18432  ;;  %p4428_p1 = scmp.lt.s32.totalorder %s16_s10, %s16_s10 }
   0x5   :  { %p4424_p0 = scmp.ne.s32.totalorder %s16_s10, %s4423_s11  ;;  %p4429_p2 = scmp.lt.s32.totalorder %s4423_s11, %s4423_s11 }
   0x7   :  { %p4430_p3 = por %p4429_p2, %p4428_p1 }
   0x9   :  { %p4431_p4 = pnand %p4430_p3, %p4424_p0 }
   0xb   :  { %4434 = shalt.err (!%p4431_p4)
}
   0xc   :  { %s4482_s12 = smov 384   ;;  %s4483_s13 = smov 24  }
   0xd   :  { %21 = dma.hbm_to_vmem [thread:$0]  %s7217_s0, 18432, %s16_s10, [#allocation3], %s4482_s12, %s4482_s12, %s4483_s13  }
   0xe   :  { %s4484_s16 = smov [#allocation5]  }
   0xf   :  { %s28_s17 = sshll.u32 %s4484_s16, 4  ;;  %s29_s17 = int_to_ptr.vmem [resolvable:$true] %s28_s17 }
  0x10   :  { %s4443_s18 = scalar_lea.vmem %s29_s17, 96  ;;  %p4448_p6 = scmp.lt.s32.totalorder %s29_s17, %s29_s17 }
  0x11   :  { %p4444_p5 = scmp.ne.s32.totalorder %s29_s17, %s4443_s18  ;;  %p4449_p7 = scmp.lt.s32.totalorder %s4443_s18, %s4443_s18 }
  0x13   :  { %p4450_p8 = por %p4449_p7, %p4448_p6 }
  0x15   :  { %p4451_p9 = pnand %p4450_p8, %p4444_p5 }
  0x17   :  { %4454 = shalt.err (!%p4451_p9)
}
  0x18   :  { %31 = dma.hbm_to_vmem [thread:$0]  %s7218_s1, 96, %s29_s17, [#allocation6]  }
  0x19   :  { %4475 = dma.done.wait [#allocation3], 18432  }
  0x1a   :  { %4476 = vsyncadd [#allocation3], 4294948864 }
  0x1b   :  { %4477 = dma.done.wait [#allocation6], 96  }
  0x1c   :  { %4478 = vsyncadd [#allocation6], 4294967200  ;;  %v4485_v0 = vmov 1983009808   ;;  %v188_v2 = vlaneseq  ;;  %v85_v5 = vld [vmem:[#allocation2 + $0x170] sm:$0xff]  ;;  %v84_v6 = vld [vmem:[#allocation2 + $0x168] sm:$0xff] }
  0x1d   :  { %v186_v1 = vunpack.c.l.s4 %v4485_v0  ;;  %v82_v7 = vld [vmem:[#allocation2 + $0x158] sm:$0xff]  ;;  %v4510_v8 = vand.u32 4294901760, %v85_v5  ;;  %v4512_v9 = vand.u32 4294901760, %v84_v6  ;;  %v81_v11 = vld [vmem:[#allocation2 + $0x150] sm:$0xff]  ;;  %v79_v12 = vld [vmem:[#allocation2 + $0x140] sm:$0xff]  ;;  %vm4487_vm0 = vmmov 0  }
  0x1e   :  { %v189_v4 = vshrl.u32 %v188_v2, 7  ;;  %v4514_v10 = vand.u32 4294901760, %v82_v7  ;;  %v78_v13 = vld [vmem:[#allocation2 + $0x138] sm:$0xff]  ;;  %v4516_v14 = vand.u32 4294901760, %v81_v11  ;;  %v4518_v15 = vand.u32 4294901760, %v79_v12  ;;  %v76_v17 = vld [vmem:[#allocation2 + $0x128] sm:$0xff] }
  0x1f   :  { %v187_v3 = vunpack.c.0.s8 %v186_v1  ;;  %v4520_v16 = vand.u32 4294901760, %v78_v13  ;;  %v75_v18 = vld [vmem:[#allocation2 + $0x120] sm:$0xff]  ;;  %v4522_v19 = vld [vmem:[#allocation2 + $0x110] sm:$0xff]  ;;  %204 = vmatprep.subr.mxu0 %v4510_v8  ;;  %v4527_v21 = vand.u32 4294901760, %v76_v17  ;;  %v4535_v24 = vsub.f32 %v85_v5, %v4510_v8  ;;  %v4537_v25 = vld [vmem:[#allocation2 + $0x108] sm:$0xff]  ;;  %s4488_s0 = smov [#allocation7]  }
  0x20   :  { %v4529_v22 = vand.u32 4294901760, %v75_v18  ;;  %v4532_v23 = vand.u32 4294901760, %v4522_v19  ;;  %v4539_v26 = vld [vmem:[#allocation2 + $0xf8] sm:$0xff]  ;;  %v4541_v27 = vld [vmem:[#allocation2 + $0xf0] sm:$0xff]  ;;  %206 = vmatpush1.msra.mxu0 %v4512_v9  ;;  %v4545_v28 = vand.u32 4294901760, %v4537_v25  ;;  %v4548_v29 = vsub.f32 %v84_v6, %v4512_v9  ;;  %v4556_v32 = vld [vmem:[#allocation2 + $0xe0] sm:$0xff] }
  0x21   :  { %v4524_v20 = vsub.s32 %v187_v3, %v189_v4  ;;  %7563 = vst [vmem:[#allocation12_spill] sm:$0xff] %v4535_v24  ;;  %v4551_v30 = vand.u32 4294901760, %v4539_v26  ;;  %v4554_v31 = vsub.f32 %v82_v7, %v4514_v10  ;;  %v4558_v33 = vld [vmem:[#allocation2 + $0xd8] sm:$0xff]  ;;  %v4560_v34 = vld [vmem:[#allocation2 + $0xc8] sm:$0xff]  ;;  %208 = vmatprep.subr.mxu0 %v4514_v10  ;;  %v7232_v35 = vand.u32 4294901760, %v4535_v24  ;;  %v4582_v43 = vld [vmem:[#allocation2 + $0xc0] sm:$0xff] }
  0x22   :  { %v4565_v36 = vand.u32 4294901760, %v4541_v27  ;;  %v4568_v37 = vsub.f32 %v81_v11, %v4516_v14  ;;  %v4571_v38 = vand.u32 4294901760, %v4556_v32  ;;  %210 = vmatpush1.msra.mxu0 %v4516_v14  ;;  %v7231_v39 = vand.u32 4294901760, %v4548_v29  ;;  %v4606_v52 = vld [vmem:[#allocation2 + $0xb0] sm:$0xff]  ;;  %v4616_v57 = vld [vmem:[#allocation2 + $0xa8] sm:$0xff]  ;;  %v4623_v62 = vld [vmem:[#allocation2 + $0x98] sm:$0xff] }
  0x23   :  { %7562 = vst [vmem:[#allocation11_spill] sm:$0xff] %v4524_v20  ;;  %v7229_v40 = vand.u32 4294901760, %v4554_v31  ;;  %v4577_v41 = vsub.f32 %v79_v12, %v4518_v15  ;;  %v4580_v42 = vand.u32 4294901760, %v4558_v33  ;;  %212 = vmatprep.subr.mxu0 %v4518_v15  ;;  %v351_v44 = vsub.f32 %v4535_v24, %v7232_v35  ;;  %v4635_v3 = vld [vmem:[#allocation2 + $0x90] sm:$0xff]  ;;  %v4648_v11 = vld [vmem:[#allocation2 + $0x80] sm:$0xff]  ;;  %s3873_s1 = sshll.u32 %s4488_s0, 4  ;;  %s3874_s1 = int_to_ptr.vmem [resolvable:$true] %s3873_s1 }
  0x24   :  { %7564 = vst [vmem:[#allocation13_spill] sm:$0xff] %v4565_v36  ;;  %7565 = vst [vmem:[#allocation14_spill] sm:$0xff] %v4571_v38  ;;  %v7227_v45 = vand.u32 4294901760, %v4568_v37  ;;  %v4590_v46 = vsub.f32 %v78_v13, %v4520_v16  ;;  %v4593_v47 = vand.u32 4294901760, %v4560_v34  ;;  %214 = vmatpush1.msra.mxu0 %v4520_v16  ;;  %v357_v48 = vsub.f32 %v4548_v29, %v7231_v39  ;;  %v4749_v39 = vld [vmem:[#allocation2 + $0x30] sm:$0xff]  ;;  %s4455_s21 = scalar_lea.vmem %s3874_s1, 96  ;;  %p4460_p11 = scmp.lt.s32.totalorder %s3874_s1, %s3874_s1 }
  0x25   :  { %7566 = vst [vmem:[#allocation15_spill] sm:$0xff] %v4580_v42  ;;  %v363_v49 = vsub.f32 %v4554_v31, %v7229_v40  ;;  %v7226_v50 = vand.u32 4294901760, %v4577_v41  ;;  %v4604_v51 = vsub.f32 %v76_v17, %v4527_v21  ;;  %216 = vmatprep.subr.mxu0 %v4527_v21  ;;  %v352_v53 = vand.u32 4294901760, %v351_v44  ;;  %v4739_v40 = vld [vmem:[#allocation2 + $0x38] sm:$0xff]  ;;  %p4456_p10 = scmp.ne.s32.totalorder %s3874_s1, %s4455_s21  ;;  %p4461_p12 = scmp.lt.s32.totalorder %s4455_s21, %s4455_s21 }
  0x26   :  { %7567 = vst [vmem:[#allocation16_spill] sm:$0xff] %v4593_v47  ;;  %v369_v54 = vsub.f32 %v4568_v37, %v7227_v45  ;;  %v7224_v55 = vand.u32 4294901760, %v4590_v46  ;;  %v4614_v56 = vand.u32 4294901760, %v4582_v43  ;;  %218 = vmatpush1.msra.mxu0 %v4529_v22  ;;  %v358_v58 = vand.u32 4294901760, %v357_v48 }
  0x27   :  { %v364_v59 = vand.u32 4294901760, %v363_v49  ;;  %v375_v60 = vsub.f32 %v4577_v41, %v7226_v50  ;;  %v7222_v61 = vand.u32 4294901760, %v4604_v51  ;;  %220 = vmatprep.subr.mxu0 %v4532_v23  ;;  %353 = vmatprep.subr.mxu1 %v352_v53  ;;  %v4630_v1 = vsub.f32 %v75_v18, %v4529_v22  ;;  %v4726_v50 = vld [vmem:[#allocation2 + $0x48] sm:$0xff]  ;;  %p4462_p13 = por %p4461_p12, %p4460_p11 }
  0x28   :  { %7568 = vst [vmem:[#allocation17_spill] sm:$0xff] %v4614_v56  ;;  %v370_v63 = vand.u32 4294901760, %v369_v54  ;;  %v381_v0 = vsub.f32 %v4590_v46, %v7224_v55  ;;  %v4633_v2 = vand.u32 4294901760, %v4606_v52  ;;  %222 = vmatpush1.msra.mxu0 %v4545_v28  ;;  %359 = vmatpush1.msra.mxu1 %v358_v58  ;;  %v4643_v6 = vsub.f32 %v4522_v19, %v4532_v23  ;;  %v4659_v19 = vld [vmem:[#allocation2 + $0x78] sm:$0xff] }
  0x29   :  { %v376_v4 = vand.u32 4294901760, %v375_v60  ;;  %v387_v5 = vsub.f32 %v4604_v51, %v7222_v61  ;;  %v4646_v7 = vand.u32 4294901760, %v4616_v57  ;;  %224 = vmatprep.subr.mxu0 %v4551_v30  ;;  %365 = vmatprep.subr.mxu1 %v364_v59  ;;  %v7221_v13 = vand.u32 4294901760, %v4630_v1  ;;  %p4463_p0 = pnand %p4462_p13, %p4456_p10 }
  0x2a   :  { %7569 = vst [vmem:[#allocation18_spill] sm:$0xff] %v4633_v2  ;;  %v382_v12 = vand.u32 4294901760, %v381_v0  ;;  %v4654_v17 = vsub.f32 %v4537_v25, %v4545_v28  ;;  %v4657_v18 = vand.u32 4294901760, %v4623_v62  ;;  %226 = vmatpush1.msra.mxu0 %v4565_v36  ;;  %371 = vmatpush1.msra.mxu1 %v370_v63  ;;  %v7220_v48 = vand.u32 4294901760, %v4643_v6 }
  0x2b   :  { %7570 = vst [vmem:[#allocation19_spill] sm:$0xff] %v4646_v7  ;;  %v388_v44 = vand.u32 4294901760, %v387_v5  ;;  %v4665_v49 = vsub.f32 %v4539_v26, %v4551_v30  ;;  %v4668_v53 = vand.u32 4294901760, %v4635_v3  ;;  %228 = vmatprep.subr.mxu0 %v4571_v38  ;;  %377 = vmatprep.subr.mxu1 %v376_v4  ;;  %v393_v25 = vsub.f32 %v4630_v1, %v7221_v13  ;;  %v4682_v26 = vld [vmem:[#allocation2 + $0x68] sm:$0xff]  ;;  %v4705_v13 = vld [vmem:[#allocation2 + $0x60] sm:$0xff] }
  0x2c   :  { %7571 = vst [vmem:[#allocation20_spill] sm:$0xff] %v4657_v18  ;;  %v7223_v54 = vand.u32 4294901760, %v4654_v17  ;;  %v4677_v58 = vsub.f32 %v4541_v27, %v4565_v36  ;;  %v4680_v59 = vand.u32 4294901760, %v4648_v11  ;;  %230 = vmatpush1.msra.mxu0 %v4580_v42  ;;  %383 = vmatpush1.msra.mxu1 %v382_v12  ;;  %v399_v60 = vsub.f32 %v4643_v6, %v7220_v48 }
  0x2d   :  { %7572 = vst [vmem:[#allocation21_spill] sm:$0xff] %v4668_v53  ;;  %v7225_v63 = vand.u32 4294901760, %v4665_v49  ;;  %v4691_v0 = vsub.f32 %v4556_v32, %v4571_v38  ;;  %v4694_v27 = vand.u32 4294901760, %v4659_v19  ;;  %232 = vmatprep.subr.mxu0 %v4593_v47  ;;  %389 = vmatprep.subr.mxu1 %v388_v44  ;;  %v394_v4 = vand.u32 4294901760, %v393_v25  ;;  %v4829_v38 = vld [vmem:[#allocation2 + $0x2f0] sm:$0xff] }
  0x2e   :  { %7573 = vst [vmem:[#allocation22_spill] sm:$0xff] %v4680_v59  ;;  %v405_v5 = vsub.f32 %v4654_v17, %v7223_v54  ;;  %v7228_v12 = vand.u32 4294901760, %v4677_v58  ;;  %v4703_v48 = vsub.f32 %v4558_v33, %v4580_v42  ;;  %234 = vmatpush1.msra.mxu0 %v4614_v56  ;;  %v400_v32 = vand.u32 4294901760, %v399_v60  ;;  %v4715_v54 = vld [vmem:[#allocation2 + $0x50] sm:$0xff] }
  0x2f   :  { %7574 = vst [vmem:[#allocation23_spill] sm:$0xff] %v4694_v27  ;;  %v411_v44 = vsub.f32 %v4665_v49, %v7225_v63  ;;  %v7230_v25 = vand.u32 4294901760, %v4691_v0  ;;  %v4713_v61 = vand.u32 4294901760, %v4682_v26  ;;  %395 = vmatpush1.msra.mxu1 %v394_v4  ;;  %236 = vmatprep.subr.mxu0 %v4633_v2  ;;  %v4724_v63 = vsub.f32 %v4560_v34, %v4593_v47 }
  0x30   :  { %v406_v33 = vand.u32 4294901760, %v405_v5  ;;  %v417_v55 = vsub.f32 %v4677_v58, %v7228_v12  ;;  %v7233_v60 = vand.u32 4294901760, %v4703_v48  ;;  %401 = vmatprep.subr.mxu1 %v400_v32  ;;  %238 = vmatpush1.msra.mxu0 %v4646_v7  ;;  %v4733_v5 = vand.u32 4294901760, %v4705_v13 }
  0x31   :  { %7575 = vst [vmem:[#allocation24_spill] sm:$0xff] %v4713_v61  ;;  %v412_v45 = vand.u32 4294901760, %v411_v44  ;;  %v423_v4 = vsub.f32 %v4691_v0, %v7230_v25  ;;  %v4737_v12 = vsub.f32 %v4582_v43, %v4614_v56  ;;  %240 = vmatprep.subr.mxu0 %v4657_v18  ;;  %v4747_v25 = vand.u32 4294901760, %v4715_v54 }
  0x32   :  { %7576 = vst [vmem:[#allocation25_spill] sm:$0xff] %v4733_v5  ;;  %407 = vmatpush1.msra.mxu1 %v406_v33  ;;  %v418_v34 = vand.u32 4294901760, %v417_v55  ;;  %v429_v32 = vsub.f32 %v4703_v48, %v7233_v60  ;;  %242 = vmatpush1.msra.mxu0 %v4668_v53  ;;  %v4755_v55 = vsub.f32 %v4606_v52, %v4633_v2  ;;  %v4758_v35 = vand.u32 4294901760, %v4726_v50  ;;  %v4760_v60 = vld [vmem:[#allocation2 + $0x20] sm:$0xff] }
  0x33   :  { %7577 = vst [vmem:[#allocation26_spill] sm:$0xff] %v4747_v25  ;;  %413 = vmatprep.subr.mxu1 %v412_v45  ;;  %v424_v43 = vand.u32 4294901760, %v423_v4  ;;  %v7240_v33 = vand.u32 4294901760, %v4737_v12  ;;  %244 = vmatprep.subr.mxu0 %v4680_v59  ;;  %v7579_v45 = vand.u32 4294901760, %v4724_v63  ;;  %v4768_v4 = vsub.f32 %v4616_v57, %v4646_v7  ;;  %v4785_v57 = vld [vmem:[#allocation2 + $0x18] sm:$0xff] }
  0x34   :  { %7578 = vst [vmem:[#allocation27_spill] sm:$0xff] %v4758_v35  ;;  %419 = vmatpush1.msra.mxu1 %v418_v34  ;;  %v430_v44 = vand.u32 4294901760, %v429_v32  ;;  %v4771_v52 = vand.u32 4294901760, %v4739_v40  ;;  %246 = vmatpush1.msra.mxu0 %v4694_v27  ;;  %v4780_v2 = vsub.f32 %v4623_v62, %v4657_v18  ;;  %v4794_v32 = vand.u32 4294901760, %v4760_v60  ;;  %v4796_v62 = vld [vmem:[#allocation2 + $0x8] sm:$0xff] }
  0x35   :  { %v435_v56 = vsub.f32 %v4724_v63, %v7579_v45  ;;  %7580 = vst [vmem:[#allocation28_spill] sm:$0xff] %v4768_v4  ;;  %425 = vmatprep.subr.mxu1 %v424_v43  ;;  %v441_v34 = vsub.f32 %v4737_v12, %v7240_v33  ;;  %v4783_v45 = vand.u32 4294901760, %v4749_v39  ;;  %248 = vmatprep.subr.mxu0 %v4713_v61  ;;  %v7586_v47 = vand.u32 4294901760, %v4755_v55 }
  0x36   :  { %7581 = vst [vmem:[#allocation29_spill] sm:$0xff] %v4771_v52  ;;  %7582 = vst [vmem:[#allocation30_spill] sm:$0xff] %v4780_v2  ;;  %431 = vmatpush1.msra.mxu1 %v430_v44  ;;  %v4791_v33 = vsub.f32 %v4635_v3, %v4668_v53  ;;  %250 = vmatpush1.msra.mxu0 %v4733_v5  ;;  %v4805_v7 = vsub.f32 %v4648_v11, %v4680_v59  ;;  %v7588_v3 = vand.u32 4294901760, %v4768_v4 }
  0x37   :  { %7583 = vst [vmem:[#allocation31_spill] sm:$0xff] %v4783_v45  ;;  %v436_v43 = vand.u32 4294901760, %v435_v56  ;;  %7585 = vst [vmem:[#allocation33_spill] sm:$0xff] %v4794_v32  ;;  %v442_v18 = vand.u32 4294901760, %v441_v34  ;;  %v447_v44 = vsub.f32 %v4755_v55, %v7586_v47  ;;  %252 = vmatprep.subr.mxu0 %v4747_v25  ;;  %v4813_v34 = vand.u32 4294901760, %v4785_v57  ;;  %v4819_v56 = vld [vmem:[#allocation2] sm:$0xff] }
  0x38   :  { %7584 = vst [vmem:[#allocation32_spill] sm:$0xff] %v4791_v33  ;;  %7587 = vst [vmem:[#allocation34_spill] sm:$0xff] %v4805_v7  ;;  %v453_v53 = vsub.f32 %v4768_v4, %v7588_v3  ;;  %v4817_v47 = vsub.f32 %v4659_v19, %v4694_v27  ;;  %254 = vmatpush1.msra.mxu0 %v4758_v35  ;;  %v4827_v42 = vand.u32 4294901760, %v4796_v62  ;;  %v7593_v19 = vand.u32 4294901760, %v4791_v33 }
  0x39   :  { %437 = vmatprep.subr.mxu1 %v436_v43  ;;  %7589 = vst [vmem:[#allocation35_spill] sm:$0xff] %v4813_v34  ;;  %v448_v11 = vand.u32 4294901760, %v447_v44  ;;  %v7591_v43 = vand.u32 4294901760, %v4780_v2  ;;  %256 = vmatprep.subr.mxu0 %v4771_v52  ;;  %v4838_v27 = vsub.f32 %v4682_v26, %v4713_v61  ;;  %v4847_v36 = vand.u32 4294901760, %v4819_v56  ;;  %v4853_v44 = vld [vmem:[#allocation2 + $0x2d8] sm:$0xff] }
  0x3a   :  { %7590 = vst [vmem:[#allocation36_spill] sm:$0xff] %v4817_v47  ;;  %443 = vmatpush1.msra.mxu1 %v442_v18  ;;  %7592 = vst [vmem:[#allocation37_spill] sm:$0xff] %v4827_v42  ;;  %v454_v4 = vand.u32 4294901760, %v453_v53  ;;  %v465_v18 = vsub.f32 %v4791_v33, %v7593_v19  ;;  %258 = vmatpush1.msra.mxu0 %v4783_v45  ;;  %v7595_v53 = vand.u32 4294901760, %v4805_v7 }
  0x3b   :  { %v459_v59 = vsub.f32 %v4780_v2, %v7591_v43  ;;  %7594 = vst [vmem:[#allocation38_spill] sm:$0xff] %v4838_v27  ;;  %v4840_v43 = vld [vmem:[#allocation2 + $0x2e8] sm:$0xff]  ;;  %449 = vmatprep.subr.mxu1 %v448_v11  ;;  %7596 = vst [vmem:[#allocation39_spill] sm:$0xff] %v4847_v36  ;;  %v4851_v19 = vsub.f32 %v4705_v13, %v4733_v5  ;;  %260 = vmatprep.subr.mxu0 %v4794_v32 }
  0x3c   :  { %v471_v2 = vsub.f32 %v4805_v7, %v7595_v53  ;;  %455 = vmatpush1.msra.mxu1 %v454_v4  ;;  %v466_v26 = vand.u32 4294901760, %v465_v18  ;;  %v4861_v53 = vand.u32 4294901760, %v4829_v38  ;;  %v4863_v7 = vld [vmem:[#allocation2 + $0x2d0] sm:$0xff]  ;;  %262 = vmatpush1.msra.mxu0 %v4813_v34  ;;  %v4869_v18 = vsub.f32 %v4715_v54, %v4747_v25 }
  0x3d   :  { %v460_v3 = vand.u32 4294901760, %v459_v59  ;;  %7597 = vst [vmem:[#allocation40_spill] sm:$0xff] %v4851_v19  ;;  %v7598_v59 = vand.u32 4294901760, %v4817_v47  ;;  %v4872_v5 = vand.u32 4294901760, %v4840_v43  ;;  %264 = vmatprep.subr.mxu0 %v4827_v42  ;;  %v4882_v4 = vsub.f32 %v4726_v50, %v4758_v35  ;;  %v4899_v50 = vld [vmem:[#allocation2 + $0x2b8] sm:$0xff] }
  0x3e   :  { %7599 = vst [vmem:[#allocation41_spill] sm:$0xff] %v4861_v53  ;;  %v472_v13 = vand.u32 4294901760, %v471_v2  ;;  %7600 = vst [vmem:[#allocation42_spill] sm:$0xff] %v4869_v18  ;;  %v4885_v54 = vand.u32 4294901760, %v4853_v44  ;;  %266 = vmatpush1.msra.mxu0 %v4847_v36  ;;  %v7605_v25 = vand.u32 4294901760, %v4851_v19 }
  0x3f   :  { %v477_v11 = vsub.f32 %v4817_v47, %v7598_v59  ;;  %461 = vmatprep.subr.mxu1 %v460_v3  ;;  %7601 = vst [vmem:[#allocation43_spill] sm:$0xff] %v4872_v5  ;;  %v4874_v59 = vld [vmem:[#allocation2 + $0x2c0] sm:$0xff]  ;;  %v7602_v3 = vand.u32 4294901760, %v4838_v27  ;;  %7603 = vst [vmem:[#allocation44_spill] sm:$0xff] %v4882_v4  ;;  %v4894_v47 = vsub.f32 %v4739_v40, %v4771_v52  ;;  %268 = vmatprep.subr.mxu0 %v4861_v53  ;;  %v4910_v40 = vld [vmem:[#allocation2 + $0x2a8] sm:$0xff] }
  0x40   :  { %467 = vmatpush1.msra.mxu1 %v466_v26  ;;  %7604 = vst [vmem:[#allocation45_spill] sm:$0xff] %v4885_v54  ;;  %v489_v26 = vsub.f32 %v4851_v19, %v7605_v25  ;;  %v4905_v25 = vsub.f32 %v4749_v39, %v4783_v45  ;;  %v7610_v19 = vand.u32 4294901760, %v4869_v18  ;;  %270 = vmatpush2.msra.mxu0 %v4872_v5  ;;  %v4927_v45 = vand.u32 4294901760, %v4899_v50 }
  0x41   :  { %v478_v61 = vand.u32 4294901760, %v477_v11  ;;  %v483_v2 = vsub.f32 %v4838_v27, %v7602_v3  ;;  %473 = vmatprep.subr.mxu1 %v472_v13  ;;  %7606 = vst [vmem:[#allocation46_spill] sm:$0xff] %v4894_v47  ;;  %v4897_v3 = vand.u32 4294901760, %v4863_v7  ;;  %v7283_v13 = vand.u32 4294901760, %v4882_v4  ;;  %272 = vmatprep.subr.mxu0 %v4885_v54 }
  0x42   :  { %7608 = vst [vmem:[#allocation48_spill] sm:$0xff] %v4905_v25  ;;  %v4908_v11 = vand.u32 4294901760, %v4874_v59  ;;  %v490_v52 = vand.u32 4294901760, %v489_v26  ;;  %v495_v27 = vsub.f32 %v4869_v18, %v7610_v19  ;;  %7612 = vst [vmem:[#allocation51_spill] sm:$0xff] %v4927_v45  ;;  %v4931_v19 = vsub.f32 %v4785_v57, %v4813_v34 }
  0x43   :  { %7607 = vst [vmem:[#allocation47_spill] sm:$0xff] %v4897_v3  ;;  %479 = vmatpush1.msra.mxu1 %v478_v61  ;;  %v484_v35 = vand.u32 4294901760, %v483_v2  ;;  %v4919_v2 = vsub.f32 %v4760_v60, %v4794_v32  ;;  %v501_v39 = vsub.f32 %v4882_v4, %v7283_v13  ;;  %v4933_v61 = vld [vmem:[#allocation2 + $0x2a0] sm:$0xff]  ;;  %274 = vmatpush2.msra.mxu0 %v4897_v3  ;;  %v4941_v26 = vand.u32 4294901760, %v4910_v40  ;;  %v4943_v4 = vld [vmem:[#allocation2 + $0x290] sm:$0xff] }
  0x44   :  { %7609 = vst [vmem:[#allocation49_spill] sm:$0xff] %v4908_v11  ;;  %7613 = vst [vmem:[#allocation52_spill] sm:$0xff] %v4931_v19  ;;  %v496_v60 = vand.u32 4294901760, %v495_v27  ;;  %v7616_v57 = vand.u32 4294901760, %v4905_v25  ;;  %276 = vmatprep.subr.mxu0 %v4908_v11  ;;  %v4965_v27 = vsub.f32 %v4819_v56, %v4847_v36  ;;  %v4988_v36 = vld [vmem:[#allocation2 + $0x260] sm:$0xff] }
  0x45   :  { %7611 = vst [vmem:[#allocation50_spill] sm:$0xff] %v4919_v2  ;;  %485 = vmatprep.subr.mxu1 %v484_v35  ;;  %v7614_v35 = vand.u32 4294901760, %v4894_v47  ;;  %7615 = vst [vmem:[#allocation53_spill] sm:$0xff] %v4941_v26  ;;  %v502_v18 = vand.u32 4294901760, %v501_v39  ;;  %278 = vmatpush2.msra.mxu0 %v4927_v45 }
  0x46   :  { %491 = vmatpush1.msra.mxu1 %v490_v52  ;;  %v513_v34 = vsub.f32 %v4905_v25, %v7616_v57  ;;  %v4952_v52 = vsub.f32 %v4796_v62, %v4827_v42  ;;  %v4961_v57 = vand.u32 4294901760, %v4933_v61  ;;  %7620 = vst [vmem:[#allocation56_spill] sm:$0xff] %v4965_v27  ;;  %v4967_v25 = vld [vmem:[#allocation2 + $0x278] sm:$0xff]  ;;  %280 = vmatprep.subr.mxu0 %v4941_v26  ;;  %v4975_v42 = vand.u32 4294901760, %v4943_v4 }
  0x47   :  { %v507_v32 = vsub.f32 %v4894_v47, %v7614_v35  ;;  %v4954_v35 = vld [vmem:[#allocation2 + $0x288] sm:$0xff]  ;;  %497 = vmatprep.subr.mxu1 %v496_v60  ;;  %v7618_v47 = vand.u32 4294901760, %v4919_v2  ;;  %v7621_v60 = vand.u32 4294901760, %v4931_v19 }
  0x48   :  { %7617 = vst [vmem:[#allocation54_spill] sm:$0xff] %v4952_v52  ;;  %7619 = vst [vmem:[#allocation55_spill] sm:$0xff] %v4961_v57  ;;  %503 = vmatpush1.msra.mxu1 %v502_v18  ;;  %v514_v62 = vand.u32 4294901760, %v513_v34  ;;  %282 = vmatpush2.msra.mxu0 %v4961_v57  ;;  %v7306_v18 = vand.u32 4294901760, %v4965_v27  ;;  %v4983_v34 = vsub.f32 %v4829_v38, %v4861_v53  ;;  %v4999_v38 = vand.u32 4294901760, %v4967_v25 }
  0x49   :  { %v508_v13 = vand.u32 4294901760, %v507_v32  ;;  %v519_v39 = vsub.f32 %v4919_v2, %v7618_v47  ;;  %v525_v32 = vsub.f32 %v4931_v19, %v7621_v60  ;;  %7622 = vst [vmem:[#allocation57_spill] sm:$0xff] %v4975_v42  ;;  %v4977_v2 = vld [vmem:[#allocation2 + $0x270] sm:$0xff]  ;;  %v4986_v60 = vand.u32 4294901760, %v4954_v35  ;;  %284 = vmatprep.subr.mxu0 %v4975_v42 }
  0x4a   :  { %7623 = vst [vmem:[#allocation58_spill] sm:$0xff] %v4983_v34  ;;  %v7625_v19 = vand.u32 4294901760, %v4952_v52  ;;  %7627 = vst [vmem:[#allocation61_spill] sm:$0xff] %v4999_v38  ;;  %v537_v53 = vsub.f32 %v4965_v27, %v7306_v18  ;;  %v5019_v18 = vsub.f32 %v4863_v7, %v4897_v3  ;;  %v7632_v27 = vand.u32 4294901760, %v4983_v34 }
  0x4b   :  { %509 = vmatprep.subr.mxu1 %v508_v13  ;;  %v520_v56 = vand.u32 4294901760, %v519_v39  ;;  %7624 = vst [vmem:[#allocation59_spill] sm:$0xff] %v4986_v60  ;;  %v526_v47 = vand.u32 4294901760, %v525_v32  ;;  %v4996_v39 = vsub.f32 %v4840_v43, %v4872_v5  ;;  %286 = vmatpush2.msra.mxu0 %v4986_v60  ;;  %v5011_v32 = vand.u32 4294901760, %v4977_v2  ;;  %v5013_v43 = vld [vmem:[#allocation2 + $0x258] sm:$0xff] }
  0x4c   :  { %515 = vmatpush1.msra.mxu1 %v514_v62  ;;  %v531_v13 = vsub.f32 %v4952_v52, %v7625_v19  ;;  %v5008_v19 = vsub.f32 %v4853_v44, %v4885_v54  ;;  %288 = vmatprep.subr.mxu0 %v4999_v38  ;;  %7630 = vst [vmem:[#allocation64_spill] sm:$0xff] %v5019_v18  ;;  %v5022_v62 = vand.u32 4294901760, %v4988_v36  ;;  %v5024_v44 = vld [vmem:[#allocation2 + $0x248] sm:$0xff]  ;;  %v538_v54 = vand.u32 4294901760, %v537_v53 }
  0x4d   :  { %7626 = vst [vmem:[#allocation60_spill] sm:$0xff] %v4996_v39  ;;  %521 = vmatprep.subr.mxu1 %v520_v56  ;;  %7629 = vst [vmem:[#allocation63_spill] sm:$0xff] %v5011_v32  ;;  %v7317_v56 = vand.u32 4294901760, %v4996_v39  ;;  %v543_v52 = vsub.f32 %v4983_v34, %v7632_v27  ;;  %290 = vmatpush2.msra.mxu0 %v5011_v32  ;;  %v5041_v53 = vand.u32 4294901760, %v5013_v43  ;;  %v5054_v3 = vand.u32 4294901760, %v5024_v44 }
  0x4e   :  { %7628 = vst [vmem:[#allocation62_spill] sm:$0xff] %v5008_v19  ;;  %527 = vmatpush1.msra.mxu1 %v526_v47  ;;  %v532_v5 = vand.u32 4294901760, %v531_v13  ;;  %7631 = vst [vmem:[#allocation65_spill] sm:$0xff] %v5022_v62  ;;  %v5033_v13 = vsub.f32 %v4874_v59, %v4908_v11  ;;  %292 = vmatprep.subr.mxu0 %v5022_v62  ;;  %v5045_v27 = vsub.f32 %v4899_v50, %v4927_v45  ;;  %v5047_v47 = vld [vmem:[#allocation2 + $0x240] sm:$0xff] }
  0x4f   :  { %v549_v7 = vsub.f32 %v4996_v39, %v7317_v56  ;;  %7634 = vst [vmem:[#allocation67_spill] sm:$0xff] %v5041_v53  ;;  %v544_v59 = vand.u32 4294901760, %v543_v52  ;;  %7637 = vst [vmem:[#allocation69_spill] sm:$0xff] %v5054_v3  ;;  %v5056_v39 = vld [vmem:[#allocation2 + $0x230] sm:$0xff]  ;;  %v7638_v33 = vand.u32 4294901760, %v5019_v18  ;;  %294 = vmatpush2.msra.mxu0 %v5041_v53  ;;  %v5065_v52 = vsub.f32 %v4910_v40, %v4941_v26 }
  0x50   :  { %7633 = vst [vmem:[#allocation66_spill] sm:$0xff] %v5033_v13  ;;  %533 = vmatprep.subr.mxu1 %v532_v5  ;;  %7635 = vst [vmem:[#allocation68_spill] sm:$0xff] %v5045_v27  ;;  %v7636_v5 = vand.u32 4294901760, %v5008_v19  ;;  %v7640_v45 = vand.u32 4294901760, %v5033_v13  ;;  %296 = vmatprep.subr.mxu0 %v5054_v3 }
  0x51   :  { %539 = vmatpush1.msra.mxu1 %v538_v54  ;;  %v550_v34 = vand.u32 4294901760, %v549_v7  ;;  %v561_v50 = vsub.f32 %v5019_v18, %v7638_v33  ;;  %7639 = vst [vmem:[#allocation70_spill] sm:$0xff] %v5065_v52  ;;  %v5074_v33 = vand.u32 4294901760, %v5047_v47  ;;  %v5078_v54 = vsub.f32 %v4933_v61, %v4961_v57  ;;  %v5080_v18 = vld [vmem:[#allocation2 + $0x218] sm:$0xff] }
  0x52   :  { %v555_v11 = vsub.f32 %v5008_v19, %v7636_v5  ;;  %v5067_v5 = vld [vmem:[#allocation2 + $0x228] sm:$0xff]  ;;  %545 = vmatprep.subr.mxu1 %v544_v59  ;;  %v567_v7 = vsub.f32 %v5033_v13, %v7640_v45  ;;  %v7643_v59 = vand.u32 4294901760, %v5045_v27  ;;  %v5087_v45 = vand.u32 4294901760, %v5056_v39  ;;  %v5089_v13 = vld [vmem:[#allocation2 + $0x210] sm:$0xff] }
  0x53   :  { %7641 = vst [vmem:[#allocation71_spill] sm:$0xff] %v5074_v33  ;;  %7642 = vst [vmem:[#allocation72_spill] sm:$0xff] %v5078_v54  ;;  %551 = vmatpush2.msra.mxu1 %v550_v34  ;;  %v562_v40 = vand.u32 4294901760, %v561_v50  ;;  %298 = vmatpush2.msra.mxu0 %v5074_v33  ;;  %v7340_v61 = vand.u32 4294901760, %v5078_v54  ;;  %v5095_v34 = vsub.f32 %v4943_v4, %v4975_v42  ;;  %v5098_v50 = vand.u32 4294901760, %v5067_v5 }
  0x54   :  { %v556_v56 = vand.u32 4294901760, %v555_v11  ;;  %v573_v11 = vsub.f32 %v5045_v27, %v7643_v59  ;;  %7644 = vst [vmem:[#allocation73_spill] sm:$0xff] %v5087_v45  ;;  %v568_v19 = vand.u32 4294901760, %v567_v7  ;;  %v5100_v59 = vld [vmem:[#allocation2 + $0x200] sm:$0xff]  ;;  %v7647_v57 = vand.u32 4294901760, %v5065_v52  ;;  %300 = vmatprep.subr.mxu0 %v5087_v45 }
  0x55   :  { %7645 = vst [vmem:[#allocation74_spill] sm:$0xff] %v5095_v34  ;;  %7646 = vst [vmem:[#allocation75_spill] sm:$0xff] %v5098_v50  ;;  %v5108_v7 = vsub.f32 %v4954_v35, %v4986_v60  ;;  %v5111_v4 = vand.u32 4294901760, %v5080_v18  ;;  %v585_v42 = vsub.f32 %v5078_v54, %v7340_v61  ;;  %302 = vmatpush2.msra.mxu0 %v5098_v50  ;;  %v5125_v35 = vld [vmem:[#allocation2 + $0x1f8] sm:$0xff]  ;;  %v7654_v54 = vand.u32 4294901760, %v5095_v34 }
  0x56   :  { %557 = vmatprep.subr.mxu1 %v556_v56  ;;  %v574_v26 = vand.u32 4294901760, %v573_v11  ;;  %v579_v56 = vsub.f32 %v5065_v52, %v7647_v57  ;;  %v5120_v57 = vsub.f32 %v4967_v25, %v4999_v38  ;;  %v5123_v11 = vand.u32 4294901760, %v5089_v13  ;;  %v5136_v25 = vld [vmem:[#allocation2 + $0x1e8] sm:$0xff] }
  0x57   :  { %563 = vmatpush2.msra.mxu1 %v562_v40  ;;  %7648 = vst [vmem:[#allocation76_spill] sm:$0xff] %v5108_v7  ;;  %7649 = vst [vmem:[#allocation77_spill] sm:$0xff] %v5111_v4  ;;  %304 = vmatprep.subr.mxu0 %v5111_v4  ;;  %v5131_v61 = vsub.f32 %v4977_v2, %v5011_v32  ;;  %v5134_v40 = vand.u32 4294901760, %v5100_v59  ;;  %v586_v38 = vand.u32 4294901760, %v585_v42  ;;  %v5153_v42 = vand.u32 4294901760, %v5125_v35 }
  0x58   :  { %569 = vmatprep.subr.mxu1 %v568_v19  ;;  %7650 = vst [vmem:[#allocation78_spill] sm:$0xff] %v5120_v57  ;;  %7651 = vst [vmem:[#allocation79_spill] sm:$0xff] %v5123_v11  ;;  %v580_v60 = vand.u32 4294901760, %v579_v56  ;;  %v7351_v19 = vand.u32 4294901760, %v5108_v7  ;;  %v591_v52 = vsub.f32 %v5095_v34, %v7654_v54  ;;  %306 = vmatpush2.msra.mxu0 %v5123_v11  ;;  %v5166_v32 = vand.u32 4294901760, %v5136_v25 }
  0x59   :  { %575 = vmatpush2.msra.mxu1 %v574_v26  ;;  %7652 = vst [vmem:[#allocation80_spill] sm:$0xff] %v5131_v61  ;;  %7653 = vst [vmem:[#allocation81_spill] sm:$0xff] %v5134_v40  ;;  %v5145_v56 = vsub.f32 %v4988_v36, %v5022_v62  ;;  %308 = vmatprep.subr.mxu0 %v5134_v40  ;;  %v5157_v54 = vsub.f32 %v5013_v43, %v5041_v53  ;;  %v5159_v26 = vld [vmem:[#allocation2 + $0x1e0] sm:$0xff]  ;;  %v7660_v27 = vand.u32 4294901760, %v5131_v61 }
  0x5a   :  { %581 = vmatprep.subr.mxu1 %v580_v60  ;;  %v597_v2 = vsub.f32 %v5108_v7, %v7351_v19  ;;  %7656 = vst [vmem:[#allocation83_spill] sm:$0xff] %v5153_v42  ;;  %v592_v36 = vand.u32 4294901760, %v591_v52  ;;  %v7658_v60 = vand.u32 4294901760, %v5120_v57  ;;  %7659 = vst [vmem:[#allocation85_spill] sm:$0xff] %v5166_v32  ;;  %v5168_v7 = vld [vmem:[#allocation2 + $0x1d0] sm:$0xff]  ;;  %310 = vmatpush2.msra.mxu0 %v5153_v42 }
  0x5b   :  { %7655 = vst [vmem:[#allocation82_spill] sm:$0xff] %v5145_v56  ;;  %7657 = vst [vmem:[#allocation84_spill] sm:$0xff] %v5157_v54  ;;  %587 = vmatpush2.msra.mxu1 %v586_v38  ;;  %v609_v43 = vsub.f32 %v5131_v61, %v7660_v27  ;;  %v5177_v52 = vsub.f32 %v5024_v44, %v5054_v3  ;;  %v7662_v53 = vand.u32 4294901760, %v5145_v56  ;;  %312 = vmatprep.subr.mxu0 %v5166_v32  ;;  %v5192_v61 = vld [vmem:[#allocation2 + $0x1b8] sm:$0xff] }
  0x5c   :  { %v603_v62 = vsub.f32 %v5120_v57, %v7658_v60  ;;  %v598_v34 = vand.u32 4294901760, %v597_v2  ;;  %v5179_v60 = vld [vmem:[#allocation2 + $0x1c8] sm:$0xff]  ;;  %593 = vmatprep.subr.mxu1 %v592_v36  ;;  %v5186_v27 = vand.u32 4294901760, %v5159_v26  ;;  %v5190_v38 = vsub.f32 %v5047_v47, %v5074_v33 }
  0x5d   :  { %7661 = vst [vmem:[#allocation86_spill] sm:$0xff] %v5177_v52  ;;  %v615_v2 = vsub.f32 %v5145_v56, %v7662_v53  ;;  %v610_v44 = vand.u32 4294901760, %v609_v43  ;;  %v7665_v36 = vand.u32 4294901760, %v5157_v54  ;;  %v5199_v53 = vand.u32 4294901760, %v5168_v7  ;;  %v5201_v56 = vld [vmem:[#allocation2 + $0x1b0] sm:$0xff] }
  0x5e   :  { %v604_v19 = vand.u32 4294901760, %v603_v62  ;;  %7663 = vst [vmem:[#allocation87_spill] sm:$0xff] %v5186_v27  ;;  %7664 = vst [vmem:[#allocation88_spill] sm:$0xff] %v5190_v38  ;;  %599 = vmatpush2.msra.mxu1 %v598_v34  ;;  %314 = vmatpush2.msra.mxu0 %v5186_v27  ;;  %v7374_v47 = vand.u32 4294901760, %v5190_v38  ;;  %v5207_v34 = vsub.f32 %v5056_v39, %v5087_v45  ;;  %v5210_v43 = vand.u32 4294901760, %v5179_v60 }
  0x5f   :  { %v621_v62 = vsub.f32 %v5157_v54, %v7665_v36  ;;  %7666 = vst [vmem:[#allocation89_spill] sm:$0xff] %v5199_v53  ;;  %v616_v57 = vand.u32 4294901760, %v615_v2  ;;  %v5212_v36 = vld [vmem:[#allocation2 + $0x1a0] sm:$0xff]  ;;  %v7669_v33 = vand.u32 4294901760, %v5177_v52  ;;  %316 = vmatprep.subr.mxu0 %v5199_v53  ;;  %v5220_v2 = vsub.f32 %v5067_v5, %v5098_v50  ;;  %v5237_v5 = vld [vmem:[#allocation2 + $0x198] sm:$0xff] }
  0x60   :  { %605 = vmatprep.subr.mxu1 %v604_v19  ;;  %7667 = vst [vmem:[#allocation90_spill] sm:$0xff] %v5207_v34  ;;  %7668 = vst [vmem:[#allocation91_spill] sm:$0xff] %v5210_v43  ;;  %v5223_v39 = vand.u32 4294901760, %v5192_v61  ;;  %v633_v45 = vsub.f32 %v5190_v38, %v7374_v47  ;;  %318 = vmatpush2.msra.mxu0 %v5210_v43  ;;  %v5243_v47 = vsub.f32 %v5089_v13, %v5123_v11 }
  0x61   :  { %611 = vmatpush2.msra.mxu1 %v610_v44  ;;  %v622_v3 = vand.u32 4294901760, %v621_v62  ;;  %v627_v19 = vsub.f32 %v5177_v52, %v7669_v33  ;;  %7670 = vst [vmem:[#allocation92_spill] sm:$0xff] %v5220_v2  ;;  %v5232_v33 = vsub.f32 %v5080_v18, %v5111_v4  ;;  %v5235_v62 = vand.u32 4294901760, %v5201_v56  ;;  %v5248_v18 = vld [vmem:[#allocation2 + $0x188] sm:$0xff] }
  0x62   :  { %617 = vmatprep.subr.mxu1 %v616_v57  ;;  %v7385_v57 = vand.u32 4294901760, %v5220_v2  ;;  %320 = vmatprep.subr.mxu0 %v5223_v39  ;;  %v5246_v44 = vand.u32 4294901760, %v5212_v36  ;;  %v634_v4 = vand.u32 4294901760, %v633_v45  ;;  %v7672_v38 = vand.u32 4294901760, %v5207_v34 }
  0x63   :  { %7671 = vst [vmem:[#allocation93_spill] sm:$0xff] %v5235_v62  ;;  %623 = vmatpush2.msra.mxu1 %v622_v3  ;;  %v628_v50 = vand.u32 4294901760, %v627_v19  ;;  %322 = vmatpush2.msra.mxu0 %v5235_v62  ;;  %v5257_v19 = vsub.f32 %v5100_v59, %v5134_v40  ;;  %v5265_v45 = vand.u32 4294901760, %v5237_v5  ;;  %v5271_v3 = vld [vmem:[#allocation2 + $0x180] sm:$0xff]  ;;  %v5278_v11 = vand.u32 4294901760, %v5248_v18 }
  0x64   :  { %v639_v52 = vsub.f32 %v5207_v34, %v7672_v38  ;;  %v645_v13 = vsub.f32 %v5220_v2, %v7385_v57  ;;  %324 = vmatprep.subr.mxu0 %v5246_v44  ;;  %v5269_v38 = vsub.f32 %v5125_v35, %v5153_v42  ;;  %v5280_v2 = vld [vmem:[#allocation5] sm:$0x3f]  ;;  %v7677_v54 = vand.u32 4294901760, %v5243_v47 }
  0x65   :  { %7673 = vst [vmem:[#allocation94_spill] sm:$0xff] %v5257_v19  ;;  %629 = vmatprep.subr.mxu1 %v628_v50  ;;  %7674 = vst [vmem:[#allocation95_spill] sm:$0xff] %v5265_v45  ;;  %v7675_v50 = vand.u32 4294901760, %v5232_v33  ;;  %v7394_v57 = vand.u32 4294901760, %v5257_v19  ;;  %326 = vmatpush2.msra.mxu0 %v5265_v45 }
  0x66   :  { %635 = vmatpush2.msra.mxu1 %v634_v4  ;;  %v640_v59 = vand.u32 4294901760, %v639_v52  ;;  %7676 = vst [vmem:[#allocation96_spill] sm:$0xff] %v5280_v2  ;;  %v646_v34 = vand.u32 4294901760, %v645_v13  ;;  %v657_v35 = vsub.f32 %v5243_v47, %v7677_v54  ;;  %v5289_v52 = vsub.f32 %v5136_v25, %v5166_v32  ;;  %328 = vmatprep.subr.mxu0 %v5278_v11 }
  0x67   :  { %v651_v40 = vsub.f32 %v5232_v33, %v7675_v50  ;;  %v663_v42 = vsub.f32 %v5257_v19, %v7394_v57  ;;  %v5296_v13 = vand.u32 4294901760, %v5271_v3  ;;  %v5300_v54 = vsub.f32 %v5159_v26, %v5186_v27 }
  0x68   :  { %641 = vmatprep.subr.mxu1 %v640_v59  ;;  %v658_v4 = vand.u32 4294901760, %v657_v35  ;;  %v7679_v25 = vand.u32 4294901760, %v5269_v38  ;;  %v191_v57 = vrot.slane %v5280_v2, %v4524_v20  ;;  %v5312_v26 = vsub.f32 %v5168_v7, %v5199_v53 }
  0x69   :  { %v652_v50 = vand.u32 4294901760, %v651_v40  ;;  %7678 = vst [vmem:[#allocation97_spill] sm:$0xff] %v5296_v13  ;;  %647 = vmatpush2.msra.mxu1 %v646_v34  ;;  %v7401_v40 = vand.u32 4294901760, %v5289_v52  ;;  %v664_v32 = vand.u32 4294901760, %v663_v42  ;;  %330 = vmatpush2.msra.mxu0 %v5296_v13  ;;  %v7403_v19 = vand.u32 4294901760, %v5300_v54 }
  0x6a   :  { %v669_v59 = vsub.f32 %v5269_v38, %v7679_v25  ;;  %v5316_v34 = vsub.f32 %v5179_v60, %v5210_v43  ;;  %v5321_v42 = vand.u32 4294901760, %v191_v57  ;;  %743 = vmatprep.subr.mxu0 %v4535_v24  ;;  %v7405_v20 = vand.u32 4294901760, %v5312_v26 }
  0x6b   :  { %653 = vmatprep.subr.mxu1 %v652_v50  ;;  %v675_v25 = vsub.f32 %v5289_v52, %v7401_v40  ;;  %v199_v50 = vcombine.high %v191_v57, %v191_v57  ;;  %v681_v7 = vsub.f32 %v5300_v54, %v7403_v19 }
  0x6c   :  { %659 = vmatpush2.msra.mxu1 %v658_v4  ;;  %v670_v35 = vand.u32 4294901760, %v669_v59  ;;  %7680 = vst [vmem:[#allocation98_spill] sm:$0xff] %v5321_v42  ;;  %v5331_v4 = vsub.f32 %v5192_v61, %v5223_v39  ;;  %v5336_v2 = vsub.f32 %v191_v57, %v5321_v42  ;;  %v687_v60 = vsub.f32 %v5312_v26, %v7405_v20 }
  0x6d   :  { %665 = vmatprep.subr.mxu1 %v664_v32  ;;  %v676_v59 = vand.u32 4294901760, %v675_v25  ;;  %v5333_v40 = vand.u32 4294901760, %v199_v50  ;;  %v5340_v32 = vsub.f32 %v5201_v56, %v5235_v62  ;;  %v682_v19 = vand.u32 4294901760, %v681_v7 }
  0x6e   :  { %671 = vmatpush2.msra.mxu1 %v670_v35  ;;  %7682 = vst [vmem:[#allocation100_spill] sm:$0xff] %v5336_v2  ;;  %v7683_v24 = vand.u32 4294901760, %v5316_v34  ;;  %v7408_v35 = vand.u32 4294901760, %v5331_v4  ;;  %v5353_v57 = vand.u32 4294901760, %v5336_v2  ;;  %v5358_v7 = vsub.f32 %v5212_v36, %v5246_v44 }
  0x6f   :  { %7681 = vst [vmem:[#allocation99_spill] sm:$0xff] %v5333_v40  ;;  %677 = vmatprep.subr.mxu1 %v676_v59  ;;  %v5350_v25 = vsub.f32 %v199_v50, %v5333_v40  ;;  %v7415_v56 = vand.u32 4294901760, %v5340_v32  ;;  %733 = vmatprep.mubr.f32.mxu1 %v5333_v40  ;;  %v688_v20 = vand.u32 4294901760, %v687_v60  ;;  %v5366_v50 = vsub.f32 %v5237_v5, %v5265_v45 }
  0x70   :  { %v693_v61 = vsub.f32 %v5316_v34, %v7683_v24  ;;  %7685 = vst [vmem:[#allocation102_spill] sm:$0xff] %v5353_v57  ;;  %683 = vmatpush2.msra.mxu1 %v682_v19  ;;  %v699_v59 = vsub.f32 %v5331_v4, %v7408_v35  ;;  %v340_v36 = vsub.f32 %v5336_v2, %v5353_v57  ;;  %v7418_v60 = vand.u32 4294901760, %v5358_v7 }
  0x71   :  { %7684 = vst [vmem:[#allocation101_spill] sm:$0xff] %v5350_v25  ;;  %v5369_v62 = vand.u32 4294901760, %v5350_v25  ;;  %v705_v19 = vsub.f32 %v5340_v32, %v7415_v56  ;;  %689 = vmatprep.subr.mxu1 %v688_v20  ;;  %v7421_v35 = vand.u32 4294901760, %v5366_v50  ;;  %v5380_v5 = vsub.f32 %v5248_v18, %v5278_v11 }
  0x72   :  { %v694_v24 = vand.u32 4294901760, %v693_v61  ;;  %v700_v61 = vand.u32 4294901760, %v699_v59  ;;  %v5384_v40 = vsub.f32 %v5271_v3, %v5296_v13  ;;  %v711_v20 = vsub.f32 %v5358_v7, %v7418_v60 }
  0x73   :  { %7686 = vst [vmem:[#allocation103_spill] sm:$0xff] %v5369_v62  ;;  %v334_v57 = vsub.f32 %v5350_v25, %v5369_v62  ;;  %v706_v45 = vand.u32 4294901760, %v705_v19  ;;  %v5391_v59 = vand.u32 4294901760, %v340_v36  ;;  %v717_v18 = vsub.f32 %v5366_v50, %v7421_v35  ;;  %v7701_v35 = vld [vmem:[#allocation38_spill] sm:$0xff] }
  0x74   :  { %7687 = vst [vmem:[#allocation104_spill] sm:$0xff] %v5384_v40  ;;  %695 = vmatpush2.msra.mxu1 %v694_v24  ;;  %v7420_v56 = vand.u32 4294901760, %v5380_v5  ;;  %v7419_v3 = vand.u32 4294901760, %v5384_v40  ;;  %v712_v24 = vand.u32 4294901760, %v711_v20  ;;  %v7692_v20 = vld [vmem:[#allocation14_spill] sm:$0xff] }
  0x75   :  { %7688 = vst [vmem:[#allocation105_spill] sm:$0xff] %v5391_v59  ;;  %701 = vmatprep.subr.mxu1 %v700_v61  ;;  %v5398_v13 = vand.u32 4294901760, %v334_v57  ;;  %v718_v19 = vand.u32 4294901760, %v717_v18  ;;  %v7693_v18 = vld [vmem:[#allocation30_spill] sm:$0xff] }
  0x76   :  { %707 = vmatpush2.msra.mxu1 %v706_v45  ;;  %v723_v60 = vsub.f32 %v5380_v5, %v7420_v56  ;;  %v729_v36 = vsub.f32 %v5384_v40, %v7419_v3  ;;  %v7690_v45 = vld [vmem:[#allocation13_spill] sm:$0xff]  ;;  %v7699_v3 = vld [vmem:[#allocation36_spill] sm:$0xff]  ;;  %v7700_v56 = vld [vmem:[#allocation18_spill] sm:$0xff] }
  0x77   :  { %7689 = vst [vmem:[#allocation106_spill] sm:$0xff] %v5398_v13  ;;  %336 = vmatprep.mubr.f32.mxu0 %v5398_v13  ;;  %713 = vmatprep.subr.mxu1 %v712_v24  ;;  %v7694_v24 = vld [vmem:[#allocation15_spill] sm:$0xff]  ;;  %v7704_v13 = vld [vmem:[#allocation20_spill] sm:$0xff] }
  0x78   :  { %342 = vmatmul.mubr.f32.vlgmr.msra.gmra.mxu0 %v5391_v59  ;;  %719 = vmatpush2.msra.mxu1 %v718_v19  ;;  %v724_v61 = vand.u32 4294901760, %v723_v60  ;;  %v730_v57 = vand.u32 4294901760, %v729_v36  ;;  %v7691_v60 = vld [vmem:[#allocation28_spill] sm:$0xff] }
  0x79   :  { %746 = vmatpush1.msra.mxu0 %v4548_v29  ;;  %935 = vmatprep.mubr.f32.mxu0 %v5350_v25  ;;  %v7695_v19 = vld [vmem:[#allocation32_spill] sm:$0xff]  ;;  %v7702_v25 = vld [vmem:[#allocation19_spill] sm:$0xff] }
  0x7a   :  { %749 = vmatprep.subr.mxu0 %v4554_v31  ;;  %725 = vmatprep.subr.mxu1 %v724_v61  ;;  %v7696_v36 = vld [vmem:[#allocation16_spill] sm:$0xff]  ;;  %v7697_v61 = vld [vmem:[#allocation34_spill] sm:$0xff] }
  0x7b   :  { %752 = vmatpush1.msra.mxu0 %v4568_v37  ;;  %731 = vmatpush2.msra.mxu1 %v730_v57  ;;  %v7698_v57 = vld [vmem:[#allocation17_spill] sm:$0xff]  ;;  %v7703_v59 = vld [vmem:[#allocation40_spill] sm:$0xff] }
  0x7c   :  { %755 = vmatprep.subr.mxu0 %v4577_v41  ;;  %735 = vmatmul.mubr.f32.vlgmr.msra.gmra.mxu1 %v5321_v42  ;;  %v7705_v42 = vld [vmem:[#allocation42_spill] sm:$0xff] }
  0x7d   :  { %758 = vmatpush1.msra.mxu0 %v4590_v46  ;;  %945 = vmatprep.subr.mxu1 %v4510_v8 }
  0x7e   :  { %761 = vmatprep.subr.mxu0 %v4604_v51  ;;  %947 = vmatpush1.msra.mxu1 %v4512_v9 }
  0x7f   :  { %764 = vmatpush1.msra.mxu0 %v4630_v1  ;;  %949 = vmatprep.subr.mxu1 %v4514_v10 }
  0x80   :  { %767 = vmatprep.subr.mxu0 %v4643_v6  ;;  %951 = vmatpush1.msra.mxu1 %v4516_v14 }
  0x81   :  { %770 = vmatpush1.msra.mxu0 %v4654_v17  ;;  %953 = vmatprep.subr.mxu1 %v4518_v15 }
  0x82   :  { %773 = vmatprep.subr.mxu0 %v4665_v49  ;;  %955 = vmatpush1.msra.mxu1 %v4520_v16 }
  0x83   :  { %776 = vmatpush1.msra.mxu0 %v4677_v58  ;;  %957 = vmatprep.subr.mxu1 %v4527_v21 }
  0x84   :  { %779 = vmatprep.subr.mxu0 %v4691_v0  ;;  %959 = vmatpush1.msra.mxu1 %v4529_v22 }
  0x85   :  { %782 = vmatpush1.msra.mxu0 %v4703_v48  ;;  %961 = vmatprep.subr.mxu1 %v4532_v23 }
  0x86   :  { %785 = vmatprep.subr.mxu0 %v4724_v63  ;;  %963 = vmatpush1.msra.mxu1 %v4545_v28 }
  0x87   :  { %788 = vmatpush1.msra.mxu0 %v4737_v12  ;;  %965 = vmatprep.subr.mxu1 %v4551_v30 }
  0x88   :  { %791 = vmatprep.subr.mxu0 %v4755_v55  ;;  %967 = vmatpush1.msra.mxu1 %v7690_v45 }
  0x89   :  { %794 = vmatpush1.msra.mxu0 %v7691_v60  ;;  %969 = vmatprep.subr.mxu1 %v7692_v20  ;;  %v7708_v20 = vld [vmem:[#allocation22_spill] sm:$0xff] }
  0x8a   :  { %797 = vmatprep.subr.mxu0 %v7693_v18  ;;  %971 = vmatpush1.msra.mxu1 %v7694_v24  ;;  %v7706_v24 = vld [vmem:[#allocation21_spill] sm:$0xff] }
  0x8b   :  { %800 = vmatpush1.msra.mxu0 %v7695_v19  ;;  %973 = vmatprep.subr.mxu1 %v7696_v36  ;;  %v7707_v36 = vld [vmem:[#allocation44_spill] sm:$0xff] }
  0x8c   :  { %803 = vmatprep.subr.mxu0 %v7697_v61  ;;  %975 = vmatpush1.msra.mxu1 %v7698_v57  ;;  %v7709_v57 = vld [vmem:[#allocation46_spill] sm:$0xff] }
  0x8d   :  { %806 = vmatpush1.msra.mxu0 %v7699_v3  ;;  %977 = vmatprep.subr.mxu1 %v7700_v56  ;;  %v7710_v3 = vld [vmem:[#allocation23_spill] sm:$0xff]  ;;  %v7711_v56 = vld [vmem:[#allocation48_spill] sm:$0xff] }
  0x8e   :  { %809 = vmatprep.subr.mxu0 %v7701_v35  ;;  %979 = vmatpush1.msra.mxu1 %v7702_v25  ;;  %v7712_v35 = vld [vmem:[#allocation24_spill] sm:$0xff]  ;;  %v7713_v25 = vld [vmem:[#allocation50_spill] sm:$0xff] }
  0x8f   :  { %812 = vmatpush1.msra.mxu0 %v7703_v59  ;;  %981 = vmatprep.subr.mxu1 %v7704_v13  ;;  %v7714_v59 = vld [vmem:[#allocation25_spill] sm:$0xff]  ;;  %v7715_v13 = vld [vmem:[#allocation52_spill] sm:$0xff] }
  0x90   :  { %815 = vmatprep.subr.mxu0 %v7705_v42  ;;  %983 = vmatpush1.msra.mxu1 %v7706_v24  ;;  %v7716_v42 = vld [vmem:[#allocation26_spill] sm:$0xff] }
  0x91   :  { %818 = vmatpush1.msra.mxu0 %v7707_v36  ;;  %985 = vmatprep.subr.mxu1 %v7708_v20  ;;  %v7717_v24 = vld [vmem:[#allocation54_spill] sm:$0xff]  ;;  %v7718_v36 = vld [vmem:[#allocation27_spill] sm:$0xff]  ;;  %v7719_v20 = vld [vmem:[#allocation56_spill] sm:$0xff] }
  0x92   :  { %821 = vmatprep.subr.mxu0 %v7709_v57  ;;  %987 = vmatpush1.msra.mxu1 %v7710_v3  ;;  %v7720_v57 = vld [vmem:[#allocation29_spill] sm:$0xff]  ;;  %v7721_v3 = vld [vmem:[#allocation58_spill] sm:$0xff] }
  0x93   :  { %824 = vmatpush1.msra.mxu0 %v7711_v56  ;;  %989 = vmatprep.subr.mxu1 %v7712_v35  ;;  %v7722_v56 = vld [vmem:[#allocation31_spill] sm:$0xff]  ;;  %v7723_v35 = vld [vmem:[#allocation60_spill] sm:$0xff] }
  0x94   :  { %827 = vmatprep.subr.mxu0 %v7713_v25  ;;  %991 = vmatpush1.msra.mxu1 %v7714_v59  ;;  %v7724_v25 = vld [vmem:[#allocation33_spill] sm:$0xff]  ;;  %v7725_v59 = vld [vmem:[#allocation62_spill] sm:$0xff] }
  0x95   :  { %830 = vmatpush1.msra.mxu0 %v7715_v13  ;;  %993 = vmatprep.subr.mxu1 %v7716_v42  ;;  %v7726_v13 = vld [vmem:[#allocation35_spill] sm:$0xff]  ;;  %v7727_v42 = vld [vmem:[#allocation64_spill] sm:$0xff] }
  0x96   :  { %833 = vmatprep.subr.mxu0 %v7717_v24  ;;  %995 = vmatpush1.msra.mxu1 %v7718_v36  ;;  %v7728_v24 = vld [vmem:[#allocation37_spill] sm:$0xff]  ;;  %v7729_v36 = vld [vmem:[#allocation66_spill] sm:$0xff] }
  0x97   :  { %836 = vmatpush1.msra.mxu0 %v7719_v20  ;;  %997 = vmatprep.subr.mxu1 %v7720_v57  ;;  %v7730_v20 = vld [vmem:[#allocation39_spill] sm:$0xff]  ;;  %v7731_v57 = vld [vmem:[#allocation68_spill] sm:$0xff] }
  0x98   :  { %839 = vmatprep.subr.mxu0 %v7721_v3  ;;  %999 = vmatpush1.msra.mxu1 %v7722_v56  ;;  %v7732_v3 = vld [vmem:[#allocation41_spill] sm:$0xff]  ;;  %v7733_v56 = vld [vmem:[#allocation70_spill] sm:$0xff] }
  0x99   :  { %842 = vmatpush2.msra.mxu0 %v7723_v35  ;;  %1001 = vmatprep.subr.mxu1 %v7724_v25  ;;  %v7734_v35 = vld [vmem:[#allocation43_spill] sm:$0xff]  ;;  %v7735_v25 = vld [vmem:[#allocation72_spill] sm:$0xff] }
  0x9a   :  { %845 = vmatprep.subr.mxu0 %v7725_v59  ;;  %1003 = vmatpush1.msra.mxu1 %v7726_v13  ;;  %v7736_v59 = vld [vmem:[#allocation45_spill] sm:$0xff]  ;;  %v7737_v13 = vld [vmem:[#allocation74_spill] sm:$0xff] }
  0x9b   :  { %848 = vmatpush2.msra.mxu0 %v7727_v42  ;;  %1005 = vmatprep.subr.mxu1 %v7728_v24  ;;  %v7738_v42 = vld [vmem:[#allocation47_spill] sm:$0xff]  ;;  %v7739_v24 = vld [vmem:[#allocation76_spill] sm:$0xff] }
  0x9c   :  { %851 = vmatprep.subr.mxu0 %v7729_v36  ;;  %1007 = vmatpush1.msra.mxu1 %v7730_v20  ;;  %v7740_v36 = vld [vmem:[#allocation49_spill] sm:$0xff]  ;;  %v7741_v20 = vld [vmem:[#allocation78_spill] sm:$0xff] }
  0x9d   :  { %854 = vmatpush2.msra.mxu0 %v7731_v57  ;;  %1009 = vmatprep.subr.mxu1 %v7732_v3  ;;  %v7742_v57 = vld [vmem:[#allocation51_spill] sm:$0xff]  ;;  %v7743_v3 = vld [vmem:[#allocation80_spill] sm:$0xff] }
  0x9e   :  { %857 = vmatprep.subr.mxu0 %v7733_v56  ;;  %1011 = vmatpush2.msra.mxu1 %v7734_v35  ;;  %v7744_v56 = vld [vmem:[#allocation53_spill] sm:$0xff]  ;;  %v7745_v35 = vld [vmem:[#allocation82_spill] sm:$0xff] }
  0x9f   :  { %860 = vmatpush2.msra.mxu0 %v7735_v25  ;;  %1013 = vmatprep.subr.mxu1 %v7736_v59  ;;  %v7746_v25 = vld [vmem:[#allocation55_spill] sm:$0xff]  ;;  %v7747_v59 = vld [vmem:[#allocation84_spill] sm:$0xff] }
  0xa0   :  { %863 = vmatprep.subr.mxu0 %v7737_v13  ;;  %1015 = vmatpush2.msra.mxu1 %v7738_v42  ;;  %v7748_v13 = vld [vmem:[#allocation57_spill] sm:$0xff]  ;;  %v7749_v42 = vld [vmem:[#allocation86_spill] sm:$0xff] }
  0xa1   :  { %866 = vmatpush2.msra.mxu0 %v7739_v24  ;;  %1017 = vmatprep.subr.mxu1 %v7740_v36  ;;  %v7750_v24 = vld [vmem:[#allocation59_spill] sm:$0xff]  ;;  %v7751_v36 = vld [vmem:[#allocation88_spill] sm:$0xff] }
  0xa2   :  { %869 = vmatprep.subr.mxu0 %v7741_v20  ;;  %1019 = vmatpush2.msra.mxu1 %v7742_v57  ;;  %v7752_v20 = vld [vmem:[#allocation61_spill] sm:$0xff]  ;;  %v7753_v57 = vld [vmem:[#allocation90_spill] sm:$0xff] }
  0xa3   :  { %872 = vmatpush2.msra.mxu0 %v7743_v3  ;;  %1021 = vmatprep.subr.mxu1 %v7744_v56  ;;  %v7754_v3 = vld [vmem:[#allocation63_spill] sm:$0xff]  ;;  %v7755_v56 = vld [vmem:[#allocation92_spill] sm:$0xff] }
  0xa4   :  { %875 = vmatprep.subr.mxu0 %v7745_v35  ;;  %1023 = vmatpush2.msra.mxu1 %v7746_v25  ;;  %v7756_v35 = vld [vmem:[#allocation65_spill] sm:$0xff]  ;;  %v7757_v25 = vld [vmem:[#allocation67_spill] sm:$0xff] }
  0xa5   :  { %878 = vmatpush2.msra.mxu0 %v7747_v59  ;;  %1025 = vmatprep.subr.mxu1 %v7748_v13  ;;  %v7758_v13 = vld [vmem:[#allocation69_spill] sm:$0xff] }
  0xa6   :  { %881 = vmatprep.subr.mxu0 %v7749_v42  ;;  %1027 = vmatpush2.msra.mxu1 %v7750_v24  ;;  %v7759_v24 = vld [vmem:[#allocation94_spill] sm:$0xff] }
  0xa7   :  { %884 = vmatpush2.msra.mxu0 %v7751_v36  ;;  %1029 = vmatprep.subr.mxu1 %v7752_v20  ;;  %v7760_v36 = vld [vmem:[#allocation71_spill] sm:$0xff]  ;;  %v7761_v20 = vld [vmem:[#allocation73_spill] sm:$0xff] }
  0xa8   :  { %887 = vmatprep.subr.mxu0 %v7753_v57  ;;  %1031 = vmatpush2.msra.mxu1 %v7754_v3  ;;  %v7762_v3 = vld [vmem:[#allocation75_spill] sm:$0xff] }
  0xa9   :  { %890 = vmatpush2.msra.mxu0 %v7755_v56  ;;  %1033 = vmatprep.subr.mxu1 %v7756_v35  ;;  %v7763_v35 = vld [vmem:[#allocation77_spill] sm:$0xff] }
  0xaa   :  { %893 = vmatprep.subr.mxu0 %v5232_v33  ;;  %1035 = vmatpush2.msra.mxu1 %v7757_v25  ;;  %v7764_v25 = vld [vmem:[#allocation79_spill] sm:$0xff] }
  0xab   :  { %896 = vmatpush2.msra.mxu0 %v5243_v47  ;;  %1037 = vmatprep.subr.mxu1 %v7758_v13  ;;  %v7765_v13 = vld [vmem:[#allocation81_spill] sm:$0xff] }
  0xac   :  { %899 = vmatprep.subr.mxu0 %v7759_v24  ;;  %1039 = vmatpush2.msra.mxu1 %v7760_v36  ;;  %v7766_v36 = vld [vmem:[#allocation83_spill] sm:$0xff] }
  0xad   :  { %902 = vmatpush2.msra.mxu0 %v5269_v38  ;;  %1041 = vmatprep.subr.mxu1 %v7761_v20  ;;  %v7767_v20 = vld [vmem:[#allocation85_spill] sm:$0xff] }
  0xae   :  { %905 = vmatprep.subr.mxu0 %v5289_v52  ;;  %1043 = vmatpush2.msra.mxu1 %v7762_v3 }
  0xaf   :  { %908 = vmatpush2.msra.mxu0 %v5300_v54  ;;  %1045 = vmatprep.subr.mxu1 %v7763_v35 }
  0xb0   :  { %911 = vmatprep.subr.mxu0 %v5312_v26  ;;  %1047 = vmatpush2.msra.mxu1 %v7764_v25 }
  0xb1   :  { %914 = vmatpush2.msra.mxu0 %v5316_v34  ;;  %1049 = vmatprep.subr.mxu1 %v7765_v13  ;;  %v7770_v13 = vand.u32 4294901760, %v4548_v29  ;;  %v7776_v29 = vand.u32 4294901760, %v4590_v46  ;;  %v7782_v46 = vand.u32 4294901760, %v4654_v17  ;;  %v7794_v17 = vld [vmem:[#allocation14_spill] sm:$0xff] }
  0xb2   :  { %917 = vmatprep.subr.mxu0 %v5331_v4  ;;  %1051 = vmatpush2.msra.mxu1 %v7766_v36  ;;  %v7768_v36 = vld [vmem:[#allocation12_spill] sm:$0xff] }
  0xb3   :  { %920 = vmatpush2.msra.mxu0 %v5340_v32  ;;  %1053 = vmatprep.subr.mxu1 %v7767_v20  ;;  %v7769_v20 = vand.u32 4294901760, %v7768_v36  ;;  %v7812_v36 = vld [vmem:[#allocation20_spill] sm:$0xff] }
  0xb4   :  { %923 = vmatprep.subr.mxu0 %v5358_v7  ;;  %1055 = vmatpush2.msra.mxu1 %v5186_v27  ;;  %v7771_v27 = vld [vmem:[#allocation93_spill] sm:$0xff] }
  0xb5   :  { %926 = vmatpush2.msra.mxu0 %v5366_v50  ;;  %1057 = vmatprep.subr.mxu1 %v5199_v53  ;;  %v7772_v53 = vand.u32 4294901760, %v4554_v31  ;;  %v7778_v31 = vand.u32 4294901760, %v4604_v51  ;;  %v7783_v51 = vand.u32 4294901760, %v4665_v49  ;;  %v7797_v49 = vld [vmem:[#allocation15_spill] sm:$0xff] }
  0xb6   :  { %929 = vmatprep.subr.mxu0 %v5380_v5  ;;  %1059 = vmatpush2.msra.mxu1 %v5210_v43  ;;  %v7773_v43 = vand.u32 4294901760, %v4568_v37  ;;  %v7779_v37 = vand.u32 4294901760, %v4630_v1  ;;  %v7784_v1 = vand.u32 4294901760, %v4677_v58 }
  0xb7   :  { %932 = vmatpush2.msra.mxu0 %v5384_v40  ;;  %1061 = vmatprep.subr.mxu1 %v5223_v39  ;;  %v7774_v40 = vld [vmem:[#allocation95_spill] sm:$0xff] }
  0xb8   :  { %938 = vmatmul.mubr.f32.vlgmr.msra.gmra.mxu0 %v5336_v2  ;;  %1088 = vmatprep.subr.mxu0 %v7769_v20  ;;  %v7775_v2 = vand.u32 4294901760, %v4577_v41  ;;  %v7781_v41 = vand.u32 4294901760, %v4643_v6  ;;  %v7785_v6 = vand.u32 4294901760, %v4691_v0  ;;  %v7809_v20 = vld [vmem:[#allocation19_spill] sm:$0xff] }
  0xb9   :  { %1092 = vmatpush1.msra.mxu0 %v7770_v13  ;;  %1063 = vmatpush2.msra.mxu1 %v7771_v27  ;;  %v7777_v13 = vld [vmem:[#allocation97_spill] sm:$0xff] }
  0xba   :  { %1096 = vmatprep.subr.mxu0 %v7772_v53  ;;  %1065 = vmatprep.subr.mxu1 %v5246_v44  ;;  %v7780_v53 = vld [vmem:[#allocation102_spill] sm:$0xff] }
  0xbb   :  { %1100 = vmatpush1.msra.mxu0 %v7773_v43  ;;  %1067 = vmatpush2.msra.mxu1 %v7774_v40 }
  0xbc   :  { %1104 = vmatprep.subr.mxu0 %v7775_v2  ;;  %1069 = vmatprep.subr.mxu1 %v5278_v11  ;;  %v7806_v2 = vld [vmem:[#allocation18_spill] sm:$0xff] }
  0xbd   :  { %1108 = vmatpush1.msra.mxu0 %v7776_v29  ;;  %1071 = vmatpush2.msra.mxu1 %v7777_v13 }
  0xbe   :  { %1112 = vmatprep.subr.mxu0 %v7778_v31  ;;  %1075 = vmatprep.mubr.f32.mxu1 %v5369_v62  ;;  %v7815_v31 = vld [vmem:[#allocation21_spill] sm:$0xff] }
  0xbf   :  { %1116 = vmatpush1.msra.mxu0 %v7779_v37  ;;  %1079 = vmatmul.mubr.f32.vlgmr.msra.gmra.mxu1 %v7780_v53  ;;  %v7816_v37 = vld [vmem:[#allocation50_spill] sm:$0xff] }
  0xc0   :  { %1120 = vmatprep.subr.mxu0 %v7781_v41  ;;  %1351 = vmatprep.subr.mxu1 %v4510_v8  ;;  %v7786_v8 = vand.u32 4294901760, %v4703_v48  ;;  %v7817_v41 = vand.u32 4294901760, %v7816_v37  ;;  %v7852_v37 = vld [vmem:[#allocation74_spill] sm:$0xff] }
  0xc1   :  { %1124 = vmatpush1.msra.mxu0 %v7782_v46  ;;  %1353 = vmatpush1.msra.mxu1 %v4512_v9  ;;  %v7787_v9 = vand.u32 4294901760, %v4724_v63  ;;  %v7800_v63 = vld [vmem:[#allocation16_spill] sm:$0xff]  ;;  %v7818_v46 = vld [vmem:[#allocation22_spill] sm:$0xff] }
  0xc2   :  { %1128 = vmatprep.subr.mxu0 %v7783_v51  ;;  %1355 = vmatprep.subr.mxu1 %v4514_v10  ;;  %v7788_v10 = vand.u32 4294901760, %v4737_v12  ;;  %v7803_v12 = vld [vmem:[#allocation17_spill] sm:$0xff]  ;;  %v7819_v51 = vld [vmem:[#allocation52_spill] sm:$0xff] }
  0xc3   :  { %1132 = vmatpush1.msra.mxu0 %v7784_v1  ;;  %1357 = vmatpush1.msra.mxu1 %v4516_v14  ;;  %v7789_v14 = vand.u32 4294901760, %v4755_v55  ;;  %v7804_v55 = vld [vmem:[#allocation42_spill] sm:$0xff]  ;;  %v7820_v1 = vand.u32 4294901760, %v7819_v51  ;;  %v7855_v51 = vld [vmem:[#allocation76_spill] sm:$0xff] }
  0xc4   :  { %1136 = vmatprep.subr.mxu0 %v7785_v6  ;;  %1359 = vmatprep.subr.mxu1 %v4518_v15  ;;  %v7790_v15 = vand.u32 4294901760, %v7691_v60  ;;  %v7805_v43 = vand.u32 4294901760, %v7804_v55  ;;  %v7821_v6 = vld [vmem:[#allocation23_spill] sm:$0xff]  ;;  %v7840_v55 = vld [vmem:[#allocation66_spill] sm:$0xff] }
  0xc5   :  { %1140 = vmatpush1.msra.mxu0 %v7786_v8  ;;  %1361 = vmatpush1.msra.mxu1 %v4520_v16  ;;  %v7791_v16 = vand.u32 4294901760, %v7693_v18  ;;  %v7810_v18 = vld [vmem:[#allocation46_spill] sm:$0xff] }
  0xc6   :  { %1144 = vmatprep.subr.mxu0 %v7787_v9  ;;  %1363 = vmatprep.subr.mxu1 %v4527_v21  ;;  %v7792_v21 = vand.u32 4294901760, %v7695_v19  ;;  %v7811_v19 = vand.u32 4294901760, %v7810_v18  ;;  %v7822_v8 = vld [vmem:[#allocation54_spill] sm:$0xff] }
  0xc7   :  { %1148 = vmatpush1.msra.mxu0 %v7788_v10  ;;  %1365 = vmatpush1.msra.mxu1 %v4529_v22  ;;  %v7793_v22 = vand.u32 4294901760, %v7697_v61  ;;  %v7813_v61 = vld [vmem:[#allocation48_spill] sm:$0xff]  ;;  %v7823_v9 = vand.u32 4294901760, %v7822_v8  ;;  %v7846_v18 = vld [vmem:[#allocation70_spill] sm:$0xff] }
  0xc8   :  { %1152 = vmatprep.subr.mxu0 %v7789_v14  ;;  %1367 = vmatprep.subr.mxu1 %v4532_v23  ;;  %v7795_v23 = vld [vmem:[#allocation36_spill] sm:$0xff]  ;;  %v7814_v29 = vand.u32 4294901760, %v7813_v61  ;;  %v7858_v8 = vld [vmem:[#allocation78_spill] sm:$0xff] }
  0xc9   :  { %1156 = vmatpush1.msra.mxu0 %v7790_v15  ;;  %1369 = vmatpush1.msra.mxu1 %v4545_v28  ;;  %v7796_v48 = vand.u32 4294901760, %v7795_v23  ;;  %v7798_v28 = vld [vmem:[#allocation38_spill] sm:$0xff]  ;;  %v7824_v10 = vld [vmem:[#allocation24_spill] sm:$0xff] }
  0xca   :  { %1160 = vmatprep.subr.mxu0 %v7791_v16  ;;  %1371 = vmatprep.subr.mxu1 %v4551_v30  ;;  %v7799_v58 = vand.u32 4294901760, %v7798_v28  ;;  %v7801_v30 = vld [vmem:[#allocation40_spill] sm:$0xff]  ;;  %v7827_v16 = vld [vmem:[#allocation25_spill] sm:$0xff]  ;;  %v7834_v28 = vld [vmem:[#allocation62_spill] sm:$0xff] }
  0xcb   :  { %1164 = vmatpush1.msra.mxu0 %v7792_v21  ;;  %1373 = vmatpush1.msra.mxu1 %v7690_v45  ;;  %v7802_v0 = vand.u32 4294901760, %v7801_v30  ;;  %v7807_v45 = vld [vmem:[#allocation44_spill] sm:$0xff]  ;;  %v7828_v21 = vld [vmem:[#allocation58_spill] sm:$0xff] }
  0xcc   :  { %1168 = vmatprep.subr.mxu0 %v7793_v22  ;;  %1375 = vmatprep.subr.mxu1 %v7794_v17  ;;  %v7808_v60 = vand.u32 4294901760, %v7807_v45  ;;  %v7825_v14 = vld [vmem:[#allocation56_spill] sm:$0xff]  ;;  %v7829_v22 = vand.u32 4294901760, %v7828_v21  ;;  %v7830_v17 = vld [vmem:[#allocation26_spill] sm:$0xff] }
  0xcd   :  { %1172 = vmatpush1.msra.mxu0 %v7796_v48  ;;  %1377 = vmatpush1.msra.mxu1 %v7797_v49  ;;  %v7826_v15 = vand.u32 4294901760, %v7825_v14  ;;  %v7831_v23 = vld [vmem:[#allocation60_spill] sm:$0xff]  ;;  %v7833_v49 = vld [vmem:[#allocation27_spill] sm:$0xff]  ;;  %v7864_v21 = vld [vmem:[#allocation82_spill] sm:$0xff] }
  0xce   :  { %1176 = vmatprep.subr.mxu0 %v7799_v58  ;;  %1379 = vmatprep.subr.mxu1 %v7800_v63  ;;  %v7832_v48 = vand.u32 4294901760, %v7831_v23  ;;  %v7835_v58 = vand.u32 4294901760, %v7834_v28  ;;  %v7836_v63 = vld [vmem:[#allocation29_spill] sm:$0xff]  ;;  %v7837_v30 = vld [vmem:[#allocation64_spill] sm:$0xff]  ;;  %v7867_v23 = vand.u32 4294901760, %v7747_v59 }
  0xcf   :  { %1180 = vmatpush1.msra.mxu0 %v7802_v0  ;;  %1381 = vmatpush1.msra.mxu1 %v7803_v12  ;;  %v7838_v0 = vand.u32 4294901760, %v7837_v30  ;;  %v7839_v12 = vld [vmem:[#allocation31_spill] sm:$0xff]  ;;  %v7843_v45 = vld [vmem:[#allocation68_spill] sm:$0xff]  ;;  %v7870_v28 = vld [vmem:[#allocation53_spill] sm:$0xff] }
  0xd0   :  { %1184 = vmatprep.subr.mxu0 %v7805_v43  ;;  %1383 = vmatprep.subr.mxu1 %v7806_v2  ;;  %v7841_v43 = vand.u32 4294901760, %v7840_v55  ;;  %v7842_v2 = vld [vmem:[#allocation33_spill] sm:$0xff]  ;;  %v7849_v61 = vld [vmem:[#allocation72_spill] sm:$0xff] }
  0xd1   :  { %1188 = vmatpush1.msra.mxu0 %v7808_v60  ;;  %1385 = vmatpush1.msra.mxu1 %v7809_v20  ;;  %v7844_v60 = vand.u32 4294901760, %v7843_v45  ;;  %v7845_v20 = vld [vmem:[#allocation35_spill] sm:$0xff]  ;;  %v7861_v14 = vld [vmem:[#allocation80_spill] sm:$0xff]  ;;  %v7875_v59 = vld [vmem:[#allocation57_spill] sm:$0xff]  ;;  %v7876_v45 = vand.u32 4294901760, %v7755_v56 }
  0xd2   :  { %1192 = vmatprep.subr.mxu0 %v7811_v19  ;;  %1387 = vmatprep.subr.mxu1 %v7812_v36  ;;  %v7847_v19 = vand.u32 4294901760, %v7846_v18  ;;  %v7848_v36 = vld [vmem:[#allocation37_spill] sm:$0xff]  ;;  %v7878_v18 = vand.u32 4294901760, %v5232_v33  ;;  %v7881_v56 = vld [vmem:[#allocation63_spill] sm:$0xff] }
  0xd3   :  { %1196 = vmatpush1.msra.mxu0 %v7814_v29  ;;  %1389 = vmatpush1.msra.mxu1 %v7815_v31  ;;  %v7850_v29 = vand.u32 4294901760, %v7849_v61  ;;  %v7851_v31 = vld [vmem:[#allocation39_spill] sm:$0xff]  ;;  %v178_v55 = vld [vmem:[#allocation2 + $0x458] sm:$0xff]  ;;  %v147_v53 = vld [vmem:[#allocation2 + $0x360] sm:$0xff] }
  0xd4   :  { %1200 = vmatprep.subr.mxu0 %v7817_v41  ;;  %1391 = vmatprep.subr.mxu1 %v7818_v46  ;;  %v7853_v41 = vand.u32 4294901760, %v7852_v37  ;;  %v7854_v46 = vld [vmem:[#allocation41_spill] sm:$0xff]  ;;  %v172_v37 = vld [vmem:[#allocation2 + $0x428] sm:$0xff] }
  0xd5   :  { %1204 = vmatpush1.msra.mxu0 %v7820_v1  ;;  %1393 = vmatpush1.msra.mxu1 %v7821_v6  ;;  %v7856_v1 = vand.u32 4294901760, %v7855_v51  ;;  %v7857_v6 = vld [vmem:[#allocation43_spill] sm:$0xff]  ;;  %v174_v61 = vld [vmem:[#allocation2 + $0x438] sm:$0xff]  ;;  %v7884_v51 = vand.u32 4294901760, %v5269_v38 }
  0xd6   :  { %1208 = vmatprep.subr.mxu0 %v7823_v9  ;;  %1395 = vmatprep.subr.mxu1 %v7824_v10  ;;  %v7859_v9 = vand.u32 4294901760, %v7858_v8  ;;  %v7860_v10 = vld [vmem:[#allocation45_spill] sm:$0xff]  ;;  %v169_v8 = vld [vmem:[#allocation2 + $0x410] sm:$0xff] }
  0xd7   :  { %1212 = vmatpush1.msra.mxu0 %v7826_v15  ;;  %1397 = vmatpush1.msra.mxu1 %v7827_v16  ;;  %v7862_v15 = vand.u32 4294901760, %v7861_v14  ;;  %v7863_v16 = vld [vmem:[#allocation47_spill] sm:$0xff]  ;;  %v7883_v33 = vld [vmem:[#allocation65_spill] sm:$0xff] }
  0xd8   :  { %1216 = vmatprep.subr.mxu0 %v7829_v22  ;;  %1399 = vmatprep.subr.mxu1 %v7830_v17  ;;  %v7865_v22 = vand.u32 4294901760, %v7864_v21  ;;  %v7866_v17 = vld [vmem:[#allocation49_spill] sm:$0xff]  ;;  %v7891_v21 = vld [vmem:[#allocation71_spill] sm:$0xff] }
  0xd9   :  { %1220 = vmatpush2.msra.mxu0 %v7832_v48  ;;  %1401 = vmatpush1.msra.mxu1 %v7833_v49  ;;  %v7868_v48 = vld [vmem:[#allocation51_spill] sm:$0xff]  ;;  %v7869_v49 = vand.u32 4294901760, %v7749_v42 }
  0xda   :  { %1224 = vmatprep.subr.mxu0 %v7835_v58  ;;  %1403 = vmatprep.subr.mxu1 %v7836_v63  ;;  %v181_v58 = vld [vmem:[#allocation2 + $0x470] sm:$0xff] }
  0xdb   :  { %1228 = vmatpush2.msra.mxu0 %v7838_v0  ;;  %1405 = vmatpush1.msra.mxu1 %v7839_v12  ;;  %v7871_v63 = vld [vmem:[#allocation88_spill] sm:$0xff]  ;;  %v7873_v0 = vld [vmem:[#allocation55_spill] sm:$0xff] }
  0xdc   :  { %1232 = vmatprep.subr.mxu0 %v7841_v43  ;;  %1407 = vmatprep.subr.mxu1 %v7842_v2  ;;  %v7872_v30 = vand.u32 4294901760, %v7871_v63  ;;  %v180_v12 = vld [vmem:[#allocation2 + $0x468] sm:$0xff]  ;;  %v7874_v43 = vand.u32 4294901760, %v7753_v57  ;;  %v177_v2 = vld [vmem:[#allocation2 + $0x450] sm:$0xff]  ;;  %v5689_v57 = vand.u32 4294901760, %v178_v55 }
  0xdd   :  { %1236 = vmatpush2.msra.mxu0 %v7844_v60  ;;  %1409 = vmatpush1.msra.mxu1 %v7845_v20  ;;  %v7877_v42 = vld [vmem:[#allocation59_spill] sm:$0xff]  ;;  %v5682_v60 = vand.u32 4294901760, %v181_v58  ;;  %v175_v20 = vld [vmem:[#allocation2 + $0x440] sm:$0xff] }
  0xde   :  { %1240 = vmatprep.subr.mxu0 %v7847_v19  ;;  %1411 = vmatprep.subr.mxu1 %v7848_v36  ;;  %v7879_v19 = vld [vmem:[#allocation61_spill] sm:$0xff]  ;;  %v5687_v36 = vand.u32 4294901760, %v180_v12  ;;  %v5718_v38 = vsub.f32 %v178_v55, %v5689_v57  ;;  %v165_v63 = vld [vmem:[#allocation2 + $0x3f0] sm:$0xff] }
  0xdf   :  { %1244 = vmatpush2.msra.mxu0 %v7850_v29  ;;  %1413 = vmatpush1.msra.mxu1 %v7851_v31  ;;  %v7880_v29 = vand.u32 4294901760, %v5243_v47  ;;  %v5694_v31 = vand.u32 4294901760, %v177_v2  ;;  %v171_v47 = vld [vmem:[#allocation2 + $0x420] sm:$0xff] }
  0xe0   :  { %1248 = vmatprep.subr.mxu0 %v7853_v41  ;;  %1415 = vmatprep.subr.mxu1 %v7854_v46  ;;  %v7882_v41 = vand.u32 4294901760, %v7759_v24  ;;  %v5699_v46 = vand.u32 4294901760, %v175_v20  ;;  %v7888_v24 = vld [vmem:[#allocation69_spill] sm:$0xff]  ;;  %v5713_v14 = vsub.f32 %v180_v12, %v5687_v36  ;;  %v7436_v55 = vand.u32 4294901760, %v5718_v38 }
  0xe1   :  { %1252 = vmatpush2.msra.mxu0 %v7856_v1  ;;  %1417 = vmatpush2.msra.mxu1 %v7857_v6  ;;  %v7885_v1 = vld [vmem:[#allocation67_spill] sm:$0xff]  ;;  %v5704_v6 = vand.u32 4294901760, %v174_v61  ;;  %v166_v12 = vld [vmem:[#allocation2 + $0x3f8] sm:$0xff] }
  0xe2   :  { %1256 = vmatprep.subr.mxu0 %v7859_v9  ;;  %1419 = vmatprep.subr.mxu1 %v7860_v10  ;;  %v5707_v9 = vsub.f32 %v181_v58, %v5682_v60  ;;  %v7887_v10 = vand.u32 4294901760, %v5289_v52  ;;  %v7892_v52 = vand.u32 4294901760, %v5312_v26 }
  0xe3   :  { %1260 = vmatpush2.msra.mxu0 %v7862_v15  ;;  %1421 = vmatpush2.msra.mxu1 %v7863_v16  ;;  %7886 = vst [vmem:[#allocation13_spill] sm:$0xff] %v5704_v6  ;;  %v5715_v15 = vand.u32 4294901760, %v172_v37  ;;  %v7890_v16 = vand.u32 4294901760, %v5300_v54  ;;  %v7896_v54 = vand.u32 4294901760, %v5316_v34  ;;  %v5740_v58 = vsub.f32 %v174_v61, %v5704_v6 }
  0xe4   :  { %1264 = vmatprep.subr.mxu0 %v7865_v22  ;;  %1423 = vmatprep.subr.mxu1 %v7866_v17  ;;  %v5724_v22 = vsub.f32 %v177_v2, %v5694_v31  ;;  %v7893_v17 = vld [vmem:[#allocation73_spill] sm:$0xff]  ;;  %v7440_v26 = vand.u32 4294901760, %v5707_v9  ;;  %v5777_v61 = vand.u32 4294901760, %v166_v12 }
  0xe5   :  { %1268 = vmatpush2.msra.mxu0 %v7867_v23  ;;  %1425 = vmatpush2.msra.mxu1 %v7868_v48  ;;  %7889 = vst [vmem:[#allocation28_spill] sm:$0xff] %v5715_v15  ;;  %v5729_v23 = vand.u32 4294901760, %v171_v47  ;;  %v5731_v48 = vand.u32 4294901760, %v169_v8  ;;  %v5749_v34 = vsub.f32 %v172_v37, %v5715_v15  ;;  %v7907_v37 = vld [vmem:[#allocation85_spill] sm:$0xff] }
  0xe6   :  { %1272 = vmatprep.subr.mxu0 %v7869_v49  ;;  %1427 = vmatprep.subr.mxu1 %v7870_v28  ;;  %v168_v49 = vld [vmem:[#allocation2 + $0x408] sm:$0xff]  ;;  %v5734_v28 = vsub.f32 %v175_v20, %v5699_v46  ;;  %v162_v20 = vld [vmem:[#allocation2 + $0x3d8] sm:$0xff]  ;;  %7905 = vst [vmem:[#allocation86_spill] sm:$0xff] %v5777_v61 }
  0xe7   :  { %1276 = vmatpush2.msra.mxu0 %v7872_v30  ;;  %1429 = vmatpush2.msra.mxu1 %v7873_v0  ;;  %7894 = vst [vmem:[#allocation30_spill] sm:$0xff] %v5729_v23  ;;  %7895 = vst [vmem:[#allocation32_spill] sm:$0xff] %v5731_v48  ;;  %v7897_v30 = vand.u32 4294901760, %v5331_v4  ;;  %v7438_v0 = vand.u32 4294901760, %v5713_v14  ;;  %v7435_v4 = vand.u32 4294901760, %v5724_v22  ;;  %v5761_v2 = vsub.f32 %v171_v47, %v5729_v23 }
  0xe8   :  { %1280 = vmatprep.subr.mxu0 %v7874_v43  ;;  %1431 = vmatprep.subr.mxu1 %v7875_v59  ;;  %v5754_v43 = vand.u32 4294901760, %v168_v49  ;;  %v7900_v59 = vand.u32 4294901760, %v5358_v7  ;;  %v5775_v7 = vsub.f32 %v5707_v9, %v7440_v26 }
  0xe9   :  { %1284 = vmatpush2.msra.mxu0 %v7876_v45  ;;  %1433 = vmatpush2.msra.mxu1 %v7877_v42  ;;  %v5763_v45 = vand.u32 4294901760, %v165_v63  ;;  %v163_v42 = vld [vmem:[#allocation2 + $0x3e0] sm:$0xff] }
  0xea   :  { %1288 = vmatprep.subr.mxu0 %v7878_v18  ;;  %1435 = vmatprep.subr.mxu1 %v7879_v19  ;;  %7899 = vst [vmem:[#allocation34_spill] sm:$0xff] %v5754_v43  ;;  %v7903_v18 = vand.u32 4294901760, %v5366_v50  ;;  %v7904_v19 = vld [vmem:[#allocation83_spill] sm:$0xff]  ;;  %v5786_v50 = vsub.f32 %v5713_v14, %v7438_v0 }
  0xeb   :  { %1292 = vmatpush2.msra.mxu0 %v7880_v29  ;;  %1437 = vmatpush2.msra.mxu1 %v7881_v56  ;;  %7902 = vst [vmem:[#allocation84_spill] sm:$0xff] %v5763_v45  ;;  %v7432_v29 = vand.u32 4294901760, %v5740_v58  ;;  %v7906_v56 = vand.u32 4294901760, %v5380_v5  ;;  %v7910_v5 = vld [vmem:[#allocation99_spill] sm:$0xff] }
  0xec   :  { %1296 = vmatprep.subr.mxu0 %v7882_v41  ;;  %1439 = vmatprep.subr.mxu1 %v7883_v33  ;;  %v5791_v41 = vsub.f32 %v5718_v38, %v7436_v55  ;;  %v7433_v33 = vand.u32 4294901760, %v5749_v34 }
  0xed   :  { %1300 = vmatpush2.msra.mxu0 %v7884_v51  ;;  %1441 = vmatpush2.msra.mxu1 %v7885_v1  ;;  %v159_v51 = vld [vmem:[#allocation2 + $0x3c0] sm:$0xff]  ;;  %v7908_v1 = vld [vmem:[#allocation104_spill] sm:$0xff] }
  0xee   :  { %1304 = vmatprep.subr.mxu0 %v7887_v10  ;;  %1443 = vmatprep.subr.mxu1 %v7888_v24  ;;  %v7909_v47 = vand.u32 4294901760, %v7908_v1  ;;  %v5803_v10 = vsub.f32 %v5724_v22, %v7435_v4  ;;  %v5805_v24 = vand.u32 4294901760, %v163_v42  ;;  %v148_v1 = vld [vmem:[#allocation2 + $0x368] sm:$0xff] }
  0xef   :  { %1308 = vmatpush2.msra.mxu0 %v7890_v16  ;;  %1445 = vmatpush2.msra.mxu1 %v7891_v21  ;;  %v5807_v16 = vand.u32 4294901760, %v162_v20  ;;  %v160_v21 = vld [vmem:[#allocation2 + $0x3c8] sm:$0xff] }
  0xf0   :  { %1312 = vmatprep.subr.mxu0 %v7892_v52  ;;  %1447 = vmatprep.subr.mxu1 %v7893_v17  ;;  %7911 = vst [vmem:[#allocation90_spill] sm:$0xff] %v5805_v24  ;;  %v7913_v52 = vld [vmem:[#allocation87_spill] sm:$0xff]  ;;  %v7914_v17 = vld [vmem:[#allocation98_spill] sm:$0xff] }
  0xf1   :  { %1316 = vmatpush2.msra.mxu0 %v7896_v54  ;;  %1449 = vmatpush2.msra.mxu1 %v7762_v3  ;;  %v7898_v3 = vand.u32 4294901760, %v5340_v32  ;;  %v7434_v32 = vand.u32 4294901760, %v5734_v28  ;;  %7912 = vst [vmem:[#allocation92_spill] sm:$0xff] %v5807_v16  ;;  %v5812_v54 = vsub.f32 %v165_v63, %v5763_v45  ;;  %v5827_v63 = vsub.f32 %v5740_v58, %v7432_v29 }
  0xf2   :  { %1320 = vmatprep.subr.mxu0 %v7897_v30  ;;  %1451 = vmatprep.subr.mxu1 %v7763_v35  ;;  %v7901_v35 = vld [vmem:[#allocation81_spill] sm:$0xff]  ;;  %v7437_v30 = vand.u32 4294901760, %v5761_v2  ;;  %v5853_v29 = vsub.f32 %v163_v42, %v5805_v24 }
  0xf3   :  { %1324 = vmatpush2.msra.mxu0 %v7898_v3  ;;  %1453 = vmatpush2.msra.mxu1 %v7764_v25  ;;  %v5767_v25 = vsub.f32 %v169_v8, %v5731_v48  ;;  %v5798_v8 = vsub.f32 %v168_v49, %v5754_v43  ;;  %v5817_v49 = vsub.f32 %v5734_v28, %v7434_v32  ;;  %v153_v32 = vld [vmem:[#allocation2 + $0x390] sm:$0xff]  ;;  %v7443_v42 = vand.u32 4294901760, %v5812_v54 }
  0xf4   :  { %1328 = vmatprep.subr.mxu0 %v7900_v59  ;;  %1455 = vmatprep.subr.mxu1 %v7901_v35  ;;  %v7915_v59 = vld [vmem:[#allocation89_spill] sm:$0xff]  ;;  %v1599_v35 = vand.u32 4294901760, %v5775_v7  ;;  %v5843_v7 = vsub.f32 %v5749_v34, %v7433_v33 }
  0xf5   :  { %1332 = vmatpush2.msra.mxu0 %v7903_v18  ;;  %1457 = vmatpush2.msra.mxu1 %v7904_v19  ;;  %v7439_v3 = vand.u32 4294901760, %v5767_v25  ;;  %v5829_v18 = vand.u32 4294901760, %v159_v51  ;;  %v5832_v19 = vsub.f32 %v166_v12, %v5777_v61  ;;  %v5895_v12 = vand.u32 4294901760, %v153_v32 }
  0xf6   :  { %1336 = vmatprep.subr.mxu0 %v7906_v56  ;;  %1459 = vmatprep.subr.mxu1 %v7907_v37  ;;  %v7917_v56 = vld [vmem:[#allocation91_spill] sm:$0xff]  ;;  %v1605_v37 = vand.u32 4294901760, %v5786_v50 }
  0xf7   :  { %1340 = vmatpush2.msra.mxu0 %v7909_v47  ;;  %1342 = vmatprep.mubr.f32.mxu0 %v7910_v5  ;;  %7916 = vst [vmem:[#allocation94_spill] sm:$0xff] %v5829_v18  ;;  %v5838_v47 = vand.u32 4294901760, %v160_v21  ;;  %v157_v50 = vld [vmem:[#allocation2 + $0x3b0] sm:$0xff]  ;;  %v5873_v4 = vsub.f32 %v159_v51, %v5829_v18  ;;  %7924 = vst [vmem:[#allocation95_spill] sm:$0xff] %v5895_v12  ;;  %v5934_v62 = vsub.f32 %v153_v32, %v5895_v12 }
  0xf8   :  { %1461 = vmatpush2.msra.mxu1 %v7913_v52  ;;  %1344 = vmatmul.mubr.f32.vlgmr.msra.gmra.mxu0 %v7914_v17  ;;  %v156_v52 = vld [vmem:[#allocation2 + $0x3a8] sm:$0xff]  ;;  %v5881_v26 = vand.u32 4294901760, %v157_v50  ;;  %v5952_v32 = vand.u32 4294901760, %v147_v53 }
  0xf9   :  { %1463 = vmatprep.subr.mxu1 %v7915_v59  ;;  %1488 = vmatprep.subr.mxu0 %v5682_v60  ;;  %7918 = vst [vmem:[#allocation75_spill] sm:$0xff] %v5838_v47  ;;  %v5849_v59 = vsub.f32 %v162_v20, %v5807_v16  ;;  %v5866_v20 = vsub.f32 %v5767_v25, %v7439_v3  ;;  %7919 = vst [vmem:[#allocation77_spill] sm:$0xff] %v5873_v4  ;;  %v5875_v55 = vand.u32 4294901760, %v156_v52  ;;  %v151_v3 = vld [vmem:[#allocation2 + $0x380] sm:$0xff] }
  0xfa   :  { %1465 = vmatpush2.msra.mxu1 %v7917_v56  ;;  %1490 = vmatpush1.msra.mxu0 %v5687_v36  ;;  %v7441_v56 = vand.u32 4294901760, %v5798_v8  ;;  %7921 = vst [vmem:[#allocation12_spill] sm:$0xff] %v5881_v26  ;;  %v5884_v33 = vsub.f32 %v160_v21, %v5838_v47  ;;  %7929 = vst [vmem:[#allocation36_spill] sm:$0xff] %v5934_v62 }
  0xfb   :  { %1467 = vmatprep.subr.mxu1 %v5223_v39  ;;  %1492 = vmatprep.subr.mxu0 %v5689_v57  ;;  %v5861_v39 = vsub.f32 %v5761_v2, %v7437_v30  ;;  %7920 = vst [vmem:[#allocation79_spill] sm:$0xff] %v5875_v55  ;;  %v154_v30 = vld [vmem:[#allocation2 + $0x398] sm:$0xff]  ;;  %v5913_v21 = vsub.f32 %v156_v52, %v5875_v55  ;;  %7934 = vst [vmem:[#allocation38_spill] sm:$0xff] %v5952_v32 }
  0xfc   :  { %1469 = vmatpush2.msra.mxu1 %v7771_v27  ;;  %1494 = vmatpush1.msra.mxu0 %v5694_v31  ;;  %7922 = vst [vmem:[#allocation93_spill] sm:$0xff] %v5884_v33  ;;  %v7923_v27 = vld [vmem:[#allocation96_spill] sm:$0xff]  ;;  %v5903_v0 = vand.u32 4294901760, %v154_v30  ;;  %v5928_v52 = vsub.f32 %v157_v50, %v5881_v26 }
  0xfd   :  { %1471 = vmatprep.subr.mxu1 %v5246_v44  ;;  %1496 = vmatprep.subr.mxu0 %v5699_v46  ;;  %v150_v44 = vld [vmem:[#allocation2 + $0x378] sm:$0xff]  ;;  %v184_v51 = vcombine.high %v7923_v27, %v7923_v27 }
  0xfe   :  { %1473 = vmatpush2.msra.mxu1 %v7774_v40  ;;  %1498 = vmatpush1.msra.mxu0 %v5704_v6  ;;  %v5893_v40 = vsub.f32 %v5798_v8, %v7441_v56  ;;  %7925 = vst [vmem:[#allocation97_spill] sm:$0xff] %v5903_v0  ;;  %v5908_v56 = vsub.f32 %v5812_v54, %v7443_v42  ;;  %v5920_v27 = vand.u32 4294901760, %v150_v44  ;;  %v5924_v42 = vand.u32 4294901760, %v151_v3  ;;  %v141_v6 = vld [vmem:[#allocation2 + $0x330] sm:$0xff] }
  0xff   :  { %1475 = vmatprep.subr.mxu1 %v5278_v11  ;;  %1500 = vmatprep.subr.mxu0 %v5715_v15  ;;  %v1641_v11 = vand.u32 4294901760, %v5861_v39 }
 0x100   :  { %1477 = vmatpush2.msra.mxu1 %v7777_v13  ;;  %1479 = vmatprep.mubr.f32.mxu1 %v7910_v5  ;;  %v7926_v13 = vand.u32 4294901760, %v5832_v19  ;;  %7927 = vst [vmem:[#allocation14_spill] sm:$0xff] %v5920_v27  ;;  %v144_v5 = vld [vmem:[#allocation2 + $0x348] sm:$0xff]  ;;  %v1653_v15 = vand.u32 4294901760, %v5893_v40  ;;  %v5950_v40 = vand.u32 4294901760, %v148_v1 }
 0x101   :  { %1502 = vmatpush1.msra.mxu0 %v5729_v23  ;;  %1481 = vmatmul.mubr.f32.vlgmr.msra.gmra.mxu1 %v7914_v17  ;;  %v7928_v23 = vld [vmem:[#allocation11_spill] sm:$0xff]  ;;  %v7931_v17 = vand.u32 4294901760, %v5849_v59 }
 0x102   :  { %v5918_v39 = vsub.f32 %v5832_v19, %v7926_v13  ;;  %1504 = vmatprep.subr.mxu0 %v5731_v48  ;;  %1600 = vmatprep.subr.mxu1 %v1599_v35  ;;  %v198_v13 = vrot.slane %v184_v51, %v7928_v23  ;;  %v7930_v35 = vand.u32 4294901760, %v5853_v29  ;;  %v7932_v51 = vand.u32 4294901760, %v5791_v41  ;;  %7933 = vst [vmem:[#allocation15_spill] sm:$0xff] %v5950_v40  ;;  %v145_v23 = vld [vmem:[#allocation2 + $0x350] sm:$0xff] }
 0x103   :  { %1506 = vmatpush1.msra.mxu0 %v5754_v43  ;;  %1606 = vmatpush1.msra.mxu1 %v1605_v37  ;;  %v5944_v50 = vsub.f32 %v5849_v59, %v7931_v17  ;;  %v1665_v37 = vand.u32 4294901760, %v5908_v56  ;;  %v7935_v17 = vand.u32 4294901760, %v5803_v10  ;;  %v5962_v41 = vsub.f32 %v150_v44, %v5920_v27 }
 0x104   :  { %v5939_v48 = vsub.f32 %v5853_v29, %v7930_v35  ;;  %1508 = vmatprep.subr.mxu0 %v5777_v61  ;;  %1612 = vmatprep.subr.mxu1 %v7932_v51  ;;  %v5955_v35 = vsub.f32 %v154_v30, %v5903_v0  ;;  %v1659_v61 = vand.u32 4294901760, %v5918_v39  ;;  %v7936_v56 = vand.u32 4294901760, %v5873_v4 }
 0x105   :  { %1510 = vmatpush1.msra.mxu0 %v5763_v45  ;;  %1618 = vmatpush1.msra.mxu1 %v7935_v17  ;;  %v5969_v43 = vand.u32 4294901760, %v144_v5  ;;  %v7937_v30 = vand.u32 4294901760, %v5817_v49  ;;  %v7938_v10 = vand.u32 4294901760, %v5884_v33  ;;  %v142_v17 = vld [vmem:[#allocation2 + $0x338] sm:$0xff]  ;;  %v5981_v45 = vsub.f32 %v151_v3, %v5924_v42 }
 0x106   :  { %v5967_v51 = vsub.f32 %v5873_v4, %v7936_v56  ;;  %1512 = vmatprep.subr.mxu0 %v5805_v24  ;;  %v5983_v56 = vand.u32 4294901760, %v198_v13  ;;  %v7940_v24 = vand.u32 4294901760, %v5827_v63  ;;  %v1671_v49 = vand.u32 4294901760, %v5939_v48 }
 0x107   :  { %1624 = vmatprep.subr.mxu1 %v7937_v30  ;;  %v5977_v39 = vsub.f32 %v5884_v33, %v7938_v10  ;;  %1514 = vmatpush1.msra.mxu0 %v5807_v16  ;;  %v1677_v30 = vand.u32 4294901760, %v5944_v50  ;;  %v5990_v4 = vand.u32 4294901760, %v145_v23  ;;  %v7941_v3 = vand.u32 4294901760, %v5843_v7 }
 0x108   :  { %7939 = vst [vmem:[#allocation16_spill] sm:$0xff] %v5983_v56  ;;  %1630 = vmatpush1.msra.mxu1 %v7940_v24  ;;  %1516 = vmatprep.subr.mxu0 %v5838_v47  ;;  %v5997_v44 = vsub.f32 %v147_v53, %v5952_v32  ;;  %v6000_v63 = vand.u32 4294901760, %v141_v6  ;;  %v139_v24 = vld [vmem:[#allocation2 + $0x320] sm:$0xff]  ;;  %v6003_v48 = vsub.f32 %v148_v1, %v5950_v40  ;;  %v1689_v50 = vand.u32 4294901760, %v5967_v51 }
 0x109   :  { %1636 = vmatprep.subr.mxu1 %v7941_v3  ;;  %1518 = vmatpush1.msra.mxu0 %v5829_v18  ;;  %v6008_v10 = vsub.f32 %v144_v5, %v5969_v43  ;;  %v6010_v7 = vand.u32 4294901760, %v142_v17  ;;  %v138_v3 = vld [vmem:[#allocation2 + $0x318] sm:$0xff]  ;;  %v7943_v16 = vand.u32 4294901760, %v5866_v20  ;;  %v1683_v1 = vand.u32 4294901760, %v5977_v39  ;;  %v136_v5 = vld [vmem:[#allocation2 + $0x308] sm:$0xff]  ;;  %v135_v47 = vld [vmem:[#allocation2 + $0x300] sm:$0xff] }
 0x10a   :  { %7942 = vst [vmem:[#allocation40_spill] sm:$0xff] %v6003_v48  ;;  %1642 = vmatpush1.msra.mxu1 %v1641_v11  ;;  %1520 = vmatprep.subr.mxu0 %v5881_v26  ;;  %v7944_v18 = vand.u32 4294901760, %v5928_v52  ;;  %v6022_v33 = vsub.f32 %v198_v13, %v5983_v56  ;;  %v7946_v53 = vand.u32 4294901760, %v5913_v21  ;;  %v6028_v20 = vand.u32 4294901760, %v139_v24 }
 0x10b   :  { %1648 = vmatprep.subr.mxu1 %v7943_v16  ;;  %1522 = vmatpush1.msra.mxu0 %v5875_v55  ;;  %v7948_v13 = vand.u32 4294901760, %v5955_v35  ;;  %v6041_v55 = vand.u32 4294901760, %v138_v3 }
 0x10c   :  { %v1694_v11 = vsub.f32 %v5928_v52, %v7944_v18  ;;  %7945 = vst [vmem:[#allocation17_spill] sm:$0xff] %v6022_v33  ;;  %1654 = vmatpush1.msra.mxu1 %v1653_v15  ;;  %v1700_v16 = vsub.f32 %v5913_v21, %v7946_v53  ;;  %v6032_v18 = vsub.f32 %v145_v23, %v5990_v4  ;;  %v7949_v23 = vand.u32 4294901760, %v5934_v62 }
 0x10d   :  { %1524 = vmatprep.subr.mxu0 %v5903_v0  ;;  %1660 = vmatprep.subr.mxu1 %v1659_v61  ;;  %v1706_v51 = vsub.f32 %v5955_v35, %v7948_v13  ;;  %v6039_v15 = vsub.f32 %v141_v6, %v6000_v63  ;;  %v6048_v0 = vand.u32 4294901760, %v136_v5  ;;  %v6050_v61 = vand.u32 4294901760, %v135_v47 }
 0x10e   :  { %7947 = vst [vmem:[#allocation42_spill] sm:$0xff] %v6032_v18  ;;  %1526 = vmatpush1.msra.mxu0 %v5895_v12  ;;  %1666 = vmatpush1.msra.mxu1 %v1665_v37  ;;  %v1712_v39 = vsub.f32 %v5934_v62, %v7949_v23  ;;  %v6053_v13 = vsub.f32 %v142_v17, %v6010_v7  ;;  %v1695_v6 = vand.u32 4294901760, %v1694_v11  ;;  %v7950_v53 = vand.u32 4294901760, %v5981_v45 }
 0x10f   :  { %1528 = vmatprep.subr.mxu0 %v5924_v42  ;;  %1672 = vmatprep.subr.mxu1 %v1671_v49  ;;  %v6061_v26 = vand.u32 4294901760, %v6022_v33  ;;  %v1701_v23 = vand.u32 4294901760, %v1700_v16  ;;  %v7952_v17 = vand.u32 4294901760, %v5962_v41  ;;  %v6069_v11 = vsub.f32 %v139_v24, %v6028_v20 }
 0x110   :  { %v1718_v12 = vsub.f32 %v5981_v45, %v7950_v53  ;;  %1530 = vmatpush1.msra.mxu0 %v5920_v27  ;;  %1678 = vmatpush1.msra.mxu1 %v1677_v30  ;;  %v1707_v53 = vand.u32 4294901760, %v1706_v51  ;;  %v6073_v37 = vsub.f32 %v138_v3, %v6041_v55  ;;  %v7955_v27 = vand.u32 4294901760, %v6003_v48 }
 0x111   :  { %7951 = vst [vmem:[#allocation18_spill] sm:$0xff] %v6061_v26  ;;  %v1724_v62 = vsub.f32 %v5962_v41, %v7952_v17  ;;  %7953 = vst [vmem:[#allocation44_spill] sm:$0xff] %v6069_v11  ;;  %1532 = vmatprep.subr.mxu0 %v5950_v40  ;;  %1684 = vmatprep.subr.mxu1 %v1683_v1  ;;  %v7484_v16 = vand.u32 4294901760, %v6008_v10  ;;  %v1713_v17 = vand.u32 4294901760, %v1712_v39 }
 0x112   :  { %7954 = vst [vmem:[#allocation19_spill] sm:$0xff] %v6073_v37  ;;  %v1730_v30 = vsub.f32 %v6003_v48, %v7955_v27  ;;  %1534 = vmatpush1.msra.mxu0 %v5952_v32  ;;  %1690 = vmatpush1.msra.mxu1 %v1689_v50  ;;  %v6081_v24 = vsub.f32 %v135_v47, %v6050_v61  ;;  %v1719_v3 = vand.u32 4294901760, %v1718_v12  ;;  %v7958_v27 = vand.u32 4294901760, %v5997_v44 }
 0x113   :  { %v6085_v1 = vsub.f32 %v136_v5, %v6048_v0  ;;  %1536 = vmatprep.subr.mxu0 %v5990_v4  ;;  %1696 = vmatprep.subr.mxu1 %v1695_v6  ;;  %v1587_v50 = vsub.f32 %v6022_v33, %v6061_v26  ;;  %v1725_v47 = vand.u32 4294901760, %v1724_v62  ;;  %v7959_v5 = vand.u32 4294901760, %v6032_v18 }
 0x114   :  { %7956 = vst [vmem:[#allocation46_spill] sm:$0xff] %v6081_v24  ;;  %v1736_v51 = vsub.f32 %v5997_v44, %v7958_v27  ;;  %1538 = vmatpush1.msra.mxu0 %v5969_v43  ;;  %1702 = vmatpush1.msra.mxu1 %v1701_v23  ;;  %v1731_v12 = vand.u32 4294901760, %v1730_v30  ;;  %v1748_v27 = vsub.f32 %v6008_v10, %v7484_v16  ;;  %v7960_v62 = vand.u32 4294901760, %v6053_v13 }
 0x115   :  { %7957 = vst [vmem:[#allocation20_spill] sm:$0xff] %v6085_v1  ;;  %v1742_v49 = vsub.f32 %v6032_v18, %v7959_v5  ;;  %1540 = vmatprep.subr.mxu0 %v6010_v7  ;;  %1708 = vmatprep.subr.mxu1 %v1707_v53  ;;  %v6110_v30 = vand.u32 4294901760, %v1587_v50  ;;  %v7962_v6 = vand.u32 4294901760, %v6039_v15 }
 0x116   :  { %1542 = vmatpush1.msra.mxu0 %v6000_v63  ;;  %1714 = vmatpush1.msra.mxu1 %v1713_v17  ;;  %v1754_v23 = vsub.f32 %v6053_v13, %v7960_v62  ;;  %v1737_v53 = vand.u32 4294901760, %v1736_v51  ;;  %v7963_v62 = vand.u32 4294901760, %v6069_v11  ;;  %v7964_v51 = vand.u32 4294901760, %v6073_v37 }
 0x117   :  { %1544 = vmatprep.subr.mxu0 %v6028_v20  ;;  %1720 = vmatprep.subr.mxu1 %v1719_v3  ;;  %7961 = vst [vmem:[#allocation48_spill] sm:$0xff] %v6110_v30  ;;  %v1760_v16 = vsub.f32 %v6039_v15, %v7962_v6  ;;  %v1743_v17 = vand.u32 4294901760, %v1742_v49  ;;  %v1749_v3 = vand.u32 4294901760, %v1748_v27  ;;  %v7485_v6 = vmov 0.0  }
 0x118   :  { %1546 = vmatpush1.msra.mxu0 %v6041_v55  ;;  %1726 = vmatpush1.msra.mxu1 %v1725_v47  ;;  %v1766_v5 = vsub.f32 %v6069_v11, %v7963_v62  ;;  %v1772_v50 = vsub.f32 %v6073_v37, %v7964_v51  ;;  %v1755_v39 = vand.u32 4294901760, %v1754_v23  ;;  %v7965_v49 = vand.u32 4294901760, %v6085_v1 }
 0x119   :  { %1548 = vmatprep.subr.mxu0 %v6048_v0  ;;  %1732 = vmatprep.subr.mxu1 %v1731_v12  ;;  %v1761_v62 = vand.u32 4294901760, %v1760_v16  ;;  %v7966_v12 = vand.u32 4294901760, %v6081_v24 }
 0x11a   :  { %1550 = vmatpush1.msra.mxu0 %v6050_v61  ;;  %1583 = vmatprep.mubr.f32.mxu0 %v7485_v6  ;;  %v1778_v47 = vsub.f32 %v6085_v1, %v7965_v49  ;;  %v1767_v51 = vand.u32 4294901760, %v1766_v5  ;;  %v1773_v23 = vand.u32 4294901760, %v1772_v50  ;;  %v7968_v5 = vld [vmem:[#allocation93_spill] sm:$0xff]  ;;  %v7972_v50 = vld [vmem:[#allocation32_spill] sm:$0xff] }
 0x11b   :  { %1738 = vmatpush1.msra.mxu1 %v1737_v53  ;;  %1589 = vmatmul.mubr.f32.vlgmr.msra.gmra.mxu0 %v6110_v30  ;;  %v1784_v27 = vsub.f32 %v6081_v24, %v7966_v12  ;;  %v7969_v53 = vld [vmem:[#allocation28_spill] sm:$0xff]  ;;  %v7982_v30 = vld [vmem:[#allocation79_spill] sm:$0xff] }
 0x11c   :  { %1744 = vmatprep.subr.mxu1 %v1743_v17  ;;  %1829 = vmatprep.subr.mxu0 %v5707_v9  ;;  %v1779_v49 = vand.u32 4294901760, %v1778_v47  ;;  %v7970_v17 = vld [vmem:[#allocation77_spill] sm:$0xff]  ;;  %v7973_v47 = vld [vmem:[#allocation34_spill] sm:$0xff]  ;;  %v7975_v12 = vld [vmem:[#allocation36_spill] sm:$0xff] }
 0x11d   :  { %1750 = vmatpush1.msra.mxu1 %v1749_v3  ;;  %1832 = vmatpush1.msra.mxu0 %v5713_v14  ;;  %v1785_v16 = vand.u32 4294901760, %v1784_v27  ;;  %v7971_v3 = vld [vmem:[#allocation30_spill] sm:$0xff]  ;;  %v7976_v27 = vld [vmem:[#allocation84_spill] sm:$0xff] }
 0x11e   :  { %1756 = vmatprep.subr.mxu1 %v1755_v39  ;;  %1835 = vmatprep.subr.mxu0 %v5718_v38  ;;  %v7967_v39 = vld [vmem:[#allocation13_spill] sm:$0xff] }
 0x11f   :  { %1762 = vmatpush1.msra.mxu1 %v1761_v62  ;;  %1838 = vmatpush1.msra.mxu0 %v5724_v22  ;;  %v7974_v62 = vld [vmem:[#allocation86_spill] sm:$0xff] }
 0x120   :  { %1768 = vmatprep.subr.mxu1 %v1767_v51  ;;  %1841 = vmatprep.subr.mxu0 %v5734_v28  ;;  %v7977_v51 = vld [vmem:[#allocation90_spill] sm:$0xff] }
 0x121   :  { %1774 = vmatpush1.msra.mxu1 %v1773_v23  ;;  %1844 = vmatpush1.msra.mxu0 %v5740_v58  ;;  %v7978_v23 = vld [vmem:[#allocation92_spill] sm:$0xff] }
 0x122   :  { %1780 = vmatprep.subr.mxu1 %v1779_v49  ;;  %1847 = vmatprep.subr.mxu0 %v5749_v34  ;;  %v7979_v49 = vld [vmem:[#allocation75_spill] sm:$0xff] }
 0x123   :  { %1786 = vmatpush1.msra.mxu1 %v1785_v16  ;;  %1819 = vmatprep.mubr.f32.mxu1 %v7485_v6  ;;  %v7980_v16 = vld [vmem:[#allocation94_spill] sm:$0xff]  ;;  %v7981_v6 = vld [vmem:[#allocation12_spill] sm:$0xff] }
 0x124   :  { %1850 = vmatpush1.msra.mxu0 %v5761_v2  ;;  %1821 = vmatmul.mubr.f32.vlgmr.msra.gmra.mxu1 %v5983_v56  ;;  %v7983_v56 = vld [vmem:[#allocation97_spill] sm:$0xff] }
 0x125   :  { %1853 = vmatprep.subr.mxu0 %v5767_v25  ;;  %1965 = vmatprep.subr.mxu1 %v5682_v60 }
 0x126   :  { %1856 = vmatpush1.msra.mxu0 %v5798_v8  ;;  %1967 = vmatpush1.msra.mxu1 %v5687_v36 }
 0x127   :  { %1859 = vmatprep.subr.mxu0 %v5832_v19  ;;  %1969 = vmatprep.subr.mxu1 %v5689_v57 }
 0x128   :  { %1862 = vmatpush1.msra.mxu0 %v5812_v54  ;;  %1971 = vmatpush1.msra.mxu1 %v5694_v31 }
 0x129   :  { %1865 = vmatprep.subr.mxu0 %v5853_v29  ;;  %1973 = vmatprep.subr.mxu1 %v5699_v46 }
 0x12a   :  { %1868 = vmatpush1.msra.mxu0 %v5849_v59  ;;  %1975 = vmatpush1.msra.mxu1 %v7967_v39 }
 0x12b   :  { %1871 = vmatprep.subr.mxu0 %v7968_v5  ;;  %1977 = vmatprep.subr.mxu1 %v7969_v53 }
 0x12c   :  { %1874 = vmatpush1.msra.mxu0 %v7970_v17  ;;  %1979 = vmatpush1.msra.mxu1 %v7971_v3 }
 0x12d   :  { %1877 = vmatprep.subr.mxu0 %v5928_v52  ;;  %1981 = vmatprep.subr.mxu1 %v7972_v50 }
 0x12e   :  { %1880 = vmatpush1.msra.mxu0 %v5913_v21  ;;  %1983 = vmatpush1.msra.mxu1 %v7973_v47 }
 0x12f   :  { %1883 = vmatprep.subr.mxu0 %v5955_v35  ;;  %1985 = vmatprep.subr.mxu1 %v7974_v62 }
 0x130   :  { %1886 = vmatpush1.msra.mxu0 %v7975_v12  ;;  %1987 = vmatpush1.msra.mxu1 %v7976_v27 }
 0x131   :  { %1889 = vmatprep.subr.mxu0 %v5981_v45  ;;  %1989 = vmatprep.subr.mxu1 %v7977_v51 }
 0x132   :  { %1892 = vmatpush1.msra.mxu0 %v5962_v41  ;;  %1991 = vmatpush1.msra.mxu1 %v7978_v23 }
 0x133   :  { %1895 = vmatprep.subr.mxu0 %v6003_v48  ;;  %1993 = vmatprep.subr.mxu1 %v7979_v49  ;;  %v7984_v48 = vld [vmem:[#allocation95_spill] sm:$0xff] }
 0x134   :  { %1898 = vmatpush1.msra.mxu0 %v5997_v44  ;;  %1995 = vmatpush1.msra.mxu1 %v7980_v16 }
 0x135   :  { %1901 = vmatprep.subr.mxu0 %v6032_v18  ;;  %1997 = vmatprep.subr.mxu1 %v7981_v6  ;;  %v7985_v18 = vld [vmem:[#allocation14_spill] sm:$0xff] }
 0x136   :  { %1904 = vmatpush1.msra.mxu0 %v6008_v10  ;;  %1999 = vmatpush1.msra.mxu1 %v7982_v30 }
 0x137   :  { %1907 = vmatprep.subr.mxu0 %v6053_v13  ;;  %2001 = vmatprep.subr.mxu1 %v7983_v56  ;;  %v7986_v56 = vmov 0.0  }
 0x138   :  { %1910 = vmatpush1.msra.mxu0 %v6039_v15  ;;  %2003 = vmatpush1.msra.mxu1 %v7984_v48  ;;  %v343_v30 = vpop.f32.mrf.mxu0 }
 0x139   :  { %1913 = vmatprep.subr.mxu0 %v6069_v11  ;;  %2005 = vmatprep.subr.mxu1 %v5924_v42 }
 0x13a   :  { %1916 = vmatpush1.msra.mxu0 %v6073_v37  ;;  %2007 = vmatpush1.msra.mxu1 %v7985_v18  ;;  %v7987_v37 = vand.u32 4294901760, %v5707_v9  ;;  %v7990_v9 = vand.u32 4294901760, %v5724_v22  ;;  %v7994_v22 = vand.u32 4294901760, %v5761_v2  ;;  %v7998_v2 = vand.u32 4294901760, %v5812_v54  ;;  %v131_v54 = vld [vmem:[#allocation2 + $0x2e0] sm:$0xff] }
 0x13b   :  { %1919 = vmatprep.subr.mxu0 %v6085_v1  ;;  %2009 = vmatprep.subr.mxu1 %v5950_v40  ;;  %v7988_v40 = vand.u32 4294901760, %v5713_v14  ;;  %v7992_v14 = vand.u32 4294901760, %v5740_v58  ;;  %v7996_v58 = vand.u32 4294901760, %v5798_v8  ;;  %v8003_v8 = vand.u32 4294901760, %v5928_v52 }
 0x13c   :  { %1922 = vmatpush1.msra.mxu0 %v6081_v24  ;;  %1955 = vmatprep.mubr.f32.mxu0 %v7986_v56  ;;  %v736_v11 = vpop.f32.mrf.mxu1  ;;  %v345_v24 = vpop.f32.mrf.mxu0  ;;  %v8006_v52 = vand.u32 4294901760, %v7975_v12  ;;  %v8013_v12 = vld [vmem:[#allocation42_spill] sm:$0xff] }
 0x13d   :  { %2011 = vmatpush1.msra.mxu1 %v5952_v32  ;;  %1958 = vmatmul.mubr.f32.vlgmr.msra.gmra.mxu0 %v6022_v33  ;;  %v6196_v18 = vadd.f32 %v736_v11, %v343_v30  ;;  %v7989_v32 = vand.u32 4294901760, %v5718_v38  ;;  %v7993_v38 = vand.u32 4294901760, %v5749_v34  ;;  %v7997_v34 = vand.u32 4294901760, %v5832_v19  ;;  %v83_v19 = vld [vmem:[#allocation2 + $0x160] sm:$0xff] }
 0x13e   :  { %2013 = vmatprep.subr.mxu1 %v5990_v4  ;;  %2073 = vmatprep.subr.mxu0 %v7987_v37  ;;  %v738_v1 = vpop.f32.mrf.mxu1  ;;  %v7991_v37 = vand.u32 4294901760, %v5734_v28  ;;  %v7995_v28 = vand.u32 4294901760, %v5767_v25  ;;  %v7999_v25 = vand.u32 4294901760, %v5853_v29  ;;  %v86_v29 = vld [vmem:[#allocation2 + $0x178] sm:$0xff]  ;;  %v8007_v11 = vand.u32 4294901760, %v5981_v45 }
 0x13f   :  { %2015 = vmatpush1.msra.mxu1 %v5969_v43  ;;  %2077 = vmatpush1.msra.mxu0 %v7988_v40  ;;  %v6204_v33 = vadd.f32 %v738_v1, %v345_v24  ;;  %v6266_v24 = vand.u32 4294901760, %v131_v54  ;;  %v80_v1 = vld [vmem:[#allocation2 + $0x148] sm:$0xff]  ;;  %v8008_v30 = vand.u32 4294901760, %v5962_v41  ;;  %v8011_v41 = vand.u32 4294901760, %v5997_v44 }
 0x140   :  { %2017 = vmatprep.subr.mxu1 %v6010_v7  ;;  %2081 = vmatprep.subr.mxu0 %v7989_v32  ;;  %v6258_v32 = vand.u32 4294901760, %v86_v29  ;;  %v8016_v44 = vand.u32 4294901760, %v6008_v10 }
 0x141   :  { %2019 = vmatpush1.msra.mxu1 %v6000_v63  ;;  %2085 = vmatpush1.msra.mxu0 %v7990_v9  ;;  %v6298_v9 = vsub.f32 %v131_v54, %v6266_v24 }
 0x142   :  { %2021 = vmatprep.subr.mxu1 %v6028_v20  ;;  %2089 = vmatprep.subr.mxu0 %v7991_v37  ;;  %v6277_v45 = vsub.f32 %v86_v29, %v6258_v32  ;;  %v116_v29 = vld [vmem:[#allocation2 + $0x268] sm:$0xff] }
 0x143   :  { %2023 = vmatpush1.msra.mxu1 %v6041_v55  ;;  %2093 = vmatpush1.msra.mxu0 %v7992_v14  ;;  %v8019_v14 = vand.u32 4294901760, %v6053_v13 }
 0x144   :  { %2025 = vmatprep.subr.mxu1 %v6048_v0  ;;  %2097 = vmatprep.subr.mxu0 %v7993_v38 }
 0x145   :  { %2027 = vmatpush1.msra.mxu1 %v6050_v61  ;;  %2060 = vmatprep.mubr.f32.mxu1 %v7986_v56 }
 0x146   :  { %2101 = vmatpush1.msra.mxu0 %v7994_v22  ;;  %2064 = vmatmul.mubr.f32.vlgmr.msra.gmra.mxu1 %v6061_v26 }
 0x147   :  { %2105 = vmatprep.subr.mxu0 %v7995_v28  ;;  %2239 = vmatprep.subr.mxu1 %v5682_v60  ;;  %v8000_v60 = vand.u32 4294901760, %v5849_v59  ;;  %v8005_v59 = vand.u32 4294901760, %v5955_v35  ;;  %v6268_v35 = vand.u32 4294901760, %v83_v19  ;;  %v7505_v28 = vand.u32 4294901760, %v6277_v45 }
 0x148   :  { %2109 = vmatpush1.msra.mxu0 %v7996_v58  ;;  %2241 = vmatpush1.msra.mxu1 %v5687_v36  ;;  %v8001_v36 = vand.u32 4294901760, %v7968_v5  ;;  %v8009_v5 = vld [vmem:[#allocation40_spill] sm:$0xff]  ;;  %v119_v58 = vld [vmem:[#allocation2 + $0x280] sm:$0xff] }
 0x149   :  { %2113 = vmatprep.subr.mxu0 %v7997_v34  ;;  %2243 = vmatprep.subr.mxu1 %v5689_v57  ;;  %v8002_v57 = vand.u32 4294901760, %v7970_v17  ;;  %v71_v34 = vld [vmem:[#allocation2 + $0x100] sm:$0xff] }
 0x14a   :  { %2117 = vmatpush1.msra.mxu0 %v7998_v2  ;;  %2245 = vmatpush1.msra.mxu1 %v5694_v31  ;;  %v134_v31 = vld [vmem:[#allocation2 + $0x2f8] sm:$0xff]  ;;  %v8022_v2 = vand.u32 4294901760, %v6039_v15 }
 0x14b   :  { %2121 = vmatprep.subr.mxu0 %v7999_v25  ;;  %2247 = vmatprep.subr.mxu1 %v5699_v46  ;;  %v8004_v46 = vand.u32 4294901760, %v5913_v21  ;;  %v6256_v40 = vand.u32 4294901760, %v134_v31  ;;  %v128_v21 = vld [vmem:[#allocation2 + $0x2c8] sm:$0xff] }
 0x14c   :  { %2125 = vmatpush1.msra.mxu0 %v8000_v60  ;;  %2249 = vmatpush1.msra.mxu1 %v7967_v39  ;;  %v125_v39 = vld [vmem:[#allocation2 + $0x2b0] sm:$0xff]  ;;  %v6279_v17 = vand.u32 4294901760, %v128_v21 }
 0x14d   :  { %2129 = vmatprep.subr.mxu0 %v8001_v36  ;;  %2251 = vmatprep.subr.mxu1 %v7969_v53  ;;  %v8010_v53 = vand.u32 4294901760, %v8009_v5  ;;  %v8024_v60 = vld [vmem:[#allocation44_spill] sm:$0xff] }
 0x14e   :  { %2133 = vmatpush1.msra.mxu0 %v8002_v57  ;;  %2253 = vmatpush1.msra.mxu1 %v7971_v3  ;;  %v77_v3 = vld [vmem:[#allocation2 + $0x130] sm:$0xff]  ;;  %v6313_v10 = vsub.f32 %v128_v21, %v6279_v17  ;;  %v8025_v36 = vand.u32 4294901760, %v8024_v60  ;;  %v7504_v57 = vand.u32 4294901760, %v6298_v9 }
 0x14f   :  { %2137 = vmatprep.subr.mxu0 %v8003_v8  ;;  %2255 = vmatprep.subr.mxu1 %v7972_v50  ;;  %v6282_v50 = vsub.f32 %v134_v31, %v6256_v40  ;;  %v6303_v37 = vand.u32 4294901760, %v77_v3  ;;  %v8026_v8 = vld [vmem:[#allocation19_spill] sm:$0xff] }
 0x150   :  { %2141 = vmatpush1.msra.mxu0 %v8004_v46  ;;  %2257 = vmatpush1.msra.mxu1 %v7973_v47  ;;  %v6287_v47 = vand.u32 4294901760, %v80_v1  ;;  %v8028_v46 = vld [vmem:[#allocation14_spill] sm:$0xff]  ;;  %v65_v5 = vld [vmem:[#allocation2 + $0xd0] sm:$0xff] }
 0x151   :  { %2145 = vmatprep.subr.mxu0 %v8005_v59  ;;  %2259 = vmatprep.subr.mxu1 %v7974_v62  ;;  %v122_v62 = vld [vmem:[#allocation2 + $0x298] sm:$0xff]  ;;  %8018 = vst [vmem:[#allocation22_spill] sm:$0xff] %v6303_v37  ;;  %v7507_v22 = vand.u32 4294901760, %v6282_v50  ;;  %v6335_v54 = vsub.f32 %v77_v3, %v6303_v37  ;;  %v6339_v59 = vand.u32 4294901760, %v71_v34  ;;  %v8034_v3 = vld [vmem:[#allocation46_spill] sm:$0xff] }
 0x152   :  { %2149 = vmatpush1.msra.mxu0 %v8006_v52  ;;  %2261 = vmatpush1.msra.mxu1 %v7976_v27  ;;  %8012 = vst [vmem:[#allocation21_spill] sm:$0xff] %v6287_v47  ;;  %v8014_v27 = vand.u32 4294901760, %v8013_v12  ;;  %v6308_v38 = vand.u32 4294901760, %v122_v62  ;;  %v6319_v13 = vsub.f32 %v80_v1, %v6287_v47  ;;  %v8031_v52 = vld [vmem:[#allocation20_spill] sm:$0xff] }
 0x153   :  { %2153 = vmatprep.subr.mxu0 %v8007_v11  ;;  %2263 = vmatprep.subr.mxu1 %v7977_v51  ;;  %v6293_v51 = vsub.f32 %v83_v19, %v6268_v35  ;;  %v6337_v19 = vand.u32 4294901760, %v119_v58  ;;  %8030 = vst [vmem:[#allocation24_spill] sm:$0xff] %v6339_v59  ;;  %v8032_v21 = vand.u32 4294901760, %v8031_v52  ;;  %v8033_v11 = vld [vmem:[#allocation15_spill] sm:$0xff]  ;;  %v6347_v1 = vsub.f32 %v6282_v50, %v7507_v22 }
 0x154   :  { %2157 = vmatpush1.msra.mxu0 %v8008_v30  ;;  %2265 = vmatpush1.msra.mxu1 %v7978_v23  ;;  %v6295_v23 = vand.u32 4294901760, %v125_v39  ;;  %8021 = vst [vmem:[#allocation52_spill] sm:$0xff] %v6308_v38  ;;  %v6352_v30 = vsub.f32 %v6277_v45, %v7505_v28  ;;  %v56_v22 = vld [vmem:[#allocation2 + $0x88] sm:$0xff] }
 0x155   :  { %2161 = vmatprep.subr.mxu0 %v8010_v53  ;;  %2267 = vmatprep.subr.mxu1 %v7979_v49  ;;  %v74_v49 = vld [vmem:[#allocation2 + $0x118] sm:$0xff]  ;;  %v7503_v31 = vand.u32 4294901760, %v6293_v51  ;;  %8029 = vst [vmem:[#allocation54_spill] sm:$0xff] %v6337_v19  ;;  %v6356_v53 = vsub.f32 %v122_v62, %v6308_v38  ;;  %v6372_v62 = vsub.f32 %v6298_v9, %v7504_v57  ;;  %v2571_v52 = vand.u32 4294901760, %v6347_v1  ;;  %v101_v57 = vld [vmem:[#allocation2 + $0x1f0] sm:$0xff] }
 0x156   :  { %2165 = vmatpush1.msra.mxu0 %v8011_v41  ;;  %2269 = vmatpush1.msra.mxu1 %v7980_v16  ;;  %8015 = vst [vmem:[#allocation50_spill] sm:$0xff] %v6295_v23  ;;  %v8017_v16 = vld [vmem:[#allocation79_spill] sm:$0xff]  ;;  %v6321_v25 = vand.u32 4294901760, %v74_v49  ;;  %v6329_v15 = vsub.f32 %v125_v39, %v6295_v23  ;;  %v7500_v39 = vand.u32 4294901760, %v6313_v10  ;;  %v8035_v41 = vand.u32 4294901760, %v8034_v3  ;;  %v62_v1 = vld [vmem:[#allocation2 + $0xb8] sm:$0xff] }
 0x157   :  { %2169 = vmatprep.subr.mxu0 %v8014_v27  ;;  %2271 = vmatprep.subr.mxu1 %v7981_v6  ;;  %v8020_v6 = vld [vmem:[#allocation97_spill] sm:$0xff]  ;;  %v6364_v27 = vand.u32 4294901760, %v116_v29 }
 0x158   :  { %2173 = vmatpush1.msra.mxu0 %v8016_v44  ;;  %2273 = vmatpush1.msra.mxu1 %v8017_v16  ;;  %8023 = vst [vmem:[#allocation23_spill] sm:$0xff] %v6321_v25  ;;  %v6362_v12 = vsub.f32 %v74_v49, %v6321_v25  ;;  %v7499_v44 = vand.u32 4294901760, %v6319_v13  ;;  %v8037_v16 = vld [vmem:[#allocation38_spill] sm:$0xff]  ;;  %v7501_v60 = vand.u32 4294901760, %v6329_v15 }
 0x159   :  { %2177 = vmatprep.subr.mxu0 %v8019_v14  ;;  %2275 = vmatprep.subr.mxu1 %v8020_v6  ;;  %8036 = vst [vmem:[#allocation56_spill] sm:$0xff] %v6364_v27  ;;  %v8038_v14 = vld [vmem:[#allocation16_spill] sm:$0xff]  ;;  %v6377_v6 = vsub.f32 %v6293_v51, %v7503_v31  ;;  %v6414_v3 = vsub.f32 %v116_v29, %v6364_v27 }
 0x15a   :  { %2181 = vmatpush1.msra.mxu0 %v8022_v2  ;;  %2277 = vmatpush1.msra.mxu1 %v7984_v48  ;;  %v8027_v48 = vand.u32 4294901760, %v8026_v8  ;;  %v113_v2 = vld [vmem:[#allocation2 + $0x250] sm:$0xff]  ;;  %v6387_v8 = vand.u32 4294901760, %v65_v5 }
 0x15b   :  { %2185 = vmatprep.subr.mxu0 %v8025_v36  ;;  %2279 = vmatprep.subr.mxu1 %v5924_v42  ;;  %v68_v42 = vld [vmem:[#allocation2 + $0xe8] sm:$0xff]  ;;  %v6385_v36 = vsub.f32 %v71_v34, %v6339_v59  ;;  %v6400_v34 = vsub.f32 %v6313_v10, %v7500_v39  ;;  %v8048_v26 = vand.u32 4294901760, %v6414_v3 }
 0x15c   :  { %2189 = vmatpush1.msra.mxu0 %v8027_v48  ;;  %2281 = vmatpush1.msra.mxu1 %v8028_v46  ;;  %v6379_v49 = vand.u32 4294901760, %v68_v42  ;;  %8040 = vst [vmem:[#allocation58_spill] sm:$0xff] %v6387_v8  ;;  %v7502_v48 = vand.u32 4294901760, %v6335_v54  ;;  %v6391_v46 = vsub.f32 %v119_v58, %v6337_v19  ;;  %v6410_v58 = vand.u32 4294901760, %v113_v2 }
 0x15d   :  { %2193 = vmatprep.subr.mxu0 %v8032_v21  ;;  %2283 = vmatprep.subr.mxu1 %v8033_v11  ;;  %v7506_v21 = vand.u32 4294901760, %v6356_v53  ;;  %v110_v11 = vld [vmem:[#allocation2 + $0x238] sm:$0xff]  ;;  %v7513_v39 = vand.u32 4294901760, %v6385_v36 }
 0x15e   :  { %2197 = vmatpush1.msra.mxu0 %v8035_v41  ;;  %2230 = vmatprep.mubr.f32.mxu0 %v7986_v56  ;;  %8039 = vst [vmem:[#allocation25_spill] sm:$0xff] %v6379_v49  ;;  %8041 = vst [vmem:[#allocation26_spill] sm:$0xff] %v6410_v58  ;;  %v2466_v41 = vand.u32 4294901760, %v6377_v6  ;;  %v6436_v29 = vsub.f32 %v6335_v54, %v7502_v48  ;;  %v59_v6 = vld [vmem:[#allocation2 + $0xa0] sm:$0xff]  ;;  %v6450_v48 = vand.u32 4294901760, %v62_v1 }
 0x15f   :  { %2285 = vmatpush1.msra.mxu1 %v8037_v16  ;;  %2232 = vmatmul.mubr.f32.vlgmr.msra.gmra.mxu0 %v8038_v14  ;;  %v6421_v16 = vsub.f32 %v68_v42, %v6379_v49  ;;  %v7511_v42 = vand.u32 4294901760, %v6391_v46  ;;  %v6462_v28 = vsub.f32 %v113_v2, %v6410_v58 }
 0x160   :  { %2287 = vmatprep.subr.mxu1 %v5990_v4  ;;  %3883 = vmatprep.subr.mxu0 %v6256_v40  ;;  %v2459_v4 = vand.u32 4294901760, %v6352_v30  ;;  %v7508_v30 = vand.u32 4294901760, %v6362_v12  ;;  %8044 = vst [vmem:[#allocation62_spill] sm:$0xff] %v6450_v48  ;;  %v2480_v2 = vand.u32 4294901760, %v6436_v29  ;;  %v6489_v29 = vsub.f32 %v62_v1, %v6450_v48 }
 0x161   :  { %2289 = vmatpush1.msra.mxu1 %v5969_v43  ;;  %3884 = vmatpush3.msra.mxu0 %v6258_v32  ;;  %v6408_v43 = vsub.f32 %v6319_v13, %v7499_v44  ;;  %v6426_v44 = vsub.f32 %v6329_v15, %v7501_v60  ;;  %v6443_v60 = vand.u32 4294901760, %v110_v11 }
 0x162   :  { %2291 = vmatprep.subr.mxu1 %v6010_v7  ;;  %3885 = vmatprep.subr.mxu0 %v6266_v24  ;;  %v2578_v7 = vand.u32 4294901760, %v6372_v62  ;;  %v107_v62 = vld [vmem:[#allocation2 + $0x220] sm:$0xff] }
 0x163   :  { %2293 = vmatpush1.msra.mxu1 %v6000_v63  ;;  %3886 = vmatpush3.msra.mxu0 %v6268_v35  ;;  %v6431_v63 = vsub.f32 %v65_v5, %v6387_v8  ;;  %8043 = vst [vmem:[#allocation27_spill] sm:$0xff] %v6443_v60  ;;  %v6448_v5 = vsub.f32 %v6356_v53, %v7506_v21  ;;  %v2473_v31 = vand.u32 4294901760, %v6408_v43  ;;  %v6467_v21 = vand.u32 4294901760, %v107_v62 }
 0x164   :  { %2295 = vmatprep.subr.mxu1 %v6028_v20  ;;  %3887 = vmatprep.subr.mxu0 %v6279_v17  ;;  %v2585_v20 = vand.u32 4294901760, %v6400_v34  ;;  %v104_v34 = vld [vmem:[#allocation2 + $0x208] sm:$0xff]  ;;  %v6469_v43 = vand.u32 4294901760, %v59_v6 }
 0x165   :  { %8042 = vst [vmem:[#allocation60_spill] sm:$0xff] %v6431_v63  ;;  %2297 = vmatpush1.msra.mxu1 %v6041_v55  ;;  %3888 = vmatpush3.msra.mxu0 %v6287_v47  ;;  %v6458_v55 = vsub.f32 %v6362_v12, %v7508_v30  ;;  %8045 = vst [vmem:[#allocation29_spill] sm:$0xff] %v6467_v21  ;;  %v2599_v30 = vand.u32 4294901760, %v6448_v5  ;;  %v6503_v5 = vand.u32 4294901760, %v56_v22 }
 0x166   :  { %2299 = vmatprep.subr.mxu1 %v6048_v0  ;;  %3889 = vmatprep.subr.mxu0 %v6295_v23  ;;  %v2592_v0 = vand.u32 4294901760, %v6426_v44  ;;  %8046 = vst [vmem:[#allocation64_spill] sm:$0xff] %v6469_v43  ;;  %v6483_v44 = vsub.f32 %v6385_v36, %v7513_v39 }
 0x167   :  { %2301 = vmatpush1.msra.mxu1 %v6050_v61  ;;  %2334 = vmatprep.mubr.f32.mxu1 %v7986_v56  ;;  %v6478_v61 = vsub.f32 %v6391_v46, %v7511_v42  ;;  %v53_v42 = vld [vmem:[#allocation2 + $0x70] sm:$0xff]  ;;  %v6494_v56 = vsub.f32 %v110_v11, %v6443_v60  ;;  %v2487_v39 = vand.u32 4294901760, %v6458_v55  ;;  %8049 = vst [vmem:[#allocation66_spill] sm:$0xff] %v6503_v5 }
 0x168   :  { %3890 = vmatpush3.msra.mxu0 %v6303_v37  ;;  %2336 = vmatmul.mubr.f32.vlgmr.msra.gmra.mxu1 %v8038_v14  ;;  %v6491_v14 = vand.u32 4294901760, %v104_v34  ;;  %v50_v37 = vld [vmem:[#allocation2 + $0x58] sm:$0xff]  ;;  %v6508_v11 = vsub.f32 %v59_v6, %v6469_v43  ;;  %v8053_v6 = vand.u32 4294901760, %v6431_v63 }
 0x169   :  { %3891 = vmatprep.subr.mxu0 %v6308_v38  ;;  %3918 = vmatprep.subr.mxu1 %v2571_v52  ;;  %v6501_v52 = vsub.f32 %v6414_v3, %v8048_v26  ;;  %v98_v38 = vld [vmem:[#allocation2 + $0x1d8] sm:$0xff]  ;;  %v6518_v26 = vsub.f32 %v107_v62, %v6467_v21  ;;  %v2606_v1 = vand.u32 4294901760, %v6478_v61  ;;  %v95_v61 = vld [vmem:[#allocation2 + $0x1c0] sm:$0xff]  ;;  %v8056_v47 = vand.u32 4294901760, %v6494_v56 }
 0x16a   :  { %8047 = vst [vmem:[#allocation31_spill] sm:$0xff] %v6491_v14  ;;  %3892 = vmatpush3.msra.mxu0 %v6321_v25  ;;  %3919 = vmatpush3.msra.mxu1 %v2459_v4  ;;  %v8050_v4 = vand.u32 4294901760, %v6421_v16  ;;  %v6515_v25 = vand.u32 4294901760, %v101_v57  ;;  %v6528_v23 = vsub.f32 %v6431_v63, %v8053_v6  ;;  %v6531_v62 = vand.u32 4294901760, %v98_v38 }
 0x16b   :  { %3893 = vmatprep.subr.mxu0 %v6337_v19  ;;  %3920 = vmatprep.subr.mxu1 %v2578_v7  ;;  %8051 = vst [vmem:[#allocation33_spill] sm:$0xff] %v6518_v26  ;;  %v2494_v7 = vand.u32 4294901760, %v6483_v44  ;;  %v6523_v19 = vand.u32 4294901760, %v53_v42  ;;  %v6537_v44 = vsub.f32 %v104_v34, %v6491_v14  ;;  %v2613_v6 = vand.u32 4294901760, %v6501_v52 }
 0x16c   :  { %v6513_v55 = vsub.f32 %v6421_v16, %v8050_v4  ;;  %3894 = vmatpush3.msra.mxu0 %v6339_v59  ;;  %3921 = vmatpush3.msra.mxu1 %v2466_v41  ;;  %v47_v4 = vld [vmem:[#allocation2 + $0x40] sm:$0xff]  ;;  %8054 = vst [vmem:[#allocation35_spill] sm:$0xff] %v6531_v62  ;;  %v6534_v41 = vand.u32 4294901760, %v50_v37  ;;  %v6542_v63 = vsub.f32 %v56_v22, %v6503_v5  ;;  %v6561_v59 = vand.u32 4294901760, %v95_v61 }
 0x16d   :  { %8052 = vst [vmem:[#allocation68_spill] sm:$0xff] %v6523_v19  ;;  %3895 = vmatprep.subr.mxu0 %v6364_v27  ;;  %3922 = vmatprep.subr.mxu1 %v2585_v20  ;;  %v8055_v20 = vand.u32 4294901760, %v6462_v28  ;;  %v6554_v52 = vsub.f32 %v101_v57, %v6515_v25  ;;  %v6558_v22 = vsub.f32 %v53_v42, %v6523_v19  ;;  %v8058_v42 = vand.u32 4294901760, %v6518_v26 }
 0x16e   :  { %3896 = vmatpush3.msra.mxu0 %v6379_v49  ;;  %3923 = vmatpush3.msra.mxu1 %v2473_v31  ;;  %v2501_v34 = vand.u32 4294901760, %v6513_v55  ;;  %v6551_v49 = vand.u32 4294901760, %v47_v4  ;;  %v92_v31 = vld [vmem:[#allocation2 + $0x1a8] sm:$0xff]  ;;  %v2626_v57 = vsub.f32 %v6494_v56, %v8056_v47 }
 0x16f   :  { %v2619_v27 = vsub.f32 %v6462_v28, %v8055_v20  ;;  %3897 = vmatprep.subr.mxu0 %v6410_v58  ;;  %3924 = vmatprep.subr.mxu1 %v2592_v0  ;;  %v2508_v20 = vand.u32 4294901760, %v6528_v23  ;;  %v44_v55 = vld [vmem:[#allocation2 + $0x28] sm:$0xff]  ;;  %v6573_v23 = vsub.f32 %v98_v38, %v6531_v62  ;;  %v6579_v58 = vand.u32 4294901760, %v92_v31 }
 0x170   :  { %3898 = vmatpush3.msra.mxu0 %v6387_v8  ;;  %3925 = vmatpush3.msra.mxu1 %v2480_v2  ;;  %v6569_v8 = vsub.f32 %v50_v37, %v6534_v41  ;;  %v89_v2 = vld [vmem:[#allocation2 + $0x190] sm:$0xff]  ;;  %v2633_v38 = vsub.f32 %v6518_v26, %v8058_v42  ;;  %v6600_v42 = vsub.f32 %v95_v61, %v6561_v59 }
 0x171   :  { %3899 = vmatprep.subr.mxu0 %v6443_v60  ;;  %3926 = vmatprep.subr.mxu1 %v2599_v30  ;;  %v2620_v0 = vand.u32 4294901760, %v2619_v27  ;;  %v8057_v60 = vand.u32 4294901760, %v6489_v29  ;;  %v41_v37 = vld [vmem:[#allocation2 + $0x10] sm:$0xff]  ;;  %v8062_v27 = vand.u32 4294901760, %v6537_v44 }
 0x172   :  { %3900 = vmatpush3.msra.mxu0 %v6450_v48  ;;  %3927 = vmatpush3.msra.mxu1 %v2487_v39  ;;  %v6587_v48 = vsub.f32 %v47_v4, %v6551_v49  ;;  %v6589_v39 = vand.u32 4294901760, %v44_v55  ;;  %8061 = vst [vmem:[#allocation37_spill] sm:$0xff] %v6600_v42  ;;  %v2627_v4 = vand.u32 4294901760, %v2626_v57 }
 0x173   :  { %v2514_v30 = vsub.f32 %v6489_v29, %v8057_v60  ;;  %3901 = vmatprep.subr.mxu0 %v6467_v21  ;;  %3928 = vmatprep.subr.mxu1 %v2606_v1  ;;  %v8060_v60 = vand.u32 4294901760, %v6508_v11  ;;  %v6596_v21 = vand.u32 4294901760, %v89_v2  ;;  %v8063_v1 = vand.u32 4294901760, %v6542_v63 }
 0x174   :  { %8059 = vst [vmem:[#allocation70_spill] sm:$0xff] %v6587_v48  ;;  %3902 = vmatpush3.msra.mxu0 %v6469_v43  ;;  %3929 = vmatpush3.msra.mxu1 %v2494_v7  ;;  %v2640_v43 = vsub.f32 %v6537_v44, %v8062_v27  ;;  %v6606_v7 = vand.u32 4294901760, %v41_v37  ;;  %v6618_v57 = vsub.f32 %v44_v55, %v6589_v39  ;;  %v8064_v27 = vand.u32 4294901760, %v6554_v52 }
 0x175   :  { %v2521_v47 = vsub.f32 %v6508_v11, %v8060_v60  ;;  %3903 = vmatprep.subr.mxu0 %v6491_v14  ;;  %3930 = vmatprep.subr.mxu1 %v2613_v6  ;;  %v2515_v60 = vand.u32 4294901760, %v2514_v30  ;;  %v2528_v61 = vsub.f32 %v6542_v63, %v8063_v1  ;;  %v6614_v14 = vsub.f32 %v92_v31, %v6579_v58 }
 0x176   :  { %3904 = vmatpush3.msra.mxu0 %v6503_v5  ;;  %3931 = vmatpush3.msra.mxu1 %v2501_v34  ;;  %v2634_v6 = vand.u32 4294901760, %v2633_v38  ;;  %v2647_v26 = vsub.f32 %v6554_v52, %v8064_v27  ;;  %v8065_v31 = vand.u32 4294901760, %v6558_v22  ;;  %v6630_v38 = vsub.f32 %v89_v2, %v6596_v21 }
 0x177   :  { %3905 = vmatprep.subr.mxu0 %v6515_v25  ;;  %3932 = vmatprep.subr.mxu1 %v2620_v0  ;;  %v2522_v30 = vand.u32 4294901760, %v2521_v47  ;;  %v2641_v55 = vand.u32 4294901760, %v2640_v43  ;;  %v6634_v27 = vsub.f32 %v41_v37, %v6606_v7  ;;  %v7554_v0 = vand.u32 4294901760, %v6614_v14 }
 0x178   :  { %3906 = vmatpush3.msra.mxu0 %v6523_v19  ;;  %3933 = vmatpush3.msra.mxu1 %v2508_v20  ;;  %v2535_v1 = vsub.f32 %v6558_v22, %v8065_v31  ;;  %v939_v34 = vpop.f32.mrf.mxu0  ;;  %v8067_v20 = vand.u32 4294901760, %v6573_v23  ;;  %v7556_v19 = vand.u32 4294901760, %v6587_v48  ;;  %v2529_v31 = vand.u32 4294901760, %v2528_v61 }
 0x179   :  { %3907 = vmatprep.subr.mxu0 %v6531_v62  ;;  %3934 = vmatprep.subr.mxu1 %v2627_v4  ;;  %8066 = vst [vmem:[#allocation72_spill] sm:$0xff] %v6634_v27  ;;  %v940_v2 = vadd.f32 %v939_v34, %v6196_v18  ;;  %v2648_v43 = vand.u32 4294901760, %v2647_v26  ;;  %v8068_v37 = vand.u32 4294901760, %v6569_v8  ;;  %v8069_v18 = vand.u32 4294901760, %v6600_v42 }
 0x17a   :  { %v2654_v47 = vsub.f32 %v6573_v23, %v8067_v20  ;;  %3908 = vmatpush3.msra.mxu0 %v6534_v41  ;;  %3935 = vmatpush3.msra.mxu1 %v2515_v60  ;;  %v941_v62 = vpop.f32.mrf.mxu0  ;;  %v2536_v60 = vand.u32 4294901760, %v2535_v1  ;;  %v7557_v20 = vand.u32 4294901760, %v6634_v27 }
 0x17b   :  { %3909 = vmatprep.subr.mxu0 %v6561_v59  ;;  %3936 = vmatprep.subr.mxu1 %v2634_v6  ;;  %v2542_v4 = vsub.f32 %v6569_v8, %v8068_v37  ;;  %v942_v61 = vadd.f32 %v941_v62, %v6204_v33  ;;  %v2661_v34 = vsub.f32 %v6600_v42, %v8069_v18  ;;  %v7555_v6 = vand.u32 4294901760, %v6630_v38  ;;  %v8071_v18 = vld [vmem:[#allocation106_spill] sm:$0xff] }
 0x17c   :  { %3910 = vmatpush3.msra.mxu0 %v6551_v49  ;;  %3937 = vmatpush3.msra.mxu1 %v2522_v30  ;;  %v2655_v26 = vand.u32 4294901760, %v2654_v47  ;;  %v2549_v37 = vsub.f32 %v6587_v48, %v7556_v19  ;;  %v2668_v33 = vsub.f32 %v6614_v14, %v7554_v0  ;;  %v8070_v30 = vand.u32 4294901760, %v6618_v57 }
 0x17d   :  { %3911 = vmatprep.subr.mxu0 %v6579_v58  ;;  %3938 = vmatprep.subr.mxu1 %v2641_v55  ;;  %v2543_v62 = vand.u32 4294901760, %v2542_v4  ;;  %v2662_v55 = vand.u32 4294901760, %v2661_v34  ;;  %v2675_v47 = vsub.f32 %v6630_v38, %v7555_v6 }
 0x17e   :  { %3912 = vmatpush3.msra.mxu0 %v6589_v39  ;;  %3939 = vmatpush3.msra.mxu1 %v2529_v31  ;;  %v2556_v1 = vsub.f32 %v6618_v57, %v8070_v30  ;;  %v2550_v0 = vand.u32 4294901760, %v2549_v37  ;;  %v8072_v30 = vld [vmem:[#allocation105_spill] sm:$0xff]  ;;  %v8074_v37 = vld [vmem:[#allocation98_spill] sm:$0xff] }
 0x17f   :  { %3913 = vmatprep.subr.mxu0 %v6596_v21  ;;  %3940 = vmatprep.subr.mxu1 %v2648_v43  ;;  %v1080_v31 = vpop.f32.mrf.mxu1  ;;  %v2563_v43 = vsub.f32 %v6634_v27, %v7557_v20  ;;  %v8090_v20 = vld [vmem:[#allocation29_spill] sm:$0xff] }
 0x180   :  { %3914 = vmatpush3.msra.mxu0 %v6606_v7  ;;  %3941 = vmatpush3.msra.mxu1 %v2536_v60  ;;  %v6675_v4 = vadd.f32 %v1080_v31, %v940_v2  ;;  %v2669_v60 = vand.u32 4294901760, %v2668_v33  ;;  %v2557_v6 = vand.u32 4294901760, %v2556_v1  ;;  %v8077_v33 = vld [vmem:[#allocation60_spill] sm:$0xff]  ;;  %v8082_v31 = vld [vmem:[#allocation54_spill] sm:$0xff] }
 0x181   :  { %2443 = vmatprep.mubr.f32.mxu0 %v8071_v18  ;;  %3942 = vmatprep.subr.mxu1 %v2655_v26  ;;  %v1082_v34 = vpop.f32.mrf.mxu1  ;;  %v2676_v26 = vand.u32 4294901760, %v2675_v47  ;;  %v2564_v2 = vand.u32 4294901760, %v2563_v43  ;;  %v8079_v1 = vld [vmem:[#allocation52_spill] sm:$0xff]  ;;  %v8081_v47 = vld [vmem:[#allocation33_spill] sm:$0xff] }
 0x182   :  { %3953 = vmatprep.subr.mxu0 %v6282_v50  ;;  %2449 = vmatmul.mubr.f32.vlgmr.msra.gmra.mxu0 %v8072_v30  ;;  %v6680_v19 = vadd.f32 %v1082_v34, %v942_v61  ;;  %v8073_v61 = vld [vmem:[#allocation99_spill] sm:$0xff]  ;;  %v8083_v18 = vld [vmem:[#allocation24_spill] sm:$0xff]  ;;  %v8085_v30 = vld [vmem:[#allocation25_spill] sm:$0xff] }
 0x183   :  { %3943 = vmatpush3.msra.mxu1 %v2543_v62  ;;  %3954 = vmatpush3.msra.mxu0 %v6277_v45  ;;  %v8078_v62 = vld [vmem:[#allocation22_spill] sm:$0xff]  ;;  %v8084_v43 = vld [vmem:[#allocation56_spill] sm:$0xff] }
 0x184   :  { %3944 = vmatprep.subr.mxu1 %v2662_v55  ;;  %3955 = vmatprep.subr.mxu0 %v6298_v9  ;;  %v8080_v55 = vld [vmem:[#allocation23_spill] sm:$0xff]  ;;  %v8087_v34 = vld [vmem:[#allocation58_spill] sm:$0xff] }
 0x185   :  { %3945 = vmatpush3.msra.mxu1 %v2550_v0  ;;  %3956 = vmatpush3.msra.mxu0 %v6293_v51  ;;  %v8075_v0 = vld [vmem:[#allocation21_spill] sm:$0xff] }
 0x186   :  { %3946 = vmatprep.subr.mxu1 %v2669_v60  ;;  %3957 = vmatprep.subr.mxu0 %v6313_v10  ;;  %v8086_v60 = vld [vmem:[#allocation26_spill] sm:$0xff] }
 0x187   :  { %3947 = vmatpush3.msra.mxu1 %v2557_v6  ;;  %3958 = vmatpush3.msra.mxu0 %v6319_v13  ;;  %v8076_v6 = vld [vmem:[#allocation50_spill] sm:$0xff] }
 0x188   :  { %3948 = vmatprep.subr.mxu1 %v2676_v26  ;;  %3959 = vmatprep.subr.mxu0 %v6329_v15  ;;  %v8088_v26 = vld [vmem:[#allocation27_spill] sm:$0xff] }
 0x189   :  { %3949 = vmatpush3.msra.mxu1 %v2564_v2  ;;  %2679 = vmatprep.mubr.f32.mxu1 %v8073_v61  ;;  %v8089_v2 = vld [vmem:[#allocation62_spill] sm:$0xff]  ;;  %v8092_v61 = vld [vmem:[#allocation31_spill] sm:$0xff] }
 0x18a   :  { %3960 = vmatpush3.msra.mxu0 %v6335_v54  ;;  %2681 = vmatmul.mubr.f32.vlgmr.msra.gmra.mxu1 %v8074_v37  ;;  %v8091_v37 = vld [vmem:[#allocation64_spill] sm:$0xff] }
 0x18b   :  { %3961 = vmatprep.subr.mxu0 %v6356_v53  ;;  %3988 = vmatprep.subr.mxu1 %v6256_v40 }
 0x18c   :  { %3962 = vmatpush3.msra.mxu0 %v6362_v12  ;;  %3989 = vmatpush3.msra.mxu1 %v6258_v32 }
 0x18d   :  { %3963 = vmatprep.subr.mxu0 %v6391_v46  ;;  %3990 = vmatprep.subr.mxu1 %v6266_v24 }
 0x18e   :  { %3964 = vmatpush3.msra.mxu0 %v6385_v36  ;;  %3991 = vmatpush3.msra.mxu1 %v6268_v35 }
 0x18f   :  { %3965 = vmatprep.subr.mxu0 %v6414_v3  ;;  %3992 = vmatprep.subr.mxu1 %v6279_v17 }
 0x190   :  { %3966 = vmatpush3.msra.mxu0 %v6421_v16  ;;  %3993 = vmatpush3.msra.mxu1 %v8075_v0 }
 0x191   :  { %3967 = vmatprep.subr.mxu0 %v6462_v28  ;;  %3994 = vmatprep.subr.mxu1 %v8076_v6 }
 0x192   :  { %3968 = vmatpush3.msra.mxu0 %v8077_v33  ;;  %3995 = vmatpush3.msra.mxu1 %v8078_v62 }
 0x193   :  { %3969 = vmatprep.subr.mxu0 %v6494_v56  ;;  %3996 = vmatprep.subr.mxu1 %v8079_v1 }
 0x194   :  { %3970 = vmatpush3.msra.mxu0 %v6489_v29  ;;  %3997 = vmatpush3.msra.mxu1 %v8080_v55 }
 0x195   :  { %3971 = vmatprep.subr.mxu0 %v8081_v47  ;;  %3998 = vmatprep.subr.mxu1 %v8082_v31 }
 0x196   :  { %3972 = vmatpush3.msra.mxu0 %v6508_v11  ;;  %3999 = vmatpush3.msra.mxu1 %v8083_v18 }
 0x197   :  { %3973 = vmatprep.subr.mxu0 %v6537_v44  ;;  %4000 = vmatprep.subr.mxu1 %v8084_v43 }
 0x198   :  { %3974 = vmatpush3.msra.mxu0 %v6542_v63  ;;  %4001 = vmatpush3.msra.mxu1 %v8085_v30 }
 0x199   :  { %3975 = vmatprep.subr.mxu0 %v6554_v52  ;;  %4002 = vmatprep.subr.mxu1 %v8086_v60 }
 0x19a   :  { %3976 = vmatpush3.msra.mxu0 %v6558_v22  ;;  %4003 = vmatpush3.msra.mxu1 %v8087_v34 }
 0x19b   :  { %3977 = vmatprep.subr.mxu0 %v6573_v23  ;;  %4004 = vmatprep.subr.mxu1 %v8088_v26 }
 0x19c   :  { %3978 = vmatpush3.msra.mxu0 %v6569_v8  ;;  %4005 = vmatpush3.msra.mxu1 %v8089_v2 }
 0x19d   :  { %3979 = vmatprep.subr.mxu0 %v6600_v42  ;;  %4006 = vmatprep.subr.mxu1 %v8090_v20  ;;  %v8093_v42 = vld [vmem:[#allocation101_spill] sm:$0xff]  ;;  %v8094_v20 = vld [vmem:[#allocation68_spill] sm:$0xff] }
 0x19e   :  { %3980 = vmatpush3.msra.mxu0 %v6587_v48  ;;  %4007 = vmatpush3.msra.mxu1 %v8091_v37  ;;  %v8095_v48 = vld [vmem:[#allocation100_spill] sm:$0xff]  ;;  %v8096_v37 = vld [vmem:[#allocation35_spill] sm:$0xff] }
 0x19f   :  { %3981 = vmatprep.subr.mxu0 %v6614_v14  ;;  %4008 = vmatprep.subr.mxu1 %v8092_v61  ;;  %v8097_v61 = vand.u32 4294901760, %v6282_v50  ;;  %v8101_v50 = vand.u32 4294901760, %v6313_v10  ;;  %v8107_v10 = vand.u32 4294901760, %v6356_v53  ;;  %v8111_v53 = vand.u32 4294901760, %v6414_v3 }
 0x1a0   :  { %3982 = vmatpush3.msra.mxu0 %v6618_v57  ;;  %4009 = vmatpush3.msra.mxu1 %v6503_v5  ;;  %v8098_v5 = vand.u32 4294901760, %v6277_v45  ;;  %v8102_v45 = vand.u32 4294901760, %v6319_v13  ;;  %v8108_v13 = vand.u32 4294901760, %v6362_v12  ;;  %v8118_v12 = vand.u32 4294901760, %v6508_v11 }
 0x1a1   :  { %3983 = vmatprep.subr.mxu0 %v6630_v38  ;;  %4010 = vmatprep.subr.mxu1 %v6515_v25  ;;  %v8120_v3 = vand.u32 4294901760, %v6542_v63  ;;  %v8121_v11 = vand.u32 4294901760, %v6554_v52 }
 0x1a2   :  { %3984 = vmatpush3.msra.mxu0 %v6634_v27  ;;  %2816 = vmatprep.mubr.f32.mxu0 %v8093_v42  ;;  %v8099_v27 = vand.u32 4294901760, %v6298_v9  ;;  %v8100_v42 = vand.u32 4294901760, %v6293_v51  ;;  %v8103_v9 = vand.u32 4294901760, %v6329_v15  ;;  %v8105_v51 = vand.u32 4294901760, %v6335_v54 }
 0x1a3   :  { %4011 = vmatpush3.msra.mxu1 %v8094_v20  ;;  %2819 = vmatmul.mubr.f32.vlgmr.msra.gmra.mxu0 %v8095_v48  ;;  %v8104_v48 = vld [vmem:[#allocation103_spill] sm:$0xff]  ;;  %v8109_v15 = vand.u32 4294901760, %v6391_v46  ;;  %v8110_v54 = vand.u32 4294901760, %v6385_v36  ;;  %v182_v46 = vld [vmem:[#allocation2 + $0x478] sm:$0xff] }
 0x1a4   :  { %4012 = vmatprep.subr.mxu1 %v8096_v37  ;;  %4023 = vmatprep.subr.mxu0 %v8097_v61  ;;  %v6815_v61 = vand.u32 4294901760, %v182_v46 }
 0x1a5   :  { %4013 = vmatpush3.msra.mxu1 %v6534_v41  ;;  %4024 = vmatpush3.msra.mxu0 %v8098_v5  ;;  %v8106_v5 = vld [vmem:[#allocation102_spill] sm:$0xff] }
 0x1a6   :  { %4014 = vmatprep.subr.mxu1 %v6561_v59  ;;  %4025 = vmatprep.subr.mxu0 %v8099_v27 }
 0x1a7   :  { %4015 = vmatpush3.msra.mxu1 %v6551_v49  ;;  %4026 = vmatpush3.msra.mxu0 %v8100_v42  ;;  %v8135_v42 = vand.u32 4294901760, %v6630_v38  ;;  %v8139_v38 = vld [vmem:[#allocation98_spill] sm:$0xff] }
 0x1a8   :  { %4016 = vmatprep.subr.mxu1 %v6579_v58  ;;  %4027 = vmatprep.subr.mxu0 %v8101_v50 }
 0x1a9   :  { %4017 = vmatpush3.msra.mxu1 %v6589_v39  ;;  %4028 = vmatpush3.msra.mxu0 %v8102_v45  ;;  %v167_v45 = vld [vmem:[#allocation2 + $0x400] sm:$0xff] }
 0x1aa   :  { %4018 = vmatprep.subr.mxu1 %v6596_v21  ;;  %4029 = vmatprep.subr.mxu0 %v8103_v9  ;;  %v8136_v9 = vld [vmem:[#allocation72_spill] sm:$0xff] }
 0x1ab   :  { %4019 = vmatpush3.msra.mxu1 %v6606_v7  ;;  %2923 = vmatprep.mubr.f32.mxu1 %v8104_v48  ;;  %v8137_v48 = vand.u32 4294901760, %v8136_v9  ;;  %v140_v9 = vld [vmem:[#allocation2 + $0x328] sm:$0xff] }
 0x1ac   :  { %4030 = vmatpush3.msra.mxu0 %v8105_v51  ;;  %2927 = vmatmul.mubr.f32.vlgmr.msra.gmra.mxu1 %v8106_v5 }
 0x1ad   :  { %4031 = vmatprep.subr.mxu0 %v8107_v10  ;;  %4058 = vmatprep.subr.mxu1 %v6256_v40  ;;  %v8112_v40 = vand.u32 4294901760, %v6421_v16 }
 0x1ae   :  { %4032 = vmatpush3.msra.mxu0 %v8108_v13  ;;  %4059 = vmatpush3.msra.mxu1 %v6258_v32  ;;  %v8113_v32 = vand.u32 4294901760, %v6462_v28  ;;  %v8117_v28 = vand.u32 4294901760, %v8081_v47  ;;  %v8130_v47 = vld [vmem:[#allocation64_spill] sm:$0xff] }
 0x1af   :  { %4033 = vmatprep.subr.mxu0 %v8109_v15  ;;  %4060 = vmatprep.subr.mxu1 %v6266_v24  ;;  %v8114_v24 = vand.u32 4294901760, %v8077_v33  ;;  %v164_v15 = vld [vmem:[#allocation2 + $0x3e8] sm:$0xff] }
 0x1b0   :  { %4034 = vmatpush3.msra.mxu0 %v8110_v54  ;;  %4061 = vmatpush3.msra.mxu1 %v6268_v35  ;;  %v8115_v35 = vand.u32 4294901760, %v6494_v56  ;;  %v8119_v56 = vand.u32 4294901760, %v6537_v44  ;;  %v8122_v44 = vand.u32 4294901760, %v6558_v22  ;;  %v8125_v22 = vld [vmem:[#allocation37_spill] sm:$0xff]  ;;  %v8140_v54 = vmov 0.0  }
 0x1b1   :  { %4035 = vmatprep.subr.mxu0 %v8111_v53  ;;  %4062 = vmatprep.subr.mxu1 %v6279_v17  ;;  %v8116_v17 = vand.u32 4294901760, %v6489_v29  ;;  %v179_v29 = vld [vmem:[#allocation2 + $0x460] sm:$0xff]  ;;  %v8126_v33 = vand.u32 4294901760, %v8125_v22 }
 0x1b2   :  { %4036 = vmatpush3.msra.mxu0 %v8112_v40  ;;  %4063 = vmatpush3.msra.mxu1 %v8075_v0  ;;  %v176_v0 = vld [vmem:[#allocation2 + $0x448] sm:$0xff]  ;;  %v6821_v52 = vand.u32 4294901760, %v179_v29  ;;  %v6872_v40 = vand.u32 4294901760, %v167_v45 }
 0x1b3   :  { %4037 = vmatprep.subr.mxu0 %v8113_v32  ;;  %4064 = vmatprep.subr.mxu1 %v8076_v6  ;;  %v8123_v6 = vand.u32 4294901760, %v6573_v23  ;;  %v161_v32 = vld [vmem:[#allocation2 + $0x3d0] sm:$0xff] }
 0x1b4   :  { %4038 = vmatpush3.msra.mxu0 %v8114_v24  ;;  %4065 = vmatpush3.msra.mxu1 %v8078_v62  ;;  %v8127_v62 = vld [vmem:[#allocation29_spill] sm:$0xff] }
 0x1b5   :  { %4039 = vmatprep.subr.mxu0 %v8115_v35  ;;  %4066 = vmatprep.subr.mxu1 %v8079_v1  ;;  %v6829_v1 = vand.u32 4294901760, %v176_v0  ;;  %v6885_v35 = vand.u32 4294901760, %v164_v15 }
 0x1b6   :  { %4040 = vmatpush3.msra.mxu0 %v8116_v17  ;;  %4067 = vmatpush3.msra.mxu1 %v8080_v55  ;;  %v8128_v55 = vld [vmem:[#allocation70_spill] sm:$0xff]  ;;  %v6895_v17 = vsub.f32 %v167_v45, %v6872_v40 }
 0x1b7   :  { %4041 = vmatprep.subr.mxu0 %v8117_v28  ;;  %4068 = vmatprep.subr.mxu1 %v8082_v31  ;;  %v8129_v23 = vand.u32 4294901760, %v8128_v55  ;;  %v6835_v31 = vsub.f32 %v182_v46, %v6815_v61  ;;  %v6897_v28 = vand.u32 4294901760, %v161_v32  ;;  %v146_v55 = vld [vmem:[#allocation2 + $0x358] sm:$0xff] }
 0x1b8   :  { %4042 = vmatpush3.msra.mxu0 %v8118_v12  ;;  %4069 = vmatpush3.msra.mxu1 %v8083_v18  ;;  %v1345_v36 = vpop.f32.mrf.mxu0  ;;  %v8132_v18 = vld [vmem:[#allocation31_spill] sm:$0xff] }
 0x1b9   :  { %4043 = vmatprep.subr.mxu0 %v8119_v56  ;;  %4070 = vmatprep.subr.mxu1 %v8084_v43  ;;  %v1346_v16 = vadd.f32 %v1345_v36, %v6675_v4  ;;  %v8124_v4 = vand.u32 4294901760, %v6569_v8  ;;  %v8131_v8 = vand.u32 4294901760, %v6614_v14  ;;  %v6841_v43 = vsub.f32 %v179_v29, %v6821_v52  ;;  %v155_v56 = vld [vmem:[#allocation2 + $0x3a0] sm:$0xff] }
 0x1ba   :  { %4044 = vmatpush3.msra.mxu0 %v8120_v3  ;;  %4071 = vmatpush3.msra.mxu1 %v8085_v30  ;;  %v1347_v27 = vpop.f32.mrf.mxu0  ;;  %v170_v30 = vld [vmem:[#allocation2 + $0x418] sm:$0xff]  ;;  %v6852_v14 = vsub.f32 %v176_v0, %v6829_v1  ;;  %v3298_v5 = vand.u32 4294901760, %v6835_v31  ;;  %v6908_v36 = vsub.f32 %v164_v15, %v6885_v35 }
 0x1bb   :  { %4045 = vmatprep.subr.mxu0 %v8121_v11  ;;  %4072 = vmatprep.subr.mxu1 %v8086_v60  ;;  %v1348_v63 = vadd.f32 %v1347_v27, %v6680_v19  ;;  %v173_v19 = vld [vmem:[#allocation2 + $0x430] sm:$0xff]  ;;  %v8133_v60 = vand.u32 4294901760, %v6618_v57  ;;  %v6859_v51 = vand.u32 4294901760, %v170_v30  ;;  %v3305_v13 = vand.u32 4294901760, %v6841_v43 }
 0x1bc   :  { %4046 = vmatpush3.msra.mxu0 %v8122_v44  ;;  %4073 = vmatpush3.msra.mxu1 %v8087_v34  ;;  %v8134_v34 = vld [vmem:[#allocation66_spill] sm:$0xff]  ;;  %v8138_v57 = vld [vmem:[#allocation99_spill] sm:$0xff]  ;;  %v3299_v24 = vsub.f32 %v6835_v31, %v3298_v5  ;;  %v6923_v11 = vand.u32 4294901760, %v155_v56  ;;  %v3333_v27 = vand.u32 4294901760, %v6895_v17 }
 0x1bd   :  { %4047 = vmatprep.subr.mxu0 %v8123_v6  ;;  %4074 = vmatprep.subr.mxu1 %v8088_v26  ;;  %v6846_v26 = vand.u32 4294901760, %v173_v19  ;;  %v3340_v6 = vand.u32 4294901760, %v6908_v36 }
 0x1be   :  { %4048 = vmatpush3.msra.mxu0 %v8124_v4  ;;  %4075 = vmatpush3.msra.mxu1 %v8089_v2  ;;  %v149_v4 = vld [vmem:[#allocation2 + $0x370] sm:$0xff] }
 0x1bf   :  { %4049 = vmatprep.subr.mxu0 %v8126_v33  ;;  %4076 = vmatprep.subr.mxu1 %v8127_v62  ;;  %v6870_v53 = vsub.f32 %v173_v19, %v6846_v26  ;;  %v6942_v33 = vsub.f32 %v155_v56, %v6923_v11  ;;  %v3334_v62 = vsub.f32 %v6895_v17, %v3333_v27 }
 0x1c0   :  { %4050 = vmatpush3.msra.mxu0 %v8129_v23  ;;  %4077 = vmatpush3.msra.mxu1 %v8130_v47  ;;  %v6950_v23 = vand.u32 4294901760, %v149_v4 }
 0x1c1   :  { %4051 = vmatprep.subr.mxu0 %v8131_v8  ;;  %4078 = vmatprep.subr.mxu1 %v8132_v18  ;;  %v1482_v2 = vpop.f32.mrf.mxu1  ;;  %v3319_v12 = vand.u32 4294901760, %v6870_v53  ;;  %v3341_v18 = vsub.f32 %v6908_v36, %v3340_v6  ;;  %v3361_v45 = vand.u32 4294901760, %v6942_v33 }
 0x1c2   :  { %4052 = vmatpush3.msra.mxu0 %v8133_v60  ;;  %4079 = vmatpush3.msra.mxu1 %v8134_v34  ;;  %v6854_v50 = vadd.f32 %v1482_v2, %v1346_v16  ;;  %v152_v16 = vld [vmem:[#allocation2 + $0x388] sm:$0xff]  ;;  %v143_v60 = vld [vmem:[#allocation2 + $0x340] sm:$0xff]  ;;  %v6962_v34 = vand.u32 4294901760, %v146_v55  ;;  %v3335_v2 = vand.u32 4294901760, %v3334_v62 }
 0x1c3   :  { %4053 = vmatprep.subr.mxu0 %v8135_v42  ;;  %4080 = vmatprep.subr.mxu1 %v6515_v25  ;;  %v1484_v10 = vpop.f32.mrf.mxu1  ;;  %v3320_v29 = vsub.f32 %v6870_v53, %v3319_v12  ;;  %v6935_v0 = vand.u32 4294901760, %v152_v16 }
 0x1c4   :  { %4054 = vmatpush3.msra.mxu0 %v8137_v48  ;;  %3093 = vmatprep.mubr.f32.mxu0 %v8138_v57  ;;  %v6864_v25 = vadd.f32 %v1484_v10, %v1348_v63  ;;  %v6972_v48 = vsub.f32 %v149_v4, %v6950_v23  ;;  %v3342_v10 = vand.u32 4294901760, %v3341_v18 }
 0x1c5   :  { %4081 = vmatpush3.msra.mxu1 %v8094_v20  ;;  %3095 = vmatmul.mubr.f32.vlgmr.msra.gmra.mxu0 %v8139_v38  ;;  %v3312_v20 = vand.u32 4294901760, %v6852_v14  ;;  %v3321_v22 = vand.u32 4294901760, %v3320_v29  ;;  %v6954_v8 = vsub.f32 %v152_v16, %v6935_v0 }
 0x1c6   :  { %4082 = vmatprep.subr.mxu1 %v8096_v37  ;;  %4195 = vmatprep.subr.mxu0 %v8140_v54  ;;  %v6880_v37 = vsub.f32 %v170_v30, %v6859_v51 }
 0x1c7   :  { %4083 = vmatpush3.msra.mxu1 %v6534_v41  ;;  %4196 = vmatpush3.msra.mxu0 %v6815_v61  ;;  %v3306_v41 = vsub.f32 %v6841_v43, %v3305_v13  ;;  %v3368_v15 = vand.u32 4294901760, %v6954_v8 }
 0x1c8   :  { %4084 = vmatprep.subr.mxu1 %v6561_v59  ;;  %4197 = vmatprep.subr.mxu0 %v8140_v54  ;;  %v158_v59 = vld [vmem:[#allocation2 + $0x3b8] sm:$0xff]  ;;  %v3326_v3 = vand.u32 4294901760, %v6880_v37 }
 0x1c9   :  { %4085 = vmatpush3.msra.mxu1 %v6551_v49  ;;  %4198 = vmatpush3.msra.mxu0 %v6821_v52  ;;  %v3313_v49 = vsub.f32 %v6852_v14, %v3312_v20  ;;  %v6910_v46 = vand.u32 4294901760, %v158_v59 }
 0x1ca   :  { %4086 = vmatprep.subr.mxu1 %v6579_v58  ;;  %4199 = vmatprep.subr.mxu0 %v8140_v54  ;;  %v3300_v58 = vand.u32 4294901760, %v3299_v24  ;;  %v3327_v63 = vsub.f32 %v6880_v37, %v3326_v3  ;;  %v6984_v24 = vsub.f32 %v146_v55, %v6962_v34 }
 0x1cb   :  { %4087 = vmatpush3.msra.mxu1 %v6589_v39  ;;  %4200 = vmatpush3.msra.mxu0 %v6829_v1  ;;  %v3307_v39 = vand.u32 4294901760, %v3306_v41  ;;  %v6930_v44 = vsub.f32 %v158_v59, %v6910_v46  ;;  %v6986_v41 = vand.u32 4294901760, %v140_v9 }
 0x1cc   :  { %4088 = vmatprep.subr.mxu1 %v6596_v21  ;;  %4201 = vmatprep.subr.mxu0 %v8140_v54  ;;  %v6918_v21 = vsub.f32 %v161_v32, %v6897_v28  ;;  %v3328_v47 = vand.u32 4294901760, %v3327_v63  ;;  %v137_v32 = vld [vmem:[#allocation2 + $0x310] sm:$0xff] }
 0x1cd   :  { %4089 = vmatpush3.msra.mxu1 %v6606_v7  ;;  %3197 = vmatprep.mubr.f32.mxu1 %v8138_v57  ;;  %v3314_v7 = vand.u32 4294901760, %v3313_v49  ;;  %v3354_v30 = vand.u32 4294901760, %v6930_v44  ;;  %v6974_v57 = vand.u32 4294901760, %v143_v60  ;;  %v3362_v49 = vsub.f32 %v6942_v33, %v3361_v45 }
 0x1ce   :  { %4202 = vmatpush3.msra.mxu0 %v6846_v26  ;;  %3199 = vmatmul.mubr.f32.vlgmr.msra.gmra.mxu1 %v8139_v38  ;;  %v3347_v19 = vand.u32 4294901760, %v6918_v21  ;;  %v7008_v4 = vsub.f32 %v140_v9, %v6986_v41 }
 0x1cf   :  { %4203 = vmatprep.subr.mxu0 %v8140_v54  ;;  %4230 = vmatprep.subr.mxu1 %v8140_v54  ;;  %v3355_v38 = vsub.f32 %v6930_v44, %v3354_v30  ;;  %v6995_v56 = vsub.f32 %v143_v60, %v6974_v57  ;;  %v3363_v55 = vand.u32 4294901760, %v3362_v49 }
 0x1d0   :  { %4204 = vmatpush3.msra.mxu0 %v6859_v51  ;;  %4231 = vmatpush3.msra.mxu1 %v3300_v58  ;;  %v3348_v42 = vsub.f32 %v6918_v21, %v3347_v19  ;;  %v6997_v58 = vand.u32 4294901760, %v137_v32 }
 0x1d1   :  { %4205 = vmatprep.subr.mxu0 %v8140_v54  ;;  %4232 = vmatprep.subr.mxu1 %v8140_v54  ;;  %v3356_v29 = vand.u32 4294901760, %v3355_v38  ;;  %v3389_v60 = vand.u32 4294901760, %v6995_v56 }
 0x1d2   :  { %4206 = vmatpush3.msra.mxu0 %v6872_v40  ;;  %4233 = vmatpush3.msra.mxu1 %v3307_v39  ;;  %v3349_v59 = vand.u32 4294901760, %v3348_v42  ;;  %v3375_v39 = vand.u32 4294901760, %v6972_v48  ;;  %v3396_v42 = vand.u32 4294901760, %v7008_v4 }
 0x1d3   :  { %4207 = vmatprep.subr.mxu0 %v8140_v54  ;;  %4234 = vmatprep.subr.mxu1 %v8140_v54 }
 0x1d4   :  { %4208 = vmatpush3.msra.mxu0 %v6885_v35  ;;  %4235 = vmatpush3.msra.mxu1 %v3314_v7  ;;  %v3369_v7 = vsub.f32 %v6954_v8, %v3368_v15  ;;  %v3376_v18 = vsub.f32 %v6972_v48, %v3375_v39  ;;  %v3397_v49 = vsub.f32 %v7008_v4, %v3396_v42 }
 0x1d5   :  { %4209 = vmatprep.subr.mxu0 %v8140_v54  ;;  %4236 = vmatprep.subr.mxu1 %v8140_v54 }
 0x1d6   :  { %4210 = vmatpush3.msra.mxu0 %v6897_v28  ;;  %4237 = vmatpush3.msra.mxu1 %v3321_v22  ;;  %v3382_v22 = vand.u32 4294901760, %v6984_v24  ;;  %v3377_v9 = vand.u32 4294901760, %v3376_v18 }
 0x1d7   :  { %4211 = vmatprep.subr.mxu0 %v8140_v54  ;;  %4238 = vmatprep.subr.mxu1 %v8140_v54 }
 0x1d8   :  { %4212 = vmatpush3.msra.mxu0 %v6910_v46  ;;  %4239 = vmatpush3.msra.mxu1 %v3328_v47 }
 0x1d9   :  { %4213 = vmatprep.subr.mxu0 %v8140_v54  ;;  %4240 = vmatprep.subr.mxu1 %v8140_v54 }
 0x1da   :  { %4214 = vmatpush3.msra.mxu0 %v6923_v11  ;;  %4241 = vmatpush3.msra.mxu1 %v3335_v2  ;;  %v3370_v2 = vand.u32 4294901760, %v3369_v7  ;;  %v8141_v7 = vld [vmem:[#allocation48_spill] sm:$0xff] }
 0x1db   :  { %4215 = vmatprep.subr.mxu0 %v8140_v54  ;;  %4242 = vmatprep.subr.mxu1 %v8140_v54  ;;  %v1590_v16 = vpop.f32.mrf.mxu0 }
 0x1dc   :  { %4216 = vmatpush3.msra.mxu0 %v6935_v0  ;;  %4243 = vmatpush3.msra.mxu1 %v3342_v10  ;;  %v1591_v63 = vadd.f32 %v1590_v16, %v6854_v50  ;;  %v7016_v50 = vsub.f32 %v137_v32, %v6997_v58  ;;  %v3390_v10 = vsub.f32 %v6995_v56, %v3389_v60 }
 0x1dd   :  { %4217 = vmatprep.subr.mxu0 %v8140_v54  ;;  %4244 = vmatprep.subr.mxu1 %v8140_v54  ;;  %v1592_v62 = vpop.f32.mrf.mxu0 }
 0x1de   :  { %4218 = vmatpush3.msra.mxu0 %v6950_v23  ;;  %4245 = vmatpush3.msra.mxu1 %v3349_v59  ;;  %v1593_v47 = vadd.f32 %v1592_v62, %v6864_v25  ;;  %v3383_v25 = vsub.f32 %v6984_v24, %v3382_v22  ;;  %v3403_v38 = vand.u32 4294901760, %v7016_v50  ;;  %v3391_v62 = vand.u32 4294901760, %v3390_v10 }
 0x1df   :  { %4219 = vmatprep.subr.mxu0 %v8140_v54  ;;  %4246 = vmatprep.subr.mxu1 %v8140_v54 }
 0x1e0   :  { %4220 = vmatpush3.msra.mxu0 %v6962_v34  ;;  %4247 = vmatpush3.msra.mxu1 %v3356_v29  ;;  %v3384_v59 = vand.u32 4294901760, %v3383_v25 }
 0x1e1   :  { %4221 = vmatprep.subr.mxu0 %v8140_v54  ;;  %4248 = vmatprep.subr.mxu1 %v8140_v54 }
 0x1e2   :  { %4222 = vmatpush3.msra.mxu0 %v6974_v57  ;;  %4249 = vmatpush3.msra.mxu1 %v3363_v55  ;;  %v3404_v55 = vsub.f32 %v7016_v50, %v3403_v38 }
 0x1e3   :  { %4223 = vmatprep.subr.mxu0 %v8140_v54  ;;  %4250 = vmatprep.subr.mxu1 %v8140_v54 }
 0x1e4   :  { %4224 = vmatpush3.msra.mxu0 %v6986_v41  ;;  %4251 = vmatpush3.msra.mxu1 %v3370_v2  ;;  %v1822_v32 = vpop.f32.mrf.mxu1  ;;  %v3405_v2 = vand.u32 4294901760, %v3404_v55 }
 0x1e5   :  { %4225 = vmatprep.subr.mxu0 %v8140_v54  ;;  %4252 = vmatprep.subr.mxu1 %v8140_v54  ;;  %v1823_v16 = vadd.f32 %v1822_v32, %v1591_v63  ;;  %v3398_v63 = vand.u32 4294901760, %v3397_v49 }
 0x1e6   :  { %4226 = vmatpush3.msra.mxu0 %v6997_v58  ;;  %4227 = vmatprep.mubr.msk.f32.mxu0 %vm4487_vm0, %v8140_v54  ;;  %v1824_v29 = vpop.f32.mrf.mxu1 }
 0x1e7   :  { %4253 = vmatpush3.msra.mxu1 %v3377_v9  ;;  %4228 = vmatmul.mubr.f32.vlgmr.msra.gmra.mxu0 %v8141_v7  ;;  %v1825_v18 = vadd.f32 %v1824_v29, %v1593_v47  ;;  %v8142_v47 = vld [vmem:[#allocation16_spill] sm:$0xff]  ;;  %v8143_v29 = vld [vmem:[#allocation17_spill] sm:$0xff] }
 0x1e8   :  { %4254 = vmatprep.subr.mxu1 %v8140_v54  ;;  %4265 = vmatprep.subr.mxu0 %v8140_v54 }
 0x1e9   :  { %4255 = vmatpush3.msra.mxu1 %v3384_v59  ;;  %4266 = vmatpush3.msra.mxu0 %v6835_v31  ;;  %v8144_v31 = vld [vmem:[#allocation18_spill] sm:$0xff] }
 0x1ea   :  { %4256 = vmatprep.subr.mxu1 %v8140_v54  ;;  %4267 = vmatprep.subr.mxu0 %v8140_v54 }
 0x1eb   :  { %4257 = vmatpush3.msra.mxu1 %v3391_v62  ;;  %4268 = vmatpush3.msra.mxu0 %v6841_v43 }
 0x1ec   :  { %4258 = vmatprep.subr.mxu1 %v8140_v54  ;;  %4269 = vmatprep.subr.mxu0 %v8140_v54 }
 0x1ed   :  { %4259 = vmatpush3.msra.mxu1 %v3398_v63  ;;  %4270 = vmatpush3.msra.mxu0 %v6852_v14 }
 0x1ee   :  { %4260 = vmatprep.subr.mxu1 %v8140_v54  ;;  %4271 = vmatprep.subr.mxu0 %v8140_v54 }
 0x1ef   :  { %4261 = vmatpush3.msra.mxu1 %v3405_v2  ;;  %4262 = vmatprep.mubr.msk.f32.mxu1 %vm4487_vm0, %v8140_v54 }
 0x1f0   :  { %4272 = vmatpush3.msra.mxu0 %v6870_v53  ;;  %4263 = vmatmul.mubr.f32.vlgmr.msra.gmra.mxu1 %v8142_v47 }
 0x1f1   :  { %4273 = vmatprep.subr.mxu0 %v8140_v54  ;;  %4300 = vmatprep.subr.mxu1 %v8140_v54 }
 0x1f2   :  { %4274 = vmatpush3.msra.mxu0 %v6880_v37  ;;  %4301 = vmatpush3.msra.mxu1 %v6815_v61 }
 0x1f3   :  { %4275 = vmatprep.subr.mxu0 %v8140_v54  ;;  %4302 = vmatprep.subr.mxu1 %v8140_v54 }
 0x1f4   :  { %4276 = vmatpush3.msra.mxu0 %v6895_v17  ;;  %4303 = vmatpush3.msra.mxu1 %v6821_v52 }
 0x1f5   :  { %4277 = vmatprep.subr.mxu0 %v8140_v54  ;;  %4304 = vmatprep.subr.mxu1 %v8140_v54 }
 0x1f6   :  { %4278 = vmatpush3.msra.mxu0 %v6908_v36  ;;  %4305 = vmatpush3.msra.mxu1 %v6829_v1 }
 0x1f7   :  { %4279 = vmatprep.subr.mxu0 %v8140_v54  ;;  %4306 = vmatprep.subr.mxu1 %v8140_v54 }
 0x1f8   :  { %4280 = vmatpush3.msra.mxu0 %v6918_v21  ;;  %4307 = vmatpush3.msra.mxu1 %v6846_v26 }
 0x1f9   :  { %4281 = vmatprep.subr.mxu0 %v8140_v54  ;;  %4308 = vmatprep.subr.mxu1 %v8140_v54 }
 0x1fa   :  { %4282 = vmatpush3.msra.mxu0 %v6930_v44  ;;  %4309 = vmatpush3.msra.mxu1 %v6859_v51 }
 0x1fb   :  { %4283 = vmatprep.subr.mxu0 %v8140_v54  ;;  %4310 = vmatprep.subr.mxu1 %v8140_v54 }
 0x1fc   :  { %4284 = vmatpush3.msra.mxu0 %v6942_v33  ;;  %4311 = vmatpush3.msra.mxu1 %v6872_v40 }
 0x1fd   :  { %4285 = vmatprep.subr.mxu0 %v8140_v54  ;;  %4312 = vmatprep.subr.mxu1 %v8140_v54  ;;  %v1959_v25 = vpop.f32.mrf.mxu0 }
 0x1fe   :  { %4286 = vmatpush3.msra.mxu0 %v6954_v8  ;;  %4313 = vmatpush3.msra.mxu1 %v6885_v35  ;;  %v1960_v9 = vadd.f32 %v1959_v25, %v1823_v16  ;;  %v4414_v25 = vld [vmem:[#allocation5] sm:$0x3f] }
 0x1ff   :  { %4287 = vmatprep.subr.mxu0 %v8140_v54  ;;  %4314 = vmatprep.subr.mxu1 %v8140_v54  ;;  %v1961_v10 = vpop.f32.mrf.mxu0 }
 0x200   :  { %4288 = vmatpush3.msra.mxu0 %v6972_v48  ;;  %4315 = vmatpush3.msra.mxu1 %v6897_v28  ;;  %v1962_v32 = vadd.f32 %v1961_v10, %v1825_v18  ;;  %v8145_v18 = vld [vmem:[#allocation11_spill] sm:$0xff] }
 0x201   :  { %4289 = vmatprep.subr.mxu0 %v8140_v54  ;;  %4316 = vmatprep.subr.mxu1 %v8140_v54 }
 0x202   :  { %4290 = vmatpush3.msra.mxu0 %v6984_v24  ;;  %4317 = vmatpush3.msra.mxu1 %v6910_v46 }
 0x203   :  { %4291 = vmatprep.subr.mxu0 %v8140_v54  ;;  %4318 = vmatprep.subr.mxu1 %v8140_v54 }
 0x204   :  { %4292 = vmatpush3.msra.mxu0 %v6995_v56  ;;  %4319 = vmatpush3.msra.mxu1 %v6923_v11 }
 0x205   :  { %4293 = vmatprep.subr.mxu0 %v8140_v54  ;;  %4320 = vmatprep.subr.mxu1 %v8140_v54 }
 0x206   :  { %4294 = vmatpush3.msra.mxu0 %v7008_v4  ;;  %4321 = vmatpush3.msra.mxu1 %v6935_v0  ;;  %v2065_v59 = vpop.f32.mrf.mxu1 }
 0x207   :  { %4295 = vmatprep.subr.mxu0 %v8140_v54  ;;  %4322 = vmatprep.subr.mxu1 %v8140_v54  ;;  %v2066_v49 = vadd.f32 %v2065_v59, %v1960_v9 }
 0x208   :  { %4296 = vmatpush3.msra.mxu0 %v7016_v50  ;;  %4297 = vmatprep.mubr.msk.f32.mxu0 %vm4487_vm0, %v8140_v54  ;;  %v2067_v16 = vpop.f32.mrf.mxu1 }
 0x209   :  { %4323 = vmatpush3.msra.mxu1 %v6950_v23  ;;  %4298 = vmatmul.mubr.f32.vlgmr.msra.gmra.mxu0 %v8143_v29  ;;  %v2068_v7 = vadd.f32 %v2067_v16, %v1962_v32 }
 0x20a   :  { %4324 = vmatprep.subr.mxu1 %v8140_v54  ;;  %4335 = vmatprep.subr.mxu0 %v8140_v54 }
 0x20b   :  { %4325 = vmatpush3.msra.mxu1 %v6962_v34  ;;  %4336 = vmatpush3.msra.mxu0 %v3298_v5 }
 0x20c   :  { %4326 = vmatprep.subr.mxu1 %v8140_v54  ;;  %4337 = vmatprep.subr.mxu0 %v8140_v54 }
 0x20d   :  { %4327 = vmatpush3.msra.mxu1 %v6974_v57  ;;  %4338 = vmatpush3.msra.mxu0 %v3305_v13 }
 0x20e   :  { %4328 = vmatprep.subr.mxu1 %v8140_v54  ;;  %4339 = vmatprep.subr.mxu0 %v8140_v54 }
 0x20f   :  { %4329 = vmatpush3.msra.mxu1 %v6986_v41  ;;  %4340 = vmatpush3.msra.mxu0 %v3312_v20 }
 0x210   :  { %4330 = vmatprep.subr.mxu1 %v8140_v54  ;;  %4341 = vmatprep.subr.mxu0 %v8140_v54 }
 0x211   :  { %4331 = vmatpush3.msra.mxu1 %v6997_v58  ;;  %4332 = vmatprep.mubr.msk.f32.mxu1 %vm4487_vm0, %v8140_v54 }
 0x212   :  { %4342 = vmatpush3.msra.mxu0 %v3319_v12  ;;  %4333 = vmatmul.mubr.f32.vlgmr.msra.gmra.mxu1 %v8144_v31 }
 0x213   :  { %4343 = vmatprep.subr.mxu0 %v8140_v54  ;;  %4370 = vmatprep.subr.mxu1 %v8140_v54 }
 0x214   :  { %4344 = vmatpush3.msra.mxu0 %v3326_v3  ;;  %4371 = vmatpush3.msra.mxu1 %v6815_v61 }
 0x215   :  { %4345 = vmatprep.subr.mxu0 %v8140_v54  ;;  %4372 = vmatprep.subr.mxu1 %v8140_v54 }
 0x216   :  { %4346 = vmatpush3.msra.mxu0 %v3333_v27  ;;  %4373 = vmatpush3.msra.mxu1 %v6821_v52 }
 0x217   :  { %4347 = vmatprep.subr.mxu0 %v8140_v54  ;;  %4374 = vmatprep.subr.mxu1 %v8140_v54 }
 0x218   :  { %4348 = vmatpush3.msra.mxu0 %v3340_v6  ;;  %4375 = vmatpush3.msra.mxu1 %v6829_v1 }
 0x219   :  { %4349 = vmatprep.subr.mxu0 %v8140_v54  ;;  %4376 = vmatprep.subr.mxu1 %v8140_v54 }
 0x21a   :  { %4350 = vmatpush3.msra.mxu0 %v3347_v19  ;;  %4377 = vmatpush3.msra.mxu1 %v6846_v26 }
 0x21b   :  { %4351 = vmatprep.subr.mxu0 %v8140_v54  ;;  %4378 = vmatprep.subr.mxu1 %v8140_v54 }
 0x21c   :  { %4352 = vmatpush3.msra.mxu0 %v3354_v30  ;;  %4379 = vmatpush3.msra.mxu1 %v6859_v51 }
 0x21d   :  { %4353 = vmatprep.subr.mxu0 %v8140_v54  ;;  %4380 = vmatprep.subr.mxu1 %v8140_v54 }
 0x21e   :  { %4354 = vmatpush3.msra.mxu0 %v3361_v45  ;;  %4381 = vmatpush3.msra.mxu1 %v6872_v40 }
 0x21f   :  { %4355 = vmatprep.subr.mxu0 %v8140_v54  ;;  %4382 = vmatprep.subr.mxu1 %v8140_v54  ;;  %v2233_v61 = vpop.f32.mrf.mxu0 }
 0x220   :  { %4356 = vmatpush3.msra.mxu0 %v3368_v15  ;;  %4383 = vmatpush3.msra.mxu1 %v6885_v35  ;;  %v2234_v52 = vadd.f32 %v2233_v61, %v2066_v49 }
 0x221   :  { %4357 = vmatprep.subr.mxu0 %v8140_v54  ;;  %4384 = vmatprep.subr.mxu1 %v8140_v54  ;;  %v2235_v1 = vpop.f32.mrf.mxu0 }
 0x222   :  { %4358 = vmatpush3.msra.mxu0 %v3375_v39  ;;  %4385 = vmatpush3.msra.mxu1 %v6897_v28  ;;  %v2236_v43 = vadd.f32 %v2235_v1, %v2068_v7 }
 0x223   :  { %4359 = vmatprep.subr.mxu0 %v8140_v54  ;;  %4386 = vmatprep.subr.mxu1 %v8140_v54 }
 0x224   :  { %4360 = vmatpush3.msra.mxu0 %v3382_v22  ;;  %4387 = vmatpush3.msra.mxu1 %v6910_v46 }
 0x225   :  { %4361 = vmatprep.subr.mxu0 %v8140_v54  ;;  %4388 = vmatprep.subr.mxu1 %v8140_v54 }
 0x226   :  { %4362 = vmatpush3.msra.mxu0 %v3389_v60  ;;  %4389 = vmatpush3.msra.mxu1 %v6923_v11 }
 0x227   :  { %4363 = vmatprep.subr.mxu0 %v8140_v54  ;;  %4390 = vmatprep.subr.mxu1 %v8140_v54 }
 0x228   :  { %4364 = vmatpush3.msra.mxu0 %v3396_v42  ;;  %4391 = vmatpush3.msra.mxu1 %v6935_v0  ;;  %v2337_v26 = vpop.f32.mrf.mxu1 }
 0x229   :  { %4365 = vmatprep.subr.mxu0 %v8140_v54  ;;  %4392 = vmatprep.subr.mxu1 %v8140_v54  ;;  %v2338_v14 = vadd.f32 %v2337_v26, %v2234_v52 }
 0x22a   :  { %4366 = vmatpush3.msra.mxu0 %v3403_v38  ;;  %4367 = vmatprep.mubr.msk.f32.mxu0 %vm4487_vm0, %v8140_v54  ;;  %v2339_v51 = vpop.f32.mrf.mxu1 }
 0x22b   :  { %4393 = vmatpush3.msra.mxu1 %v6950_v23  ;;  %4368 = vmatmul.mubr.f32.vlgmr.msra.gmra.mxu0 %v8142_v47  ;;  %v2340_v5 = vadd.f32 %v2339_v51, %v2236_v43 }
 0x22c   :  { %4394 = vmatprep.subr.mxu1 %v8140_v54  ;;  %4402 = vmatprep.mubr.msk.f32.mxu1 %vm4487_vm0, %v8140_v54 }
 0x22d   :  { %4395 = vmatpush3.msra.mxu1 %v6962_v34  ;;  %v3848_v13 = vcombine.low %v2338_v14, %v2340_v5 }
 0x22e   :  { %4396 = vmatprep.subr.mxu1 %v8140_v54 }
 0x22f   :  { %4397 = vmatpush3.msra.mxu1 %v6974_v57  ;;  %v3855_v63 = vrot.slane %v3848_v13, %v8145_v18 }
 0x230   :  { %4398 = vmatprep.subr.mxu1 %v8140_v54 }
 0x231   :  { %4399 = vmatpush3.msra.mxu1 %v6986_v41 }
 0x232   :  { %4400 = vmatprep.subr.mxu1 %v8140_v54 }
 0x233   :  { %4401 = vmatpush3.msra.mxu1 %v6997_v58 }
 0x234   :  { %4403 = vmatmul.mubr.f32.vlgmr.msra.gmra.mxu1 %v8142_v47 }
 0x242   :  { %v3915_v53 = vpop.f32.mrf.mxu0 }
 0x244   :  { %v3916_v40 = vpop.f32.mrf.mxu0 }
 0x245   :  { %v3917_v20 = vadd.f32 %v3916_v40, %v3915_v53 }
 0x24a   :  { %v3950_v37 = vpop.f32.mrf.mxu1 }
 0x24c   :  { %v3951_v35 = vpop.f32.mrf.mxu1 }
 0x24d   :  { %v3952_v17 = vadd.f32 %v3951_v35, %v3950_v37 }
 0x24f   :  { %v2683_v36 = vadd.f32 %v3952_v17, %v3917_v20 }
 0x263   :  { %v3985_v28 = vpop.f32.mrf.mxu0 }
 0x265   :  { %v3986_v12 = vpop.f32.mrf.mxu0 }
 0x266   :  { %v3987_v46 = vadd.f32 %v3986_v12, %v3985_v28 }
 0x268   :  { %v2821_v3 = vadd.f32 %v3987_v46, %v2683_v36 }
 0x26c   :  { %v4020_v21 = vpop.f32.mrf.mxu1 }
 0x26e   :  { %v4021_v11 = vpop.f32.mrf.mxu1 }
 0x26f   :  { %v4022_v27 = vadd.f32 %v4021_v11, %v4020_v21 }
 0x271   :  { %v2929_v0 = vadd.f32 %v4022_v27, %v2821_v3 }
 0x285   :  { %v4055_v44 = vpop.f32.mrf.mxu0 }
 0x287   :  { %v4056_v54 = vpop.f32.mrf.mxu0 }
 0x288   :  { %v4057_v6 = vadd.f32 %v4056_v54, %v4055_v44 }
 0x28a   :  { %v3097_v33 = vadd.f32 %v4057_v6, %v2929_v0 }
 0x28e   :  { %v4090_v19 = vpop.f32.mrf.mxu1 }
 0x290   :  { %v4091_v23 = vpop.f32.mrf.mxu1 }
 0x291   :  { %v4092_v8 = vadd.f32 %v4091_v23, %v4090_v19 }
 0x293   :  { %v3201_v30 = vadd.f32 %v4092_v8, %v3097_v33 }
 0x2a7   :  { %v3291_v34 = vpop.f32.mrf.mxu0 }
 0x2a8   :  { %v3292_v45 = vadd.f32 %v3291_v34, %v3201_v30 }
 0x2a9   :  { %v4229_v48 = vpop.f32.mrf.mxu0 }
 0x2b0   :  { %v3442_v57 = vpop.f32.mrf.mxu1 }
 0x2b1   :  { %v3443_v4 = vadd.f32 %v3442_v57, %v3292_v45 }
 0x2b2   :  { %v4264_v15 = vpop.f32.mrf.mxu1 }
 0x2c9   :  { %v3546_v24 = vpop.f32.mrf.mxu0 }
 0x2ca   :  { %v3547_v50 = vadd.f32 %v3546_v24, %v3443_v4 }
 0x2cb   :  { %v4299_v41 = vpop.f32.mrf.mxu0 }
 0x2d2   :  { %v3635_v56 = vpop.f32.mrf.mxu1 }
 0x2d3   :  { %v3636_v60 = vadd.f32 %v3635_v56, %v3547_v50 }
 0x2d4   :  { %v4334_v58 = vpop.f32.mrf.mxu1 }
 0x2eb   :  { %v3754_v39 = vpop.f32.mrf.mxu0 }
 0x2ec   :  { %v3755_v42 = vadd.f32 %v3754_v39, %v3636_v60 }
 0x2ed   :  { %v4369_v22 = vpop.f32.mrf.mxu0 }
 0x2f4   :  { %v3841_v38 = vpop.f32.mrf.mxu1 }
 0x2f5   :  { %v3842_v62 = vadd.f32 %v3841_v38, %v3755_v42 }
 0x2f6   :  { %v4404_v55 = vpop.f32.mrf.mxu1 }
 0x2f7   :  { %v3862_v2 = vrot.slane %v3842_v62, %v8145_v18 }
 0x2f9   :  { %v3863_v47 = vcombine.low %v3855_v63, %v3862_v2 }
 0x2fb   :  { %v3865_v9 = vsub.f32 %v4414_v25, %v3863_v47 }
 0x2fd   :  { %3866 = vst [vmem:[#allocation7] sm:$0x3f] %v3865_v9 }
 0x2fe   :  { %4466 = shalt.err (!%p4463_p0)
}
 0x2ff   :  { %3876 = dma.vmem_to_hbm [thread:$0]  %s3874_s1, 96, %s7219_s2, [#allocation4]  }
 0x300   :  { %4479 = dma.done.wait [#allocation4], 96  }
 0x301   :  { %4480 = vsyncadd [#allocation4], 4294967200 }
 0x302   :  { %3880 = vsyncpa [#allocation3], 1 }
 0x303   :  { %3881 = vsyncpa [#allocation6], 1 }
 0x304   :  { %3882 = vsyncpa [#allocation4], 1 }

</bundles_post_ra>
